<compile_context>
chip_gen: v6e
topology: v6e:2x2x1
jax: 0.10.0
libtpu: 0.0.40
codegen_flags: <defaults>
</compile_context>

<pallas_src>
import functools

import jax
import jax.numpy as jnp
import numpy as np
from jax.experimental import pallas as pl
from jax.experimental.pallas import tpu as pltpu


# ------------------------------- helpers ----------------------------------- #

def _largest_divisor(n, candidates):
    for c in candidates:
        if n % c == 0:
            return c
    return n


def _padded_bytes(shape, dtype):
    """VMEM footprint of a buffer after dtype-aware (sublane, 128) padding."""
    dt = jnp.dtype(dtype)
    shape = tuple(int(d) for d in shape)
    if len(shape) == 0:
        shape = (1, 1)
    elif len(shape) == 1:
        shape = (1,) + shape
    lead = 1
    for d in shape[:-2]:
        lead *= d
    sub_tile = max(8, 32 // dt.itemsize)          # f32: 8, bf16: 16, int8: 32
    sub = ((shape[-2] + sub_tile - 1) // sub_tile) * sub_tile
    lane = ((shape[-1] + 127) // 128) * 128
    return lead * sub * lane * dt.itemsize


def _pad_batch(b):
    """Pad batch so that either 8 % b == 0 (small b) or b % 8 == 0."""
    if b >= 8:
        return ((b + 7) // 8) * 8
    for c in (1, 2, 4, 8):
        if c >= b:
            return c
    return 8


def _choose_tt(T, spb, B, max_rows=512):
    """Time steps per grid block: a multiple of spb, roughly <= max_rows rows."""
    cap = max(spb, ((max_rows // max(B, 1)) // spb) * spb)
    want = ((T + spb - 1) // spb) * spb
    return max(spb, min(cap, want))


# ------------------ kernel 1: time-parallel input projection --------------- #

def _proj_kernel(x_ref, w_ref, b_ref, o_ref):
    acc = jnp.dot(x_ref[...].astype(w_ref.dtype), w_ref[...],
                  preferred_element_type=jnp.float32)
    o_ref[...] = (acc + b_ref[...]).astype(o_ref.dtype)


def _input_projection(x_flat, w, b):
    """gates_x = x_flat @ w + b for all time steps at once.

    x_flat: (M, D) f32 (M multiple of 8), w: (D, 4H) compute dtype,
    b: (1, 4H) f32  ->  (M, 4H) f32.
    """
    M, D = x_flat.shape
    N = w.shape[1]
    TM = _largest_divisor(M, (512, 256, 128, 64, 32, 16, 8))
    grid_spec = pltpu.PrefetchScalarGridSpec(
        num_scalar_prefetch=0,
        grid=(M // TM,),
        in_specs=[
            pl.BlockSpec((TM, D), lambda m: (m, 0)),
            pl.BlockSpec((D, N), lambda m: (0, 0)),
            pl.BlockSpec((1, N), lambda m: (0, 0)),
        ],
        out_specs=pl.BlockSpec((TM, N), lambda m: (m, 0)),
    )
    return pl.pallas_call(
        _proj_kernel,
        out_shape=jax.ShapeDtypeStruct((M, N), jnp.float32),
        grid_spec=grid_spec,
        compiler_params=pltpu.CompilerParams(
            dimension_semantics=("parallel",)),
    )(x_flat, w, b)


# -------------- kernel 2: fused multi-layer recurrent LSTM ------------------ #

def _fused_lstm_kernel(gx0_ref, whh_ref, wih_ref, brest_ref,
                       out_ref, hn_ref, cn_ref, act_sc, gxl_sc,
                       *, spb, tt, t_valid, mask_tail):
    """tt time steps of all layers per grid iteration.

    gx0_ref  : (tt*B, 4H) f32   precomputed x @ W_ih0^T + b0 for this block
    whh_ref  : (L, H, 4H)       per-layer recurrent weights (W_hh^T), cdt
    wih_ref  : (L-1, H, 4H)     per-layer input weights for l >= 1 (W_ih^T)
    brest_ref: (L-1, 1, 4H) f32 fused biases for layers >= 1
    out_ref  : (tt*B, H) f32    last-layer hidden states for this block
    hn_ref   : (L, B, H) f32    recurrent h state (VMEM-resident accumulator)
    cn_ref   : (L, B, H) f32    recurrent c state (VMEM-resident accumulator)
    act_sc   : (tt*B, H) f32    inter-layer activations (VMEM scratch)
    gxl_sc   : (tt*B, 4H) f32   hoisted layer-l input gates (VMEM scratch)
    """
    tb = pl.program_id(0)
    L, B, H = hn_ref.shape
    RS = spb * B                       # rows per aligned slab (multiple of 8)
    n_slab = tt // spb
    cdt = whh_ref.dtype                # matmul operand dtype (bf16 or f32)

    @pl.when(tb == 0)
    def _init():
        hn_ref[...] = jnp.zeros_like(hn_ref)
        cn_ref[...] = jnp.zeros_like(cn_ref)

    def lstm_cell(gates, c_prev):
        # PyTorch gate order i, f, g, o; elementwise math stays in f32.
        i = jax.nn.sigmoid(gates[:, 0 * H:1 * H])
        f = jax.nn.sigmoid(gates[:, 1 * H:2 * H])
        g = jnp.tanh(gates[:, 2 * H:3 * H])
        o = jax.nn.sigmoid(gates[:, 3 * H:4 * H])
        c_new = f * c_prev + i * g
        return o * jnp.tanh(c_new), c_new

    t_base = tb * tt

    def run_layer(l, gx_ref, dst_ref):
        whh_l = whh_ref[l]             # (H, 4H), reused across the whole block

        def slab_body(si, carry):
            h, c = carry
            row0 = pl.multiple_of(si * RS, RS)
            gx_slab = gx_ref[pl.ds(row0, RS), :]          # aligned (RS, 4H) load
            outs = []
            for j in range(spb):                          # static unroll
                rec = jnp.dot(h.astype(cdt), whh_l,
                              preferred_element_type=jnp.float32)
                gates = gx_slab[j * B:(j + 1) * B, :] + rec
                h_new, c_new = lstm_cell(gates, c)
                if mask_tail:
                    valid = (t_base + si * spb + j) < t_valid
                    h = jnp.where(valid, h_new, h)
                    c = jnp.where(valid, c_new, c)
                else:
                    h, c = h_new, c_new
                outs.append(h)
            slab_out = outs[0] if spb == 1 else jnp.concatenate(outs, axis=0)
            dst_ref[pl.ds(row0, RS), :] = slab_out        # aligned (RS, H) store
            return h, c

        h_f, c_f = jax.lax.fori_loop(0, n_slab, slab_body,
                                     (hn_ref[l], cn_ref[l]),
                                     unroll=min(2, n_slab))
        hn_ref[l] = h_f                # state written back once per block
        cn_ref[l] = c_f

    # Layer 0: its input projection was hoisted out of the kernel entirely.
    run_layer(0, gx0_ref, out_ref if L == 1 else act_sc)

    # Layers >= 1: hoist the x-part of the gates to one block matmul, so the
    # per-step MXU work is only h @ W_hh^T.
    for l in range(1, L):
        gxl_sc[...] = (jnp.dot(act_sc[...].astype(cdt), wih_ref[l - 1],
                               preferred_element_type=jnp.float32)
                       + brest_ref[l - 1])
        run_layer(l, gxl_sc, out_ref if l == L - 1 else act_sc)
    # TODO(synk): v5e/v6e — hold W_hh in the MXU across the block via
    # pltpu.matmul_push_rhs / matmul_acc_lhs / matmul_pop (benchmark first).


def _fused_lstm(gx0, whh, wih, brest, *, nlayers, hidden, batch,
                tt, spb, t_real, t_pad):
    H, L, B = hidden, nlayers, batch
    G = 4 * H
    rows_blk = tt * B
    n_blk = t_pad // tt

    act_shape = (rows_blk, H) if L > 1 else (8, 128)
    gxl_shape = (rows_blk, G) if L > 1 else (8, 128)

    # Generation-aware VMEM budget (dtype-aware padded footprint + headroom).
    budget = (
        2 * _padded_bytes((rows_blk, G), jnp.float32)       # gx0 stream (x2 buf)
        + 2 * _padded_bytes((rows_blk, H), jnp.float32)     # out stream (x2 buf)
        + 2 * (_padded_bytes(whh.shape, whh.dtype)
               + _padded_bytes(wih.shape, wih.dtype)
               + _padded_bytes(brest.shape, brest.dtype))
        + 4 * _padded_bytes((L, B, H), jnp.float32)         # hn, cn
        + _padded_bytes(act_shape, jnp.float32)
        + _padded_bytes(gxl_shape, jnp.float32)
        + (8 << 20)
    )
    try:
        cap = int(pltpu.get_tpu_info().vmem_capacity_bytes)
    except Exception:
        cap = 128 << 20
    vmem_limit = int(min(max(budget, 32 << 20), max(32 << 20, (cap * 3) // 4)))

    kernel = functools.partial(_fused_lstm_kernel, spb=spb, tt=tt,
                               t_valid=t_real, mask_tail=(t_pad != t_real))

    grid_spec = pltpu.PrefetchScalarGridSpec(
        num_scalar_prefetch=0,
        grid=(n_blk,),
        in_specs=[
            pl.BlockSpec((rows_blk, G), lambda t: (t, 0)),
            # TODO(synk): on v7x, pipeline_mode=pl.Buffered(1) on these three
            # constant-index weights halves their VMEM at large H.
            pl.BlockSpec(whh.shape, lambda t: (0, 0, 0)),
            pl.BlockSpec(wih.shape, lambda t: (0, 0, 0)),
            pl.BlockSpec(brest.shape, lambda t: (0, 0, 0)),
        ],
        out_specs=[
            pl.BlockSpec((rows_blk, H), lambda t: (t, 0)),
            pl.BlockSpec((L, B, H), lambda t: (0, 0, 0)),
            pl.BlockSpec((L, B, H), lambda t: (0, 0, 0)),
        ],
        scratch_shapes=[pltpu.VMEM(act_shape, jnp.float32),
                        pltpu.VMEM(gxl_shape, jnp.float32)],
    )
    return pl.pallas_call(
        kernel,
        out_shape=(
            jax.ShapeDtypeStruct((t_pad * B, H), jnp.float32),
            jax.ShapeDtypeStruct((L, B, H), jnp.float32),
            jax.ShapeDtypeStruct((L, B, H), jnp.float32),
        ),
        grid_spec=grid_spec,
        compiler_params=pltpu.CompilerParams(
            dimension_semantics=("arbitrary",),   # time recurrence is sequential
            vmem_limit_bytes=vmem_limit,
        ),
    )(gx0, whh, wih, brest)


# --------------------------- module-level wrapper --------------------------- #

def init_encoder_params(key, input_size, nhidden, nlayers):
    """uniform(-0.1, 0.1) init (PyTorch layout), matching EncoderRNN.init_weights."""
    params = []
    for layer in range(nlayers):
        d_in = input_size if layer == 0 else nhidden
        key, k1, k2, k3, k4 = jax.random.split(key, 5)
        w_ih = jax.random.uniform(k1, (4 * nhidden, d_in), jnp.float32, -0.1, 0.1)
        w_hh = jax.random.uniform(k2, (4 * nhidden, nhidden), jnp.float32, -0.1, 0.1)
        b_ih = jax.random.uniform(k3, (4 * nhidden,), jnp.float32, -0.1, 0.1)
        b_hh = jax.random.uniform(k4, (4 * nhidden,), jnp.float32, -0.1, 0.1)
        params.append((w_ih, w_hh, b_ih, b_hh))
    return tuple(params)


@functools.partial(jax.jit, static_argnames=("nhidden", "nlayers", "compute_dtype"))
def encoder_rnn_forward(x, params, nhidden, nlayers, compute_dtype=jnp.float32):
    """Mirrors EncoderRNN.forward. x: (B, T, input_size), batch_first."""
    B0, T0, D = x.shape
    H, L = nhidden, nlayers
    assert len(params) == L
    cdt = compute_dtype

    # Alignment-friendly batch / time padding; tail steps masked in-kernel.
    B = _pad_batch(B0)
    spb = (8 // B) if B < 8 else 1          # time steps per 8-sublane slab
    tt = _choose_tt(T0, spb, B)             # time steps per grid block
    t_pad = ((T0 + tt - 1) // tt) * tt

    x_tm = jnp.transpose(x, (1, 0, 2)).astype(jnp.float32)     # (T0, B0, D)
    if B != B0:
        x_tm = jnp.concatenate(
            [x_tm, jnp.zeros((T0, B - B0, D), jnp.float32)], axis=1)
    if t_pad != T0:
        x_tm = jnp.concatenate(
            [x_tm, jnp.zeros((t_pad - T0, B, D), jnp.float32)], axis=0)
    x_flat = x_tm.reshape(t_pad * B, D)                        # dense (T*B, D)

    # Layer-0 input projection, hoisted out of the recurrence (time-parallel).
    w_ih0, w_hh0, b_ih0, b_hh0 = params[0]
    wih0_t = w_ih0.T.astype(cdt)                               # (D, 4H)
    b0 = (b_ih0 + b_hh0).astype(jnp.float32)[None, :]          # (1, 4H) f32
    gx0 = _input_projection(x_flat, wih0_t, b0)                # (t_pad*B, 4H) f32

    whh = jnp.stack([params[l][1].T for l in range(L)],
                    axis=0).astype(cdt)                        # (L, H, 4H)
    if L > 1:
        wih = jnp.stack([params[l][0].T for l in range(1, L)],
                        axis=0).astype(cdt)                    # (L-1, H, 4H)
        brest = jnp.stack([(params[l][2] + params[l][3])[None, :]
                           for l in range(1, L)],
                          axis=0).astype(jnp.float32)          # (L-1, 1, 4H)
    else:
        wih = jnp.zeros((1, 8, 128), cdt)                      # tiny unused dummies
        brest = jnp.zeros((1, 1, 128), jnp.float32)

    # TODO(synk): inter-layer dropout not applied (module run with dropout=0.0).
    out_flat, hn, cn = _fused_lstm(
        gx0, whh, wih, brest, nlayers=L, hidden=H, batch=B,
        tt=tt, spb=spb, t_real=T0, t_pad=t_pad)

    out_tm = out_flat.reshape(t_pad, B, H)[:T0, :B0]           # (T0, B0, H)
    output = jnp.flip(jnp.transpose(out_tm, (1, 0, 2)), axis=1)  # torch.flip(output, [1])
    hn = hn[:, :B0]
    cn = cn[:, :B0]
    newinput = jnp.flip(x, axis=1)                             # torch.flip(x, [1])
    zeros = jnp.zeros((B0, 1, D), x.dtype)
    newinput = jnp.concatenate([zeros, newinput], axis=1)[:, :-1, :]
    return output, (hn, cn), newinput


# ------------------------------ pure-JAX ref -------------------------------- #

def _encoder_ref(x, params, H):
    B, T, D = x.shape
    inp = x.astype(jnp.float32)
    hns, cns = [], []
    for (w_ih, w_hh, b_ih, b_hh) in params:
        wih_t, whh_t, b = w_ih.T, w_hh.T, b_ih + b_hh

        def step(carry, xt, wih_t=wih_t, whh_t=whh_t, b=b):
            h, c = carry
            gates = xt @ wih_t + h @ whh_t + b
            i = jax.nn.sigmoid(gates[:, 0 * H:1 * H])
            f = jax.nn.sigmoid(gates[:, 1 * H:2 * H])
            g = jnp.tanh(gates[:, 2 * H:3 * H])
            o = jax.nn.sigmoid(gates[:, 3 * H:4 * H])
            c = f * c + i * g
            h = o * jnp.tanh(c)
            return (h, c), h

        init = (jnp.zeros((B, H), jnp.float32), jnp.zeros((B, H), jnp.float32))
        (hT, cT), outs = jax.lax.scan(step, init, jnp.transpose(inp, (1, 0, 2)))
        hns.append(hT); cns.append(cT)
        inp = jnp.transpose(outs, (1, 0, 2))
    output = jnp.flip(inp, axis=1)
    hn = jnp.stack(hns, axis=0)
    cn = jnp.stack(cns, axis=0)
    newinput = jnp.flip(x, axis=1)
    zeros = jnp.zeros((B, 1, D), x.dtype)
    newinput = jnp.concatenate([zeros, newinput], axis=1)[:, :-1, :]
    return output, (hn, cn), newinput


# ---------------------------------- main ------------------------------------ #

if __name__ == "__main__":
    B, T = 2, 8
    input_size, nhidden, nlayers = 16, 128, 2   # H multiple of 128 -> lane-aligned gates

    key = jax.random.PRNGKey(0)
    key, xkey, pkey = jax.random.split(key, 3)
    x = jax.random.normal(xkey, (B, T, input_size), jnp.float32)
    params = init_encoder_params(pkey, input_size, nhidden, nlayers)

    # Reference (plain JAX, f32).
    ref_out, (ref_hn, ref_cn), ref_newinput = _encoder_ref(x, params, nhidden)

    # f32 compute path (validation).
    out32, (hn32, cn32), newinput32 = encoder_rnn_forward(
        x, params, nhidden, nlayers, compute_dtype=jnp.float32)
    jax.block_until_ready((out32, hn32, cn32, newinput32))

    assert out32.shape == (B, T, nhidden)
    assert hn32.shape == (nlayers, B, nhidden)
    assert cn32.shape == (nlayers, B, nhidden)
    assert newinput32.shape == (B, T, input_size)

    np.testing.assert_allclose(np.asarray(out32), np.asarray(ref_out),
                               rtol=1e-2, atol=1e-2)
    np.testing.assert_allclose(np.asarray(hn32), np.asarray(ref_hn),
                               rtol=1e-2, atol=1e-2)
    np.testing.assert_allclose(np.asarray(cn32), np.asarray(ref_cn),
                               rtol=1e-2, atol=1e-2)
    np.testing.assert_array_equal(np.asarray(newinput32), np.asarray(ref_newinput))

    # bf16 matmul-operand path (the recommended fast configuration).
    out16, (hn16, cn16), newinput16 = encoder_rnn_forward(
        x, params, nhidden, nlayers, compute_dtype=jnp.bfloat16)
    jax.block_until_ready((out16, hn16, cn16, newinput16))
    np.testing.assert_allclose(np.asarray(out16), np.asarray(ref_out),
                               rtol=5e-2, atol=5e-2)

    print("KERNEL_OK")
</pallas_src>

<mosaic_0001>
module attributes {stable_mosaic.version = 11 : i64} {
  func.func @_proj_kernel(%arg0: i32, %arg1: memref<16x16xf32, #tpu.memory_space<vmem>>, %arg2: memref<16x512xf32, #tpu.memory_space<vmem>>, %arg3: memref<1x512xf32, #tpu.memory_space<vmem>>, %arg4: memref<16x512xf32, #tpu.memory_space<vmem>>) attributes {dimension_semantics = [#tpu.dimension_semantics<parallel>], iteration_bounds = array<i64: 1>, scalar_prefetch = 0 : i64, scratch_operands = 0 : i64, tpu.core_type = #tpu.core_type<tc>, window_params = [{transform_indices = @transform_0, window_bounds = array<i64: 16, 16>}, {pipeline_mode = #tpu.pipeline_mode<synchronous>, transform_indices = @transform_1, window_bounds = array<i64: 16, 512>}, {pipeline_mode = #tpu.pipeline_mode<synchronous>, transform_indices = @transform_2, window_bounds = array<i64: 1, 512>}, {transform_indices = @transform_3, window_bounds = array<i64: 16, 512>}]} {
    %c0 = arith.constant 0 : index
    %c0_0 = arith.constant 0 : index
    %0 = vector.load %arg1[%c0, %c0_0] : memref<16x16xf32, #tpu.memory_space<vmem>>, vector<16x16xf32>
    %c0_1 = arith.constant 0 : index
    %c0_2 = arith.constant 0 : index
    %1 = vector.load %arg2[%c0_1, %c0_2] : memref<16x512xf32, #tpu.memory_space<vmem>>, vector<16x512xf32>
    %cst = arith.constant dense<0.000000e+00> : vector<16x512xf32>
    %2 = tpu.matmul %0, %1, %cst {dimension_numbers = #tpu.dot_dimension_numbers<[1], [0], [0], [1], [0, 0, 1, 1], [], []>} : vector<16x16xf32>, vector<16x512xf32>, vector<16x512xf32> -> vector<16x512xf32>
    %c0_3 = arith.constant 0 : index
    %c0_4 = arith.constant 0 : index
    %3 = vector.load %arg3[%c0_3, %c0_4] : memref<1x512xf32, #tpu.memory_space<vmem>>, vector<1x512xf32>
    %4 = vector.broadcast %3 : vector<1x512xf32> to vector<16x512xf32>
    %5 = arith.addf %2, %4 : vector<16x512xf32>
    %c0_5 = arith.constant 0 : index
    %c0_6 = arith.constant 0 : index
    %6 = vector.load %arg4[%c0_5, %c0_6] : memref<16x512xf32, #tpu.memory_space<vmem>>, vector<16x512xf32>
    tpu.vector_store %arg4[%c0_5, %c0_6], %5 {strides = array<i32>} : memref<16x512xf32, #tpu.memory_space<vmem>>, vector<16x512xf32>,
    return
  }
  func.func @transform_0(%arg0: i32) -> (i32, i32) {
    %c0_i32 = arith.constant 0 : i32
    %c0_i32_0 = arith.constant 0 : i32
    return %arg0, %c0_i32 : i32, i32
  }
  func.func @transform_1(%arg0: i32) -> (i32, i32) {
    %c0_i32 = arith.constant 0 : i32
    %c0_i32_0 = arith.constant 0 : i32
    %c0_i32_1 = arith.constant 0 : i32
    return %c0_i32, %c0_i32_0 : i32, i32
  }
  func.func @transform_2(%arg0: i32) -> (i32, i32) {
    %c0_i32 = arith.constant 0 : i32
    %c0_i32_0 = arith.constant 0 : i32
    %c0_i32_1 = arith.constant 0 : i32
    return %c0_i32, %c0_i32_0 : i32, i32
  }
  func.func @transform_3(%arg0: i32) -> (i32, i32) {
    %c0_i32 = arith.constant 0 : i32
    %c0_i32_0 = arith.constant 0 : i32
    return %arg0, %c0_i32 : i32, i32
  }
}

module attributes {stable_mosaic.version = 11 : i64} {
  func.func @_fused_lstm_kernel(%arg0: i32, %arg1: memref<16x512xf32, #tpu.memory_space<vmem>>, %arg2: memref<2x128x512xf32, #tpu.memory_space<vmem>>, %arg3: memref<1x128x512xf32, #tpu.memory_space<vmem>>, %arg4: memref<1x1x512xf32, #tpu.memory_space<vmem>>, %arg5: memref<16x128xf32, #tpu.memory_space<vmem>>, %arg6: memref<2x2x128xf32, #tpu.memory_space<vmem>>, %arg7: memref<2x2x128xf32, #tpu.memory_space<vmem>>, %arg8: memref<16x128xf32, #tpu.memory_space<vmem>>, %arg9: memref<16x512xf32, #tpu.memory_space<vmem>>) attributes {dimension_semantics = [#tpu.dimension_semantics<arbitrary>], iteration_bounds = array<i64: 1>, scalar_prefetch = 0 : i64, scratch_operands = 2 : i64, tpu.core_type = #tpu.core_type<tc>, window_params = [{transform_indices = @transform_0, window_bounds = array<i64: 16, 512>}, {pipeline_mode = #tpu.pipeline_mode<synchronous>, transform_indices = @transform_1, window_bounds = array<i64: 2, 128, 512>}, {pipeline_mode = #tpu.pipeline_mode<synchronous>, transform_indices = @transform_2, window_bounds = array<i64: 1, 128, 512>}, {pipeline_mode = #tpu.pipeline_mode<synchronous>, transform_indices = @transform_3, window_bounds = array<i64: 1, 1, 512>}, {transform_indices = @transform_4, window_bounds = array<i64: 16, 128>}, {pipeline_mode = #tpu.pipeline_mode<synchronous>, transform_indices = @transform_5, window_bounds = array<i64: 2, 2, 128>}, {pipeline_mode = #tpu.pipeline_mode<synchronous>, transform_indices = @transform_6, window_bounds = array<i64: 2, 2, 128>}]} {
    %c0_i32 = arith.constant 0 : i32
    %0 = arith.cmpi eq, %arg0, %c0_i32 : i32
    %1 = arith.extui %0 : i1 to i32
    %c0_i32_0 = arith.constant 0 : i32
    %2 = arith.cmpi ne, %1, %c0_i32_0 : i32
    scf.if %2 {
      %cst_118 = arith.constant 0.000000e+00 : f32
      %512 = vector.broadcast %cst_118 : f32 to vector<2x2x128xf32>
      %c0_119 = arith.constant 0 : index
      %c0_120 = arith.constant 0 : index
      %c0_121 = arith.constant 0 : index
      %513 = vector.load %arg6[%c0_119, %c0_120, %c0_121] : memref<2x2x128xf32, #tpu.memory_space<vmem>>, vector<2x2x128xf32>
      tpu.vector_store %arg6[%c0_119, %c0_120, %c0_121], %512 {strides = array<i32>} : memref<2x2x128xf32, #tpu.memory_space<vmem>>, vector<2x2x128xf32>,
      %cst_122 = arith.constant 0.000000e+00 : f32
      %514 = vector.broadcast %cst_122 : f32 to vector<2x2x128xf32>
      %c0_123 = arith.constant 0 : index
      %c0_124 = arith.constant 0 : index
      %c0_125 = arith.constant 0 : index
      %515 = vector.load %arg7[%c0_123, %c0_124, %c0_125] : memref<2x2x128xf32, #tpu.memory_space<vmem>>, vector<2x2x128xf32>
      tpu.vector_store %arg7[%c0_123, %c0_124, %c0_125], %514 {strides = array<i32>} : memref<2x2x128xf32, #tpu.memory_space<vmem>>, vector<2x2x128xf32>,
    } else {
    }
    %c0 = arith.constant 0 : index
    %c0_1 = arith.constant 0 : index
    %c0_2 = arith.constant 0 : index
    %3 = vector.load %arg2[%c0, %c0_1, %c0_2] : memref<2x128x512xf32, #tpu.memory_space<vmem>>, vector<1x128x512xf32>
    %4 = vector.shape_cast %3 : vector<1x128x512xf32> to vector<128x512xf32>
    %c0_3 = arith.constant 0 : index
    %c0_4 = arith.constant 0 : index
    %c0_5 = arith.constant 0 : index
    %5 = vector.load %arg6[%c0_3, %c0_4, %c0_5] : memref<2x2x128xf32, #tpu.memory_space<vmem>>, vector<1x2x128xf32>
    %6 = vector.shape_cast %5 : vector<1x2x128xf32> to vector<2x128xf32>
    %c0_6 = arith.constant 0 : index
    %c0_7 = arith.constant 0 : index
    %c0_8 = arith.constant 0 : index
    %7 = vector.load %arg7[%c0_6, %c0_7, %c0_8] : memref<2x2x128xf32, #tpu.memory_space<vmem>>, vector<1x2x128xf32>
    %8 = vector.shape_cast %7 : vector<1x2x128xf32> to vector<2x128xf32>
    %c0_i32_9 = arith.constant 0 : i32
    %c8_i32 = arith.constant 8 : i32
    %9 = arith.muli %c0_i32_9, %c8_i32 : i32
    %10 = tpu.assume_multiple %9, 8 : i32
    %11 = arith.index_cast %10 : i32 to index
    %c0_10 = arith.constant 0 : index
    %12 = vector.load %arg1[%11, %c0_10] : memref<16x512xf32, #tpu.memory_space<vmem>>, vector<8x512xf32>
    %cst = arith.constant dense<0.000000e+00> : vector<2x512xf32>
    %13 = tpu.matmul %6, %4, %cst {dimension_numbers = #tpu.dot_dimension_numbers<[1], [0], [0], [1], [0, 0, 1, 1], [], []>} : vector<2x128xf32>, vector<128x512xf32>, vector<2x512xf32> -> vector<2x512xf32>
    %14 = vector.extract_strided_slice %12 {offsets = [0, 0], sizes = [2, 512], strides = [1, 1]} : vector<8x512xf32> to vector<2x512xf32>
    %15 = arith.addf %14, %13 : vector<2x512xf32>
    %16 = vector.extract_strided_slice %15 {offsets = [0, 0], sizes = [2, 128], strides = [1, 1]} : vector<2x512xf32> to vector<2x128xf32>
    %17 = arith.negf %16 : vector<2x128xf32>
    %18 = math.exp %17 : vector<2x128xf32>
    %cst_11 = arith.constant 1.000000e+00 : f32
    %19 = vector.broadcast %cst_11 : f32 to vector<2x128xf32>
    %20 = arith.addf %19, %18 : vector<2x128xf32>
    %21 = arith.divf %19, %20 : vector<2x128xf32>
    %22 = vector.extract_strided_slice %15 {offsets = [0, 128], sizes = [2, 128], strides = [1, 1]} : vector<2x512xf32> to vector<2x128xf32>
    %23 = arith.negf %22 : vector<2x128xf32>
    %24 = math.exp %23 : vector<2x128xf32>
    %cst_12 = arith.constant 1.000000e+00 : f32
    %25 = vector.broadcast %cst_12 : f32 to vector<2x128xf32>
    %26 = arith.addf %25, %24 : vector<2x128xf32>
    %27 = arith.divf %25, %26 : vector<2x128xf32>
    %28 = vector.extract_strided_slice %15 {offsets = [0, 256], sizes = [2, 128], strides = [1, 1]} : vector<2x512xf32> to vector<2x128xf32>
    %29 = math.tanh %28 : vector<2x128xf32>
    %30 = vector.extract_strided_slice %15 {offsets = [0, 384], sizes = [2, 128], strides = [1, 1]} : vector<2x512xf32> to vector<2x128xf32>
    %31 = arith.negf %30 : vector<2x128xf32>
    %32 = math.exp %31 : vector<2x128xf32>
    %cst_13 = arith.constant 1.000000e+00 : f32
    %33 = vector.broadcast %cst_13 : f32 to vector<2x128xf32>
    %34 = arith.addf %33, %32 : vector<2x128xf32>
    %35 = arith.divf %33, %34 : vector<2x128xf32>
    %36 = arith.mulf %27, %8 : vector<2x128xf32>
    %37 = arith.mulf %21, %29 : vector<2x128xf32>
    %38 = arith.addf %36, %37 : vector<2x128xf32>
    %39 = math.tanh %38 : vector<2x128xf32>
    %40 = arith.mulf %35, %39 : vector<2x128xf32>
    %cst_14 = arith.constant dense<0.000000e+00> : vector<2x512xf32>
    %41 = tpu.matmul %40, %4, %cst_14 {dimension_numbers = #tpu.dot_dimension_numbers<[1], [0], [0], [1], [0, 0, 1, 1], [], []>} : vector<2x128xf32>, vector<128x512xf32>, vector<2x512xf32> -> vector<2x512xf32>
    %42 = vector.extract_strided_slice %12 {offsets = [2, 0], sizes = [2, 512], strides = [1, 1]} : vector<8x512xf32> to vector<2x512xf32>
    %43 = arith.addf %42, %41 : vector<2x512xf32>
    %44 = vector.extract_strided_slice %43 {offsets = [0, 0], sizes = [2, 128], strides = [1, 1]} : vector<2x512xf32> to vector<2x128xf32>
    %45 = arith.negf %44 : vector<2x128xf32>
    %46 = math.exp %45 : vector<2x128xf32>
    %cst_15 = arith.constant 1.000000e+00 : f32
    %47 = vector.broadcast %cst_15 : f32 to vector<2x128xf32>
    %48 = arith.addf %47, %46 : vector<2x128xf32>
    %49 = arith.divf %47, %48 : vector<2x128xf32>
    %50 = vector.extract_strided_slice %43 {offsets = [0, 128], sizes = [2, 128], strides = [1, 1]} : vector<2x512xf32> to vector<2x128xf32>
    %51 = arith.negf %50 : vector<2x128xf32>
    %52 = math.exp %51 : vector<2x128xf32>
    %cst_16 = arith.constant 1.000000e+00 : f32
    %53 = vector.broadcast %cst_16 : f32 to vector<2x128xf32>
    %54 = arith.addf %53, %52 : vector<2x128xf32>
    %55 = arith.divf %53, %54 : vector<2x128xf32>
    %56 = vector.extract_strided_slice %43 {offsets = [0, 256], sizes = [2, 128], strides = [1, 1]} : vector<2x512xf32> to vector<2x128xf32>
    %57 = math.tanh %56 : vector<2x128xf32>
    %58 = vector.extract_strided_slice %43 {offsets = [0, 384], sizes = [2, 128], strides = [1, 1]} : vector<2x512xf32> to vector<2x128xf32>
    %59 = arith.negf %58 : vector<2x128xf32>
    %60 = math.exp %59 : vector<2x128xf32>
    %cst_17 = arith.constant 1.000000e+00 : f32
    %61 = vector.broadcast %cst_17 : f32 to vector<2x128xf32>
    %62 = arith.addf %61, %60 : vector<2x128xf32>
    %63 = arith.divf %61, %62 : vector<2x128xf32>
    %64 = arith.mulf %55, %38 : vector<2x128xf32>
    %65 = arith.mulf %49, %57 : vector<2x128xf32>
    %66 = arith.addf %64, %65 : vector<2x128xf32>
    %67 = math.tanh %66 : vector<2x128xf32>
    %68 = arith.mulf %63, %67 : vector<2x128xf32>
    %cst_18 = arith.constant dense<0.000000e+00> : vector<2x512xf32>
    %69 = tpu.matmul %68, %4, %cst_18 {dimension_numbers = #tpu.dot_dimension_numbers<[1], [0], [0], [1], [0, 0, 1, 1], [], []>} : vector<2x128xf32>, vector<128x512xf32>, vector<2x512xf32> -> vector<2x512xf32>
    %70 = vector.extract_strided_slice %12 {offsets = [4, 0], sizes = [2, 512], strides = [1, 1]} : vector<8x512xf32> to vector<2x512xf32>
    %71 = arith.addf %70, %69 : vector<2x512xf32>
    %72 = vector.extract_strided_slice %71 {offsets = [0, 0], sizes = [2, 128], strides = [1, 1]} : vector<2x512xf32> to vector<2x128xf32>
    %73 = arith.negf %72 : vector<2x128xf32>
    %74 = math.exp %73 : vector<2x128xf32>
    %cst_19 = arith.constant 1.000000e+00 : f32
    %75 = vector.broadcast %cst_19 : f32 to vector<2x128xf32>
    %76 = arith.addf %75, %74 : vector<2x128xf32>
    %77 = arith.divf %75, %76 : vector<2x128xf32>
    %78 = vector.extract_strided_slice %71 {offsets = [0, 128], sizes = [2, 128], strides = [1, 1]} : vector<2x512xf32> to vector<2x128xf32>
    %79 = arith.negf %78 : vector<2x128xf32>
    %80 = math.exp %79 : vector<2x128xf32>
    %cst_20 = arith.constant 1.000000e+00 : f32
    %81 = vector.broadcast %cst_20 : f32 to vector<2x128xf32>
    %82 = arith.addf %81, %80 : vector<2x128xf32>
    %83 = arith.divf %81, %82 : vector<2x128xf32>
    %84 = vector.extract_strided_slice %71 {offsets = [0, 256], sizes = [2, 128], strides = [1, 1]} : vector<2x512xf32> to vector<2x128xf32>
    %85 = math.tanh %84 : vector<2x128xf32>
    %86 = vector.extract_strided_slice %71 {offsets = [0, 384], sizes = [2, 128], strides = [1, 1]} : vector<2x512xf32> to vector<2x128xf32>
    %87 = arith.negf %86 : vector<2x128xf32>
    %88 = math.exp %87 : vector<2x128xf32>
    %cst_21 = arith.constant 1.000000e+00 : f32
    %89 = vector.broadcast %cst_21 : f32 to vector<2x128xf32>
    %90 = arith.addf %89, %88 : vector<2x128xf32>
    %91 = arith.divf %89, %90 : vector<2x128xf32>
    %92 = arith.mulf %83, %66 : vector<2x128xf32>
    %93 = arith.mulf %77, %85 : vector<2x128xf32>
    %94 = arith.addf %92, %93 : vector<2x128xf32>
    %95 = math.tanh %94 : vector<2x128xf32>
    %96 = arith.mulf %91, %95 : vector<2x128xf32>
    %cst_22 = arith.constant dense<0.000000e+00> : vector<2x512xf32>
    %97 = tpu.matmul %96, %4, %cst_22 {dimension_numbers = #tpu.dot_dimension_numbers<[1], [0], [0], [1], [0, 0, 1, 1], [], []>} : vector<2x128xf32>, vector<128x512xf32>, vector<2x512xf32> -> vector<2x512xf32>
    %98 = vector.extract_strided_slice %12 {offsets = [6, 0], sizes = [2, 512], strides = [1, 1]} : vector<8x512xf32> to vector<2x512xf32>
    %99 = arith.addf %98, %97 : vector<2x512xf32>
    %100 = vector.extract_strided_slice %99 {offsets = [0, 0], sizes = [2, 128], strides = [1, 1]} : vector<2x512xf32> to vector<2x128xf32>
    %101 = arith.negf %100 : vector<2x128xf32>
    %102 = math.exp %101 : vector<2x128xf32>
    %cst_23 = arith.constant 1.000000e+00 : f32
    %103 = vector.broadcast %cst_23 : f32 to vector<2x128xf32>
    %104 = arith.addf %103, %102 : vector<2x128xf32>
    %105 = arith.divf %103, %104 : vector<2x128xf32>
    %106 = vector.extract_strided_slice %99 {offsets = [0, 128], sizes = [2, 128], strides = [1, 1]} : vector<2x512xf32> to vector<2x128xf32>
    %107 = arith.negf %106 : vector<2x128xf32>
    %108 = math.exp %107 : vector<2x128xf32>
    %cst_24 = arith.constant 1.000000e+00 : f32
    %109 = vector.broadcast %cst_24 : f32 to vector<2x128xf32>
    %110 = arith.addf %109, %108 : vector<2x128xf32>
    %111 = arith.divf %109, %110 : vector<2x128xf32>
    %112 = vector.extract_strided_slice %99 {offsets = [0, 256], sizes = [2, 128], strides = [1, 1]} : vector<2x512xf32> to vector<2x128xf32>
    %113 = math.tanh %112 : vector<2x128xf32>
    %114 = vector.extract_strided_slice %99 {offsets = [0, 384], sizes = [2, 128], strides = [1, 1]} : vector<2x512xf32> to vector<2x128xf32>
    %115 = arith.negf %114 : vector<2x128xf32>
    %116 = math.exp %115 : vector<2x128xf32>
    %cst_25 = arith.constant 1.000000e+00 : f32
    %117 = vector.broadcast %cst_25 : f32 to vector<2x128xf32>
    %118 = arith.addf %117, %116 : vector<2x128xf32>
    %119 = arith.divf %117, %118 : vector<2x128xf32>
    %120 = arith.mulf %111, %94 : vector<2x128xf32>
    %121 = arith.mulf %105, %113 : vector<2x128xf32>
    %122 = arith.addf %120, %121 : vector<2x128xf32>
    %123 = math.tanh %122 : vector<2x128xf32>
    %124 = arith.mulf %119, %123 : vector<2x128xf32>
    %125 = tpu.concatenate %40, %68, %96, %124 in 0 : vector<2x128xf32>, vector<2x128xf32>, vector<2x128xf32>, vector<2x128xf32> -> vector<8x128xf32>
    %126 = arith.index_cast %10 : i32 to index
    %c0_26 = arith.constant 0 : index
    %127 = vector.load %arg8[%126, %c0_26] : memref<16x128xf32, #tpu.memory_space<vmem>>, vector<8x128xf32>
    tpu.vector_store %arg8[%126, %c0_26], %125 {strides = array<i32>} : memref<16x128xf32, #tpu.memory_space<vmem>>, vector<8x128xf32>,
    %c1_i32 = arith.constant 1 : i32
    %c8_i32_27 = arith.constant 8 : i32
    %128 = arith.muli %c1_i32, %c8_i32_27 : i32
    %129 = tpu.assume_multiple %128, 8 : i32
    %130 = arith.index_cast %129 : i32 to index
    %c0_28 = arith.constant 0 : index
    %131 = vector.load %arg1[%130, %c0_28] : memref<16x512xf32, #tpu.memory_space<vmem>>, vector<8x512xf32>
    %cst_29 = arith.constant dense<0.000000e+00> : vector<2x512xf32>
    %132 = tpu.matmul %124, %4, %cst_29 {dimension_numbers = #tpu.dot_dimension_numbers<[1], [0], [0], [1], [0, 0, 1, 1], [], []>} : vector<2x128xf32>, vector<128x512xf32>, vector<2x512xf32> -> vector<2x512xf32>
    %133 = vector.extract_strided_slice %131 {offsets = [0, 0], sizes = [2, 512], strides = [1, 1]} : vector<8x512xf32> to vector<2x512xf32>
    %134 = arith.addf %133, %132 : vector<2x512xf32>
    %135 = vector.extract_strided_slice %134 {offsets = [0, 0], sizes = [2, 128], strides = [1, 1]} : vector<2x512xf32> to vector<2x128xf32>
    %136 = arith.negf %135 : vector<2x128xf32>
    %137 = math.exp %136 : vector<2x128xf32>
    %cst_30 = arith.constant 1.000000e+00 : f32
    %138 = vector.broadcast %cst_30 : f32 to vector<2x128xf32>
    %139 = arith.addf %138, %137 : vector<2x128xf32>
    %140 = arith.divf %138, %139 : vector<2x128xf32>
    %141 = vector.extract_strided_slice %134 {offsets = [0, 128], sizes = [2, 128], strides = [1, 1]} : vector<2x512xf32> to vector<2x128xf32>
    %142 = arith.negf %141 : vector<2x128xf32>
    %143 = math.exp %142 : vector<2x128xf32>
    %cst_31 = arith.constant 1.000000e+00 : f32
    %144 = vector.broadcast %cst_31 : f32 to vector<2x128xf32>
    %145 = arith.addf %144, %143 : vector<2x128xf32>
    %146 = arith.divf %144, %145 : vector<2x128xf32>
    %147 = vector.extract_strided_slice %134 {offsets = [0, 256], sizes = [2, 128], strides = [1, 1]} : vector<2x512xf32> to vector<2x128xf32>
    %148 = math.tanh %147 : vector<2x128xf32>
    %149 = vector.extract_strided_slice %134 {offsets = [0, 384], sizes = [2, 128], strides = [1, 1]} : vector<2x512xf32> to vector<2x128xf32>
    %150 = arith.negf %149 : vector<2x128xf32>
    %151 = math.exp %150 : vector<2x128xf32>
    %cst_32 = arith.constant 1.000000e+00 : f32
    %152 = vector.broadcast %cst_32 : f32 to vector<2x128xf32>
    %153 = arith.addf %152, %151 : vector<2x128xf32>
    %154 = arith.divf %152, %153 : vector<2x128xf32>
    %155 = arith.mulf %146, %122 : vector<2x128xf32>
    %156 = arith.mulf %140, %148 : vector<2x128xf32>
    %157 = arith.addf %155, %156 : vector<2x128xf32>
    %158 = math.tanh %157 : vector<2x128xf32>
    %159 = arith.mulf %154, %158 : vector<2x128xf32>
    %cst_33 = arith.constant dense<0.000000e+00> : vector<2x512xf32>
    %160 = tpu.matmul %159, %4, %cst_33 {dimension_numbers = #tpu.dot_dimension_numbers<[1], [0], [0], [1], [0, 0, 1, 1], [], []>} : vector<2x128xf32>, vector<128x512xf32>, vector<2x512xf32> -> vector<2x512xf32>
    %161 = vector.extract_strided_slice %131 {offsets = [2, 0], sizes = [2, 512], strides = [1, 1]} : vector<8x512xf32> to vector<2x512xf32>
    %162 = arith.addf %161, %160 : vector<2x512xf32>
    %163 = vector.extract_strided_slice %162 {offsets = [0, 0], sizes = [2, 128], strides = [1, 1]} : vector<2x512xf32> to vector<2x128xf32>
    %164 = arith.negf %163 : vector<2x128xf32>
    %165 = math.exp %164 : vector<2x128xf32>
    %cst_34 = arith.constant 1.000000e+00 : f32
    %166 = vector.broadcast %cst_34 : f32 to vector<2x128xf32>
    %167 = arith.addf %166, %165 : vector<2x128xf32>
    %168 = arith.divf %166, %167 : vector<2x128xf32>
    %169 = vector.extract_strided_slice %162 {offsets = [0, 128], sizes = [2, 128], strides = [1, 1]} : vector<2x512xf32> to vector<2x128xf32>
    %170 = arith.negf %169 : vector<2x128xf32>
    %171 = math.exp %170 : vector<2x128xf32>
    %cst_35 = arith.constant 1.000000e+00 : f32
    %172 = vector.broadcast %cst_35 : f32 to vector<2x128xf32>
    %173 = arith.addf %172, %171 : vector<2x128xf32>
    %174 = arith.divf %172, %173 : vector<2x128xf32>
    %175 = vector.extract_strided_slice %162 {offsets = [0, 256], sizes = [2, 128], strides = [1, 1]} : vector<2x512xf32> to vector<2x128xf32>
    %176 = math.tanh %175 : vector<2x128xf32>
    %177 = vector.extract_strided_slice %162 {offsets = [0, 384], sizes = [2, 128], strides = [1, 1]} : vector<2x512xf32> to vector<2x128xf32>
    %178 = arith.negf %177 : vector<2x128xf32>
    %179 = math.exp %178 : vector<2x128xf32>
    %cst_36 = arith.constant 1.000000e+00 : f32
    %180 = vector.broadcast %cst_36 : f32 to vector<2x128xf32>
    %181 = arith.addf %180, %179 : vector<2x128xf32>
    %182 = arith.divf %180, %181 : vector<2x128xf32>
    %183 = arith.mulf %174, %157 : vector<2x128xf32>
    %184 = arith.mulf %168, %176 : vector<2x128xf32>
    %185 = arith.addf %183, %184 : vector<2x128xf32>
    %186 = math.tanh %185 : vector<2x128xf32>
    %187 = arith.mulf %182, %186 : vector<2x128xf32>
    %cst_37 = arith.constant dense<0.000000e+00> : vector<2x512xf32>
    %188 = tpu.matmul %187, %4, %cst_37 {dimension_numbers = #tpu.dot_dimension_numbers<[1], [0], [0], [1], [0, 0, 1, 1], [], []>} : vector<2x128xf32>, vector<128x512xf32>, vector<2x512xf32> -> vector<2x512xf32>
    %189 = vector.extract_strided_slice %131 {offsets = [4, 0], sizes = [2, 512], strides = [1, 1]} : vector<8x512xf32> to vector<2x512xf32>
    %190 = arith.addf %189, %188 : vector<2x512xf32>
    %191 = vector.extract_strided_slice %190 {offsets = [0, 0], sizes = [2, 128], strides = [1, 1]} : vector<2x512xf32> to vector<2x128xf32>
    %192 = arith.negf %191 : vector<2x128xf32>
    %193 = math.exp %192 : vector<2x128xf32>
    %cst_38 = arith.constant 1.000000e+00 : f32
    %194 = vector.broadcast %cst_38 : f32 to vector<2x128xf32>
    %195 = arith.addf %194, %193 : vector<2x128xf32>
    %196 = arith.divf %194, %195 : vector<2x128xf32>
    %197 = vector.extract_strided_slice %190 {offsets = [0, 128], sizes = [2, 128], strides = [1, 1]} : vector<2x512xf32> to vector<2x128xf32>
    %198 = arith.negf %197 : vector<2x128xf32>
    %199 = math.exp %198 : vector<2x128xf32>
    %cst_39 = arith.constant 1.000000e+00 : f32
    %200 = vector.broadcast %cst_39 : f32 to vector<2x128xf32>
    %201 = arith.addf %200, %199 : vector<2x128xf32>
    %202 = arith.divf %200, %201 : vector<2x128xf32>
    %203 = vector.extract_strided_slice %190 {offsets = [0, 256], sizes = [2, 128], strides = [1, 1]} : vector<2x512xf32> to vector<2x128xf32>
    %204 = math.tanh %203 : vector<2x128xf32>
    %205 = vector.extract_strided_slice %190 {offsets = [0, 384], sizes = [2, 128], strides = [1, 1]} : vector<2x512xf32> to vector<2x128xf32>
    %206 = arith.negf %205 : vector<2x128xf32>
    %207 = math.exp %206 : vector<2x128xf32>
    %cst_40 = arith.constant 1.000000e+00 : f32
    %208 = vector.broadcast %cst_40 : f32 to vector<2x128xf32>
    %209 = arith.addf %208, %207 : vector<2x128xf32>
    %210 = arith.divf %208, %209 : vector<2x128xf32>
    %211 = arith.mulf %202, %185 : vector<2x128xf32>
    %212 = arith.mulf %196, %204 : vector<2x128xf32>
    %213 = arith.addf %211, %212 : vector<2x128xf32>
    %214 = math.tanh %213 : vector<2x128xf32>
    %215 = arith.mulf %210, %214 : vector<2x128xf32>
    %cst_41 = arith.constant dense<0.000000e+00> : vector<2x512xf32>
    %216 = tpu.matmul %215, %4, %cst_41 {dimension_numbers = #tpu.dot_dimension_numbers<[1], [0], [0], [1], [0, 0, 1, 1], [], []>} : vector<2x128xf32>, vector<128x512xf32>, vector<2x512xf32> -> vector<2x512xf32>
    %217 = vector.extract_strided_slice %131 {offsets = [6, 0], sizes = [2, 512], strides = [1, 1]} : vector<8x512xf32> to vector<2x512xf32>
    %218 = arith.addf %217, %216 : vector<2x512xf32>
    %219 = vector.extract_strided_slice %218 {offsets = [0, 0], sizes = [2, 128], strides = [1, 1]} : vector<2x512xf32> to vector<2x128xf32>
    %220 = arith.negf %219 : vector<2x128xf32>
    %221 = math.exp %220 : vector<2x128xf32>
    %cst_42 = arith.constant 1.000000e+00 : f32
    %222 = vector.broadcast %cst_42 : f32 to vector<2x128xf32>
    %223 = arith.addf %222, %221 : vector<2x128xf32>
    %224 = arith.divf %222, %223 : vector<2x128xf32>
    %225 = vector.extract_strided_slice %218 {offsets = [0, 128], sizes = [2, 128], strides = [1, 1]} : vector<2x512xf32> to vector<2x128xf32>
    %226 = arith.negf %225 : vector<2x128xf32>
    %227 = math.exp %226 : vector<2x128xf32>
    %cst_43 = arith.constant 1.000000e+00 : f32
    %228 = vector.broadcast %cst_43 : f32 to vector<2x128xf32>
    %229 = arith.addf %228, %227 : vector<2x128xf32>
    %230 = arith.divf %228, %229 : vector<2x128xf32>
    %231 = vector.extract_strided_slice %218 {offsets = [0, 256], sizes = [2, 128], strides = [1, 1]} : vector<2x512xf32> to vector<2x128xf32>
    %232 = math.tanh %231 : vector<2x128xf32>
    %233 = vector.extract_strided_slice %218 {offsets = [0, 384], sizes = [2, 128], strides = [1, 1]} : vector<2x512xf32> to vector<2x128xf32>
    %234 = arith.negf %233 : vector<2x128xf32>
    %235 = math.exp %234 : vector<2x128xf32>
    %cst_44 = arith.constant 1.000000e+00 : f32
    %236 = vector.broadcast %cst_44 : f32 to vector<2x128xf32>
    %237 = arith.addf %236, %235 : vector<2x128xf32>
    %238 = arith.divf %236, %237 : vector<2x128xf32>
    %239 = arith.mulf %230, %213 : vector<2x128xf32>
    %240 = arith.mulf %224, %232 : vector<2x128xf32>
    %241 = arith.addf %239, %240 : vector<2x128xf32>
    %242 = math.tanh %241 : vector<2x128xf32>
    %243 = arith.mulf %238, %242 : vector<2x128xf32>
    %244 = tpu.concatenate %159, %187, %215, %243 in 0 : vector<2x128xf32>, vector<2x128xf32>, vector<2x128xf32>, vector<2x128xf32> -> vector<8x128xf32>
    %245 = arith.index_cast %129 : i32 to index
    %c0_45 = arith.constant 0 : index
    %246 = vector.load %arg8[%245, %c0_45] : memref<16x128xf32, #tpu.memory_space<vmem>>, vector<8x128xf32>
    tpu.vector_store %arg8[%245, %c0_45], %244 {strides = array<i32>} : memref<16x128xf32, #tpu.memory_space<vmem>>, vector<8x128xf32>,
    %c2_i32 = arith.constant 2 : i32
    %c0_46 = arith.constant 0 : index
    %c0_47 = arith.constant 0 : index
    %c0_48 = arith.constant 0 : index
    %247 = vector.load %arg6[%c0_46, %c0_47, %c0_48] : memref<2x2x128xf32, #tpu.memory_space<vmem>>, vector<1x2x128xf32>
    %248 = vector.shape_cast %247 : vector<1x2x128xf32> to vector<2x128xf32>
    %249 = vector.shape_cast %243 : vector<2x128xf32> to vector<1x2x128xf32>
    tpu.vector_store %arg6[%c0_46, %c0_47, %c0_48], %249 {strides = array<i32>} : memref<2x2x128xf32, #tpu.memory_space<vmem>>, vector<1x2x128xf32>,
    %c0_49 = arith.constant 0 : index
    %c0_50 = arith.constant 0 : index
    %c0_51 = arith.constant 0 : index
    %250 = vector.load %arg7[%c0_49, %c0_50, %c0_51] : memref<2x2x128xf32, #tpu.memory_space<vmem>>, vector<1x2x128xf32>
    %251 = vector.shape_cast %250 : vector<1x2x128xf32> to vector<2x128xf32>
    %252 = vector.shape_cast %241 : vector<2x128xf32> to vector<1x2x128xf32>
    tpu.vector_store %arg7[%c0_49, %c0_50, %c0_51], %252 {strides = array<i32>} : memref<2x2x128xf32, #tpu.memory_space<vmem>>, vector<1x2x128xf32>,
    %c0_52 = arith.constant 0 : index
    %c0_53 = arith.constant 0 : index
    %253 = vector.load %arg8[%c0_52, %c0_53] : memref<16x128xf32, #tpu.memory_space<vmem>>, vector<16x128xf32>
    %c0_54 = arith.constant 0 : index
    %c0_55 = arith.constant 0 : index
    %c0_56 = arith.constant 0 : index
    %254 = vector.load %arg3[%c0_54, %c0_55, %c0_56] : memref<1x128x512xf32, #tpu.memory_space<vmem>>, vector<1x128x512xf32>
    %255 = vector.shape_cast %254 : vector<1x128x512xf32> to vector<128x512xf32>
    %cst_57 = arith.constant dense<0.000000e+00> : vector<16x512xf32>
    %256 = tpu.matmul %253, %255, %cst_57 {dimension_numbers = #tpu.dot_dimension_numbers<[1], [0], [0], [1], [0, 0, 1, 1], [], []>} : vector<16x128xf32>, vector<128x512xf32>, vector<16x512xf32> -> vector<16x512xf32>
    %c0_58 = arith.constant 0 : index
    %c0_59 = arith.constant 0 : index
    %c0_60 = arith.constant 0 : index
    %257 = vector.load %arg4[%c0_58, %c0_59, %c0_60] : memref<1x1x512xf32, #tpu.memory_space<vmem>>, vector<1x1x512xf32>
    %258 = vector.shape_cast %257 : vector<1x1x512xf32> to vector<1x512xf32>
    %259 = vector.broadcast %258 : vector<1x512xf32> to vector<16x512xf32>
    %260 = arith.addf %256, %259 : vector<16x512xf32>
    %c0_61 = arith.constant 0 : index
    %c0_62 = arith.constant 0 : index
    %261 = vector.load %arg9[%c0_61, %c0_62] : memref<16x512xf32, #tpu.memory_space<vmem>>, vector<16x512xf32>
    tpu.vector_store %arg9[%c0_61, %c0_62], %260 {strides = array<i32>} : memref<16x512xf32, #tpu.memory_space<vmem>>, vector<16x512xf32>,
    %c1 = arith.constant 1 : index
    %c0_63 = arith.constant 0 : index
    %c0_64 = arith.constant 0 : index
    %262 = vector.load %arg2[%c1, %c0_63, %c0_64] : memref<2x128x512xf32, #tpu.memory_space<vmem>>, vector<1x128x512xf32>
    %263 = vector.shape_cast %262 : vector<1x128x512xf32> to vector<128x512xf32>
    %c1_65 = arith.constant 1 : index
    %c0_66 = arith.constant 0 : index
    %c0_67 = arith.constant 0 : index
    %264 = vector.load %arg6[%c1_65, %c0_66, %c0_67] : memref<2x2x128xf32, #tpu.memory_space<vmem>>, vector<1x2x128xf32>
    %265 = vector.shape_cast %264 : vector<1x2x128xf32> to vector<2x128xf32>
    %c1_68 = arith.constant 1 : index
    %c0_69 = arith.constant 0 : index
    %c0_70 = arith.constant 0 : index
    %266 = vector.load %arg7[%c1_68, %c0_69, %c0_70] : memref<2x2x128xf32, #tpu.memory_space<vmem>>, vector<1x2x128xf32>
    %267 = vector.shape_cast %266 : vector<1x2x128xf32> to vector<2x128xf32>
    %c0_i32_71 = arith.constant 0 : i32
    %c8_i32_72 = arith.constant 8 : i32
    %268 = arith.muli %c0_i32_71, %c8_i32_72 : i32
    %269 = tpu.assume_multiple %268, 8 : i32
    %270 = arith.index_cast %269 : i32 to index
    %c0_73 = arith.constant 0 : index
    %271 = vector.load %arg9[%270, %c0_73] : memref<16x512xf32, #tpu.memory_space<vmem>>, vector<8x512xf32>
    %cst_74 = arith.constant dense<0.000000e+00> : vector<2x512xf32>
    %272 = tpu.matmul %265, %263, %cst_74 {dimension_numbers = #tpu.dot_dimension_numbers<[1], [0], [0], [1], [0, 0, 1, 1], [], []>} : vector<2x128xf32>, vector<128x512xf32>, vector<2x512xf32> -> vector<2x512xf32>
    %273 = vector.extract_strided_slice %271 {offsets = [0, 0], sizes = [2, 512], strides = [1, 1]} : vector<8x512xf32> to vector<2x512xf32>
    %274 = arith.addf %273, %272 : vector<2x512xf32>
    %275 = vector.extract_strided_slice %274 {offsets = [0, 0], sizes = [2, 128], strides = [1, 1]} : vector<2x512xf32> to vector<2x128xf32>
    %276 = arith.negf %275 : vector<2x128xf32>
    %277 = math.exp %276 : vector<2x128xf32>
    %cst_75 = arith.constant 1.000000e+00 : f32
    %278 = vector.broadcast %cst_75 : f32 to vector<2x128xf32>
    %279 = arith.addf %278, %277 : vector<2x128xf32>
    %280 = arith.divf %278, %279 : vector<2x128xf32>
    %281 = vector.extract_strided_slice %274 {offsets = [0, 128], sizes = [2, 128], strides = [1, 1]} : vector<2x512xf32> to vector<2x128xf32>
    %282 = arith.negf %281 : vector<2x128xf32>
    %283 = math.exp %282 : vector<2x128xf32>
    %cst_76 = arith.constant 1.000000e+00 : f32
    %284 = vector.broadcast %cst_76 : f32 to vector<2x128xf32>
    %285 = arith.addf %284, %283 : vector<2x128xf32>
    %286 = arith.divf %284, %285 : vector<2x128xf32>
    %287 = vector.extract_strided_slice %274 {offsets = [0, 256], sizes = [2, 128], strides = [1, 1]} : vector<2x512xf32> to vector<2x128xf32>
    %288 = math.tanh %287 : vector<2x128xf32>
    %289 = vector.extract_strided_slice %274 {offsets = [0, 384], sizes = [2, 128], strides = [1, 1]} : vector<2x512xf32> to vector<2x128xf32>
    %290 = arith.negf %289 : vector<2x128xf32>
    %291 = math.exp %290 : vector<2x128xf32>
    %cst_77 = arith.constant 1.000000e+00 : f32
    %292 = vector.broadcast %cst_77 : f32 to vector<2x128xf32>
    %293 = arith.addf %292, %291 : vector<2x128xf32>
    %294 = arith.divf %292, %293 : vector<2x128xf32>
    %295 = arith.mulf %286, %267 : vector<2x128xf32>
    %296 = arith.mulf %280, %288 : vector<2x128xf32>
    %297 = arith.addf %295, %296 : vector<2x128xf32>
    %298 = math.tanh %297 : vector<2x128xf32>
    %299 = arith.mulf %294, %298 : vector<2x128xf32>
    %cst_78 = arith.constant dense<0.000000e+00> : vector<2x512xf32>
    %300 = tpu.matmul %299, %263, %cst_78 {dimension_numbers = #tpu.dot_dimension_numbers<[1], [0], [0], [1], [0, 0, 1, 1], [], []>} : vector<2x128xf32>, vector<128x512xf32>, vector<2x512xf32> -> vector<2x512xf32>
    %301 = vector.extract_strided_slice %271 {offsets = [2, 0], sizes = [2, 512], strides = [1, 1]} : vector<8x512xf32> to vector<2x512xf32>
    %302 = arith.addf %301, %300 : vector<2x512xf32>
    %303 = vector.extract_strided_slice %302 {offsets = [0, 0], sizes = [2, 128], strides = [1, 1]} : vector<2x512xf32> to vector<2x128xf32>
    %304 = arith.negf %303 : vector<2x128xf32>
    %305 = math.exp %304 : vector<2x128xf32>
    %cst_79 = arith.constant 1.000000e+00 : f32
    %306 = vector.broadcast %cst_79 : f32 to vector<2x128xf32>
    %307 = arith.addf %306, %305 : vector<2x128xf32>
    %308 = arith.divf %306, %307 : vector<2x128xf32>
    %309 = vector.extract_strided_slice %302 {offsets = [0, 128], sizes = [2, 128], strides = [1, 1]} : vector<2x512xf32> to vector<2x128xf32>
    %310 = arith.negf %309 : vector<2x128xf32>
    %311 = math.exp %310 : vector<2x128xf32>
    %cst_80 = arith.constant 1.000000e+00 : f32
    %312 = vector.broadcast %cst_80 : f32 to vector<2x128xf32>
    %313 = arith.addf %312, %311 : vector<2x128xf32>
    %314 = arith.divf %312, %313 : vector<2x128xf32>
    %315 = vector.extract_strided_slice %302 {offsets = [0, 256], sizes = [2, 128], strides = [1, 1]} : vector<2x512xf32> to vector<2x128xf32>
    %316 = math.tanh %315 : vector<2x128xf32>
    %317 = vector.extract_strided_slice %302 {offsets = [0, 384], sizes = [2, 128], strides = [1, 1]} : vector<2x512xf32> to vector<2x128xf32>
    %318 = arith.negf %317 : vector<2x128xf32>
    %319 = math.exp %318 : vector<2x128xf32>
    %cst_81 = arith.constant 1.000000e+00 : f32
    %320 = vector.broadcast %cst_81 : f32 to vector<2x128xf32>
    %321 = arith.addf %320, %319 : vector<2x128xf32>
    %322 = arith.divf %320, %321 : vector<2x128xf32>
    %323 = arith.mulf %314, %297 : vector<2x128xf32>
    %324 = arith.mulf %308, %316 : vector<2x128xf32>
    %325 = arith.addf %323, %324 : vector<2x128xf32>
    %326 = math.tanh %325 : vector<2x128xf32>
    %327 = arith.mulf %322, %326 : vector<2x128xf32>
    %cst_82 = arith.constant dense<0.000000e+00> : vector<2x512xf32>
    %328 = tpu.matmul %327, %263, %cst_82 {dimension_numbers = #tpu.dot_dimension_numbers<[1], [0], [0], [1], [0, 0, 1, 1], [], []>} : vector<2x128xf32>, vector<128x512xf32>, vector<2x512xf32> -> vector<2x512xf32>
    %329 = vector.extract_strided_slice %271 {offsets = [4, 0], sizes = [2, 512], strides = [1, 1]} : vector<8x512xf32> to vector<2x512xf32>
    %330 = arith.addf %329, %328 : vector<2x512xf32>
    %331 = vector.extract_strided_slice %330 {offsets = [0, 0], sizes = [2, 128], strides = [1, 1]} : vector<2x512xf32> to vector<2x128xf32>
    %332 = arith.negf %331 : vector<2x128xf32>
    %333 = math.exp %332 : vector<2x128xf32>
    %cst_83 = arith.constant 1.000000e+00 : f32
    %334 = vector.broadcast %cst_83 : f32 to vector<2x128xf32>
    %335 = arith.addf %334, %333 : vector<2x128xf32>
    %336 = arith.divf %334, %335 : vector<2x128xf32>
    %337 = vector.extract_strided_slice %330 {offsets = [0, 128], sizes = [2, 128], strides = [1, 1]} : vector<2x512xf32> to vector<2x128xf32>
    %338 = arith.negf %337 : vector<2x128xf32>
    %339 = math.exp %338 : vector<2x128xf32>
    %cst_84 = arith.constant 1.000000e+00 : f32
    %340 = vector.broadcast %cst_84 : f32 to vector<2x128xf32>
    %341 = arith.addf %340, %339 : vector<2x128xf32>
    %342 = arith.divf %340, %341 : vector<2x128xf32>
    %343 = vector.extract_strided_slice %330 {offsets = [0, 256], sizes = [2, 128], strides = [1, 1]} : vector<2x512xf32> to vector<2x128xf32>
    %344 = math.tanh %343 : vector<2x128xf32>
    %345 = vector.extract_strided_slice %330 {offsets = [0, 384], sizes = [2, 128], strides = [1, 1]} : vector<2x512xf32> to vector<2x128xf32>
    %346 = arith.negf %345 : vector<2x128xf32>
    %347 = math.exp %346 : vector<2x128xf32>
    %cst_85 = arith.constant 1.000000e+00 : f32
    %348 = vector.broadcast %cst_85 : f32 to vector<2x128xf32>
    %349 = arith.addf %348, %347 : vector<2x128xf32>
    %350 = arith.divf %348, %349 : vector<2x128xf32>
    %351 = arith.mulf %342, %325 : vector<2x128xf32>
    %352 = arith.mulf %336, %344 : vector<2x128xf32>
    %353 = arith.addf %351, %352 : vector<2x128xf32>
    %354 = math.tanh %353 : vector<2x128xf32>
    %355 = arith.mulf %350, %354 : vector<2x128xf32>
    %cst_86 = arith.constant dense<0.000000e+00> : vector<2x512xf32>
    %356 = tpu.matmul %355, %263, %cst_86 {dimension_numbers = #tpu.dot_dimension_numbers<[1], [0], [0], [1], [0, 0, 1, 1], [], []>} : vector<2x128xf32>, vector<128x512xf32>, vector<2x512xf32> -> vector<2x512xf32>
    %357 = vector.extract_strided_slice %271 {offsets = [6, 0], sizes = [2, 512], strides = [1, 1]} : vector<8x512xf32> to vector<2x512xf32>
    %358 = arith.addf %357, %356 : vector<2x512xf32>
    %359 = vector.extract_strided_slice %358 {offsets = [0, 0], sizes = [2, 128], strides = [1, 1]} : vector<2x512xf32> to vector<2x128xf32>
    %360 = arith.negf %359 : vector<2x128xf32>
    %361 = math.exp %360 : vector<2x128xf32>
    %cst_87 = arith.constant 1.000000e+00 : f32
    %362 = vector.broadcast %cst_87 : f32 to vector<2x128xf32>
    %363 = arith.addf %362, %361 : vector<2x128xf32>
    %364 = arith.divf %362, %363 : vector<2x128xf32>
    %365 = vector.extract_strided_slice %358 {offsets = [0, 128], sizes = [2, 128], strides = [1, 1]} : vector<2x512xf32> to vector<2x128xf32>
    %366 = arith.negf %365 : vector<2x128xf32>
    %367 = math.exp %366 : vector<2x128xf32>
    %cst_88 = arith.constant 1.000000e+00 : f32
    %368 = vector.broadcast %cst_88 : f32 to vector<2x128xf32>
    %369 = arith.addf %368, %367 : vector<2x128xf32>
    %370 = arith.divf %368, %369 : vector<2x128xf32>
    %371 = vector.extract_strided_slice %358 {offsets = [0, 256], sizes = [2, 128], strides = [1, 1]} : vector<2x512xf32> to vector<2x128xf32>
    %372 = math.tanh %371 : vector<2x128xf32>
    %373 = vector.extract_strided_slice %358 {offsets = [0, 384], sizes = [2, 128], strides = [1, 1]} : vector<2x512xf32> to vector<2x128xf32>
    %374 = arith.negf %373 : vector<2x128xf32>
    %375 = math.exp %374 : vector<2x128xf32>
    %cst_89 = arith.constant 1.000000e+00 : f32
    %376 = vector.broadcast %cst_89 : f32 to vector<2x128xf32>
    %377 = arith.addf %376, %375 : vector<2x128xf32>
    %378 = arith.divf %376, %377 : vector<2x128xf32>
    %379 = arith.mulf %370, %353 : vector<2x128xf32>
    %380 = arith.mulf %364, %372 : vector<2x128xf32>
    %381 = arith.addf %379, %380 : vector<2x128xf32>
    %382 = math.tanh %381 : vector<2x128xf32>
    %383 = arith.mulf %378, %382 : vector<2x128xf32>
    %384 = tpu.concatenate %299, %327, %355, %383 in 0 : vector<2x128xf32>, vector<2x128xf32>, vector<2x128xf32>, vector<2x128xf32> -> vector<8x128xf32>
    %385 = arith.index_cast %269 : i32 to index
    %c0_90 = arith.constant 0 : index
    %386 = vector.load %arg5[%385, %c0_90] : memref<16x128xf32, #tpu.memory_space<vmem>>, vector<8x128xf32>
    tpu.vector_store %arg5[%385, %c0_90], %384 {strides = array<i32>} : memref<16x128xf32, #tpu.memory_space<vmem>>, vector<8x128xf32>,
    %c1_i32_91 = arith.constant 1 : i32
    %c8_i32_92 = arith.constant 8 : i32
    %387 = arith.muli %c1_i32_91, %c8_i32_92 : i32
    %388 = tpu.assume_multiple %387, 8 : i32
    %389 = arith.index_cast %388 : i32 to index
    %c0_93 = arith.constant 0 : index
    %390 = vector.load %arg9[%389, %c0_93] : memref<16x512xf32, #tpu.memory_space<vmem>>, vector<8x512xf32>
    %cst_94 = arith.constant dense<0.000000e+00> : vector<2x512xf32>
    %391 = tpu.matmul %383, %263, %cst_94 {dimension_numbers = #tpu.dot_dimension_numbers<[1], [0], [0], [1], [0, 0, 1, 1], [], []>} : vector<2x128xf32>, vector<128x512xf32>, vector<2x512xf32> -> vector<2x512xf32>
    %392 = vector.extract_strided_slice %390 {offsets = [0, 0], sizes = [2, 512], strides = [1, 1]} : vector<8x512xf32> to vector<2x512xf32>
    %393 = arith.addf %392, %391 : vector<2x512xf32>
    %394 = vector.extract_strided_slice %393 {offsets = [0, 0], sizes = [2, 128], strides = [1, 1]} : vector<2x512xf32> to vector<2x128xf32>
    %395 = arith.negf %394 : vector<2x128xf32>
    %396 = math.exp %395 : vector<2x128xf32>
    %cst_95 = arith.constant 1.000000e+00 : f32
    %397 = vector.broadcast %cst_95 : f32 to vector<2x128xf32>
    %398 = arith.addf %397, %396 : vector<2x128xf32>
    %399 = arith.divf %397, %398 : vector<2x128xf32>
    %400 = vector.extract_strided_slice %393 {offsets = [0, 128], sizes = [2, 128], strides = [1, 1]} : vector<2x512xf32> to vector<2x128xf32>
    %401 = arith.negf %400 : vector<2x128xf32>
    %402 = math.exp %401 : vector<2x128xf32>
    %cst_96 = arith.constant 1.000000e+00 : f32
    %403 = vector.broadcast %cst_96 : f32 to vector<2x128xf32>
    %404 = arith.addf %403, %402 : vector<2x128xf32>
    %405 = arith.divf %403, %404 : vector<2x128xf32>
    %406 = vector.extract_strided_slice %393 {offsets = [0, 256], sizes = [2, 128], strides = [1, 1]} : vector<2x512xf32> to vector<2x128xf32>
    %407 = math.tanh %406 : vector<2x128xf32>
    %408 = vector.extract_strided_slice %393 {offsets = [0, 384], sizes = [2, 128], strides = [1, 1]} : vector<2x512xf32> to vector<2x128xf32>
    %409 = arith.negf %408 : vector<2x128xf32>
    %410 = math.exp %409 : vector<2x128xf32>
    %cst_97 = arith.constant 1.000000e+00 : f32
    %411 = vector.broadcast %cst_97 : f32 to vector<2x128xf32>
    %412 = arith.addf %411, %410 : vector<2x128xf32>
    %413 = arith.divf %411, %412 : vector<2x128xf32>
    %414 = arith.mulf %405, %381 : vector<2x128xf32>
    %415 = arith.mulf %399, %407 : vector<2x128xf32>
    %416 = arith.addf %414, %415 : vector<2x128xf32>
    %417 = math.tanh %416 : vector<2x128xf32>
    %418 = arith.mulf %413, %417 : vector<2x128xf32>
    %cst_98 = arith.constant dense<0.000000e+00> : vector<2x512xf32>
    %419 = tpu.matmul %418, %263, %cst_98 {dimension_numbers = #tpu.dot_dimension_numbers<[1], [0], [0], [1], [0, 0, 1, 1], [], []>} : vector<2x128xf32>, vector<128x512xf32>, vector<2x512xf32> -> vector<2x512xf32>
    %420 = vector.extract_strided_slice %390 {offsets = [2, 0], sizes = [2, 512], strides = [1, 1]} : vector<8x512xf32> to vector<2x512xf32>
    %421 = arith.addf %420, %419 : vector<2x512xf32>
    %422 = vector.extract_strided_slice %421 {offsets = [0, 0], sizes = [2, 128], strides = [1, 1]} : vector<2x512xf32> to vector<2x128xf32>
    %423 = arith.negf %422 : vector<2x128xf32>
    %424 = math.exp %423 : vector<2x128xf32>
    %cst_99 = arith.constant 1.000000e+00 : f32
    %425 = vector.broadcast %cst_99 : f32 to vector<2x128xf32>
    %426 = arith.addf %425, %424 : vector<2x128xf32>
    %427 = arith.divf %425, %426 : vector<2x128xf32>
    %428 = vector.extract_strided_slice %421 {offsets = [0, 128], sizes = [2, 128], strides = [1, 1]} : vector<2x512xf32> to vector<2x128xf32>
    %429 = arith.negf %428 : vector<2x128xf32>
    %430 = math.exp %429 : vector<2x128xf32>
    %cst_100 = arith.constant 1.000000e+00 : f32
    %431 = vector.broadcast %cst_100 : f32 to vector<2x128xf32>
    %432 = arith.addf %431, %430 : vector<2x128xf32>
    %433 = arith.divf %431, %432 : vector<2x128xf32>
    %434 = vector.extract_strided_slice %421 {offsets = [0, 256], sizes = [2, 128], strides = [1, 1]} : vector<2x512xf32> to vector<2x128xf32>
    %435 = math.tanh %434 : vector<2x128xf32>
    %436 = vector.extract_strided_slice %421 {offsets = [0, 384], sizes = [2, 128], strides = [1, 1]} : vector<2x512xf32> to vector<2x128xf32>
    %437 = arith.negf %436 : vector<2x128xf32>
    %438 = math.exp %437 : vector<2x128xf32>
    %cst_101 = arith.constant 1.000000e+00 : f32
    %439 = vector.broadcast %cst_101 : f32 to vector<2x128xf32>
    %440 = arith.addf %439, %438 : vector<2x128xf32>
    %441 = arith.divf %439, %440 : vector<2x128xf32>
    %442 = arith.mulf %433, %416 : vector<2x128xf32>
    %443 = arith.mulf %427, %435 : vector<2x128xf32>
    %444 = arith.addf %442, %443 : vector<2x128xf32>
    %445 = math.tanh %444 : vector<2x128xf32>
    %446 = arith.mulf %441, %445 : vector<2x128xf32>
    %cst_102 = arith.constant dense<0.000000e+00> : vector<2x512xf32>
    %447 = tpu.matmul %446, %263, %cst_102 {dimension_numbers = #tpu.dot_dimension_numbers<[1], [0], [0], [1], [0, 0, 1, 1], [], []>} : vector<2x128xf32>, vector<128x512xf32>, vector<2x512xf32> -> vector<2x512xf32>
    %448 = vector.extract_strided_slice %390 {offsets = [4, 0], sizes = [2, 512], strides = [1, 1]} : vector<8x512xf32> to vector<2x512xf32>
    %449 = arith.addf %448, %447 : vector<2x512xf32>
    %450 = vector.extract_strided_slice %449 {offsets = [0, 0], sizes = [2, 128], strides = [1, 1]} : vector<2x512xf32> to vector<2x128xf32>
    %451 = arith.negf %450 : vector<2x128xf32>
    %452 = math.exp %451 : vector<2x128xf32>
    %cst_103 = arith.constant 1.000000e+00 : f32
    %453 = vector.broadcast %cst_103 : f32 to vector<2x128xf32>
    %454 = arith.addf %453, %452 : vector<2x128xf32>
    %455 = arith.divf %453, %454 : vector<2x128xf32>
    %456 = vector.extract_strided_slice %449 {offsets = [0, 128], sizes = [2, 128], strides = [1, 1]} : vector<2x512xf32> to vector<2x128xf32>
    %457 = arith.negf %456 : vector<2x128xf32>
    %458 = math.exp %457 : vector<2x128xf32>
    %cst_104 = arith.constant 1.000000e+00 : f32
    %459 = vector.broadcast %cst_104 : f32 to vector<2x128xf32>
    %460 = arith.addf %459, %458 : vector<2x128xf32>
    %461 = arith.divf %459, %460 : vector<2x128xf32>
    %462 = vector.extract_strided_slice %449 {offsets = [0, 256], sizes = [2, 128], strides = [1, 1]} : vector<2x512xf32> to vector<2x128xf32>
    %463 = math.tanh %462 : vector<2x128xf32>
    %464 = vector.extract_strided_slice %449 {offsets = [0, 384], sizes = [2, 128], strides = [1, 1]} : vector<2x512xf32> to vector<2x128xf32>
    %465 = arith.negf %464 : vector<2x128xf32>
    %466 = math.exp %465 : vector<2x128xf32>
    %cst_105 = arith.constant 1.000000e+00 : f32
    %467 = vector.broadcast %cst_105 : f32 to vector<2x128xf32>
    %468 = arith.addf %467, %466 : vector<2x128xf32>
    %469 = arith.divf %467, %468 : vector<2x128xf32>
    %470 = arith.mulf %461, %444 : vector<2x128xf32>
    %471 = arith.mulf %455, %463 : vector<2x128xf32>
    %472 = arith.addf %470, %471 : vector<2x128xf32>
    %473 = math.tanh %472 : vector<2x128xf32>
    %474 = arith.mulf %469, %473 : vector<2x128xf32>
    %cst_106 = arith.constant dense<0.000000e+00> : vector<2x512xf32>
    %475 = tpu.matmul %474, %263, %cst_106 {dimension_numbers = #tpu.dot_dimension_numbers<[1], [0], [0], [1], [0, 0, 1, 1], [], []>} : vector<2x128xf32>, vector<128x512xf32>, vector<2x512xf32> -> vector<2x512xf32>
    %476 = vector.extract_strided_slice %390 {offsets = [6, 0], sizes = [2, 512], strides = [1, 1]} : vector<8x512xf32> to vector<2x512xf32>
    %477 = arith.addf %476, %475 : vector<2x512xf32>
    %478 = vector.extract_strided_slice %477 {offsets = [0, 0], sizes = [2, 128], strides = [1, 1]} : vector<2x512xf32> to vector<2x128xf32>
    %479 = arith.negf %478 : vector<2x128xf32>
    %480 = math.exp %479 : vector<2x128xf32>
    %cst_107 = arith.constant 1.000000e+00 : f32
    %481 = vector.broadcast %cst_107 : f32 to vector<2x128xf32>
    %482 = arith.addf %481, %480 : vector<2x128xf32>
    %483 = arith.divf %481, %482 : vector<2x128xf32>
    %484 = vector.extract_strided_slice %477 {offsets = [0, 128], sizes = [2, 128], strides = [1, 1]} : vector<2x512xf32> to vector<2x128xf32>
    %485 = arith.negf %484 : vector<2x128xf32>
    %486 = math.exp %485 : vector<2x128xf32>
    %cst_108 = arith.constant 1.000000e+00 : f32
    %487 = vector.broadcast %cst_108 : f32 to vector<2x128xf32>
    %488 = arith.addf %487, %486 : vector<2x128xf32>
    %489 = arith.divf %487, %488 : vector<2x128xf32>
    %490 = vector.extract_strided_slice %477 {offsets = [0, 256], sizes = [2, 128], strides = [1, 1]} : vector<2x512xf32> to vector<2x128xf32>
    %491 = math.tanh %490 : vector<2x128xf32>
    %492 = vector.extract_strided_slice %477 {offsets = [0, 384], sizes = [2, 128], strides = [1, 1]} : vector<2x512xf32> to vector<2x128xf32>
    %493 = arith.negf %492 : vector<2x128xf32>
    %494 = math.exp %493 : vector<2x128xf32>
    %cst_109 = arith.constant 1.000000e+00 : f32
    %495 = vector.broadcast %cst_109 : f32 to vector<2x128xf32>
    %496 = arith.addf %495, %494 : vector<2x128xf32>
    %497 = arith.divf %495, %496 : vector<2x128xf32>
    %498 = arith.mulf %489, %472 : vector<2x128xf32>
    %499 = arith.mulf %483, %491 : vector<2x128xf32>
    %500 = arith.addf %498, %499 : vector<2x128xf32>
    %501 = math.tanh %500 : vector<2x128xf32>
    %502 = arith.mulf %497, %501 : vector<2x128xf32>
    %503 = tpu.concatenate %418, %446, %474, %502 in 0 : vector<2x128xf32>, vector<2x128xf32>, vector<2x128xf32>, vector<2x128xf32> -> vector<8x128xf32>
    %504 = arith.index_cast %388 : i32 to index
    %c0_110 = arith.constant 0 : index
    %505 = vector.load %arg5[%504, %c0_110] : memref<16x128xf32, #tpu.memory_space<vmem>>, vector<8x128xf32>
    tpu.vector_store %arg5[%504, %c0_110], %503 {strides = array<i32>} : memref<16x128xf32, #tpu.memory_space<vmem>>, vector<8x128xf32>,
    %c2_i32_111 = arith.constant 2 : i32
    %c1_112 = arith.constant 1 : index
    %c0_113 = arith.constant 0 : index
    %c0_114 = arith.constant 0 : index
    %506 = vector.load %arg6[%c1_112, %c0_113, %c0_114] : memref<2x2x128xf32, #tpu.memory_space<vmem>>, vector<1x2x128xf32>
    %507 = vector.shape_cast %506 : vector<1x2x128xf32> to vector<2x128xf32>
    %508 = vector.shape_cast %502 : vector<2x128xf32> to vector<1x2x128xf32>
    tpu.vector_store %arg6[%c1_112, %c0_113, %c0_114], %508 {strides = array<i32>} : memref<2x2x128xf32, #tpu.memory_space<vmem>>, vector<1x2x128xf32>,
    %c1_115 = arith.constant 1 : index
    %c0_116 = arith.constant 0 : index
    %c0_117 = arith.constant 0 : index
    %509 = vector.load %arg7[%c1_115, %c0_116, %c0_117] : memref<2x2x128xf32, #tpu.memory_space<vmem>>, vector<1x2x128xf32>
    %510 = vector.shape_cast %509 : vector<1x2x128xf32> to vector<2x128xf32>
    %511 = vector.shape_cast %500 : vector<2x128xf32> to vector<1x2x128xf32>
    tpu.vector_store %arg7[%c1_115, %c0_116, %c0_117], %511 {strides = array<i32>} : memref<2x2x128xf32, #tpu.memory_space<vmem>>, vector<1x2x128xf32>,
    return
  }
  func.func @transform_0(%arg0: i32) -> (i32, i32) {
    %c0_i32 = arith.constant 0 : i32
    %c0_i32_0 = arith.constant 0 : i32
    return %arg0, %c0_i32 : i32, i32
  }
  func.func @transform_1(%arg0: i32) -> (i32, i32, i32) {
    %c0_i32 = arith.constant 0 : i32
    %c0_i32_0 = arith.constant 0 : i32
    %c0_i32_1 = arith.constant 0 : i32
    %c0_i32_2 = arith.constant 0 : i32
    return %c0_i32, %c0_i32_0, %c0_i32_1 : i32, i32, i32
  }
  func.func @transform_2(%arg0: i32) -> (i32, i32, i32) {
    %c0_i32 = arith.constant 0 : i32
    %c0_i32_0 = arith.constant 0 : i32
    %c0_i32_1 = arith.constant 0 : i32
    %c0_i32_2 = arith.constant 0 : i32
    return %c0_i32, %c0_i32_0, %c0_i32_1 : i32, i32, i32
  }
  func.func @transform_3(%arg0: i32) -> (i32, i32, i32) {
    %c0_i32 = arith.constant 0 : i32
    %c0_i32_0 = arith.constant 0 : i32
    %c0_i32_1 = arith.constant 0 : i32
    %c0_i32_2 = arith.constant 0 : i32
    return %c0_i32, %c0_i32_0, %c0_i32_1 : i32, i32, i32
  }
  func.func @transform_4(%arg0: i32) -> (i32, i32) {
    %c0_i32 = arith.constant 0 : i32
    %c0_i32_0 = arith.constant 0 : i32
    return %arg0, %c0_i32 : i32, i32
  }
  func.func @transform_5(%arg0: i32) -> (i32, i32, i32) {
    %c0_i32 = arith.constant 0 : i32
    %c0_i32_0 = arith.constant 0 : i32
    %c0_i32_1 = arith.constant 0 : i32
    %c0_i32_2 = arith.constant 0 : i32
    return %c0_i32, %c0_i32_0, %c0_i32_1 : i32, i32, i32
  }
  func.func @transform_6(%arg0: i32) -> (i32, i32, i32) {
    %c0_i32 = arith.constant 0 : i32
    %c0_i32_0 = arith.constant 0 : i32
    %c0_i32_1 = arith.constant 0 : i32
    %c0_i32_2 = arith.constant 0 : i32
    return %c0_i32, %c0_i32_0, %c0_i32_1 : i32, i32, i32
  }
}

</mosaic_0001>

<bundles_post_ra>
// kernel: encoder_rnn_forward.2
= control target key start
LH: loop header
LB: loop body
LE: loop exit
PB: predicated region body
PF: predicated region fallthrough
CT: control target
= control target key end

     0   :  { %v224_v3 = vmov 0.0   ;;  %vm46_vm0 = vcmask 130048   ;;  %v26_v11 = vlaneseq  ;;  %s302_s1 = inlined_call_operand.vmem [shape: f32[16,512], index: 1, kind: input, shape index: {}]   ;;  %s303_s0 = inlined_call_operand.vmem [shape: f32[16,16], index: 0, kind: input, shape index: {}]   ;;  %s304_s2 = inlined_call_operand.vmem [shape: f32[1,512], index: 2, kind: input, shape index: {}]   ;;  %s305_s3 = inlined_call_operand.vmem [shape: f32[16,512], index: 3, kind: output, shape index: {}]  }
   0x1   :  { %v21_v0 = vld [vmem:[%s302_s1 + $0x28] sm:$0xff]  ;;  %v23_v1 = vld [vmem:[%s302_s1 + $0x38] sm:$0xff]  ;;  %v20_v2 = vld [vmem:[%s302_s1 + $0x20] sm:$0xff]  ;;  %117 = vmatprep.mubr.f32.mxu0 %v224_v3  ;;  %194 = vmatprep.mubr.f32.mxu1 %v224_v3 }
   0x2   :  { %81 = vmatprep.subr.mxu0 %v21_v0  ;;  %158 = vmatprep.subr.mxu1 %v23_v1  ;;  %v22_v4 = vld [vmem:[%s302_s1 + $0x30] sm:$0xff]  ;;  %v17_v5 = vld [vmem:[%s302_s1 + $0x8] sm:$0xff]  ;;  %v19_v6 = vld [vmem:[%s302_s1 + $0x18] sm:$0xff]  ;;  %v27_v12 = vshrl.u32 %v26_v11, 7 }
   0x3   :  { %82 = vmatpush1.msra.mxu0 %v20_v2  ;;  %159 = vmatpush1.msra.mxu1 %v22_v4  ;;  %v16_v7 = vld [vmem:[%s302_s1] sm:$0xff]  ;;  %v18_v8 = vld [vmem:[%s302_s1 + $0x10] sm:$0xff]  ;;  %v15_v10 = vld [vmem:[%s303_s0 + $0x8] sm:$0xff] }
   0x4   :  { %v14_v9 = vld [vmem:[%s303_s0] sm:$0xff]  ;;  %83 = vmatprep.subr.mxu0 %v17_v5  ;;  %160 = vmatprep.subr.mxu1 %v19_v6  ;;  %v28_v13 = vsub.s32 0, %v27_v12  ;;  %v36_v14 = vsub.s32 2, %v27_v12  ;;  %v32_v16 = vsub.s32 1, %v27_v12  ;;  %v40_v17 = vsub.s32 3, %v27_v12 }
   0x5   :  { %84 = vmatpush1.msra.mxu0 %v16_v7  ;;  %161 = vmatpush1.msra.mxu1 %v18_v8  ;;  %v24_v15 = vld [vmem:[%s304_s2] sm:$0xf] }
   0x6   :  { %219 = vmatmul.mubr.msk.f32.vlgmr.msra.gmra.mxu0 %vm46_vm0, %v14_v9  ;;  %221 = vmatmul.mubr.msk.f32.vlgmr.msra.gmra.mxu1 %vm46_vm0, %v14_v9  ;;  %v29_v18 = vrot.slane %v24_v15, %v28_v13  ;;  %v37_v19 = vrot.slane %v24_v15, %v36_v14  ;;  %v33_v20 = vrot.slane %v24_v15, %v32_v16 }
   0x7   :  { %123 = vmatprep.mubr.f32.mxu0 %v224_v3  ;;  %200 = vmatprep.mubr.f32.mxu1 %v224_v3  ;;  %v41_v21 = vrot.slane %v24_v15, %v40_v17 }
   0xa   :  { %220 = vmatmul.mubr.msk.f32.gmra.mxu0 %vm46_vm0, %v15_v10  ;;  %222 = vmatmul.mubr.msk.f32.gmra.mxu1 %vm46_vm0, %v15_v10 }
  0xc6   :  { %v119_v22 = vpop.f32.mrf.mxu0  ;;  %v196_v23 = vpop.f32.mrf.mxu1 }
  0xc7   :  { %v120_v24 = vadd.f32 %v119_v22, %v29_v18  ;;  %v197_v25 = vadd.f32 %v196_v23, %v37_v19 }
  0xc8   :  { %v121_v26 = vpop.f32.mrf.mxu0  ;;  %v198_v27 = vpop.f32.mrf.mxu1 }
  0xc9   :  { %207 = vst [vmem:[%s305_s3] sm:$0xff] %v120_v24  ;;  %209 = vst [vmem:[%s305_s3 + $0x10] sm:$0xff] %v197_v25  ;;  %v122_v28 = vadd.f32 %v121_v26, %v33_v20  ;;  %v199_v29 = vadd.f32 %v198_v27, %v41_v21 }
  0xca   :  { %v125_v30 = vpop.f32.mrf.mxu0  ;;  %v202_v31 = vpop.f32.mrf.mxu1 }
  0xcb   :  { %208 = vst [vmem:[%s305_s3 + $0x8] sm:$0xff] %v122_v28  ;;  %210 = vst [vmem:[%s305_s3 + $0x18] sm:$0xff] %v199_v29  ;;  %v126_v32 = vadd.f32 %v125_v30, %v29_v18  ;;  %v203_v33 = vadd.f32 %v202_v31, %v37_v19 }
  0xcc   :  { %v127_v34 = vpop.f32.mrf.mxu0  ;;  %v204_v35 = vpop.f32.mrf.mxu1 }
  0xcd   :  { %211 = vst [vmem:[%s305_s3 + $0x20] sm:$0xff] %v126_v32  ;;  %213 = vst [vmem:[%s305_s3 + $0x30] sm:$0xff] %v203_v33  ;;  %v128_v36 = vadd.f32 %v127_v34, %v33_v20  ;;  %v205_v37 = vadd.f32 %v204_v35, %v41_v21 }
  0xcf   :  { %212 = vst [vmem:[%s305_s3 + $0x28] sm:$0xff] %v128_v36  ;;  %214 = vst [vmem:[%s305_s3 + $0x38] sm:$0xff] %v205_v37 }

// kernel: encoder_rnn_forward.3
= control target key start
LH: loop header
LB: loop body
LE: loop exit
PB: predicated region body
PF: predicated region fallthrough
CT: control target
= control target key end

     0   :  { %12 = vsyncpa [#allocation5], 0  ;;  %v6861_v4 = vmov 0.0   ;;  %s6854_s0 = inlined_call_operand.vmem [shape: f32[16,512], index: 0, kind: input, shape index: {}]   ;;  %s6855_s1 = inlined_call_operand.vmem [shape: f32[2,128,512], index: 1, kind: input, shape index: {}]   ;;  %s6856_s2 = inlined_call_operand.vmem [shape: f32[1,128,512], index: 2, kind: input, shape index: {}]   ;;  %s6857_s3 = inlined_call_operand.vmem [shape: f32[1,1,512], index: 3, kind: input, shape index: {}]   ;;  %s6858_s4 = inlined_call_operand.vmem [shape: f32[16,128], index: 4, kind: output, shape index: {0}]   ;;  %s6859_s5 = inlined_call_operand.hbm [shape: f32[2,2,128], index: 5, kind: output, shape index: {1}]   ;;  %s6860_s6 = inlined_call_operand.hbm [shape: f32[2,2,128], index: 6, kind: output, shape index: {2}]  }
   0x1   :  { %v4037_v0 = vld [vmem:[%s6855_s1 + $0x1e8] sm:$0xff]  ;;  %v4042_v1 = vld [vmem:[%s6855_s1 + $0x1e0] sm:$0xff]  ;;  %167 = vmatprep.mubr.f32.mxu0 %v6861_v4  ;;  %26 = vst [vmem:[#allocation4] sm:$0x3] %v6861_v4  ;;  %27 = vst [vmem:[#allocation4 + $0x2] sm:$0x3] %v6861_v4  ;;  %238 = vmatprep.mubr.f32.mxu1 %v6861_v4 }
   0x2   :  { %7059 = vst [vmem:[#allocation10_spill] sm:$0xff] %v4037_v0  ;;  %v4047_v2 = vld [vmem:[%s6855_s1 + $0x1c8] sm:$0xff]  ;;  %103 = vmatprep.subr.mxu0 %v4037_v0  ;;  %v4053_v3 = vld [vmem:[%s6855_s1 + $0x1c0] sm:$0xff]  ;;  %28 = vst [vmem:[#allocation6] sm:$0x3] %v6861_v4 }
   0x3   :  { %29 = vst [vmem:[#allocation6 + $0x2] sm:$0x3] %v6861_v4  ;;  %104 = vmatpush1.msra.mxu0 %v4042_v1  ;;  %v4064_v5 = vld [vmem:[%s6855_s1 + $0x1a8] sm:$0xff]  ;;  %v4071_v6 = vld [vmem:[%s6855_s1 + $0x1a0] sm:$0xff]  ;;  %v4088_v9 = vld [vmem:[%s6855_s1 + $0x1f8] sm:$0xff] }
   0x4   :  { %105 = vmatprep.subr.mxu0 %v4047_v2  ;;  %v4077_v7 = vld [vmem:[%s6855_s1 + $0x188] sm:$0xff]  ;;  %v4083_v8 = vld [vmem:[%s6855_s1 + $0x180] sm:$0xff]  ;;  %7060 = vst [vmem:[#allocation11_spill] sm:$0xff] %v4088_v9  ;;  %174 = vmatprep.subr.mxu1 %v4088_v9  ;;  %v4100_v11 = vld [vmem:[%s6855_s1 + $0x1f0] sm:$0xff] }
   0x5   :  { %106 = vmatpush1.msra.mxu0 %v4053_v3  ;;  %v4094_v10 = vld [vmem:[%s6855_s1 + $0x168] sm:$0xff]  ;;  %v4106_v12 = vld [vmem:[%s6855_s1 + $0x160] sm:$0xff]  ;;  %175 = vmatpush1.msra.mxu1 %v4100_v11  ;;  %v4112_v13 = vld [vmem:[%s6855_s1 + $0x1d8] sm:$0xff] }
   0x6   :  { %107 = vmatprep.subr.mxu0 %v4064_v5  ;;  %v4117_v14 = vld [vmem:[%s6855_s1 + $0x1d0] sm:$0xff]  ;;  %v4123_v15 = vld [vmem:[%s6855_s1 + $0x148] sm:$0xff]  ;;  %176 = vmatprep.subr.mxu1 %v4112_v13  ;;  %v4129_v16 = vld [vmem:[%s6855_s1 + $0x1b8] sm:$0xff] }
   0x7   :  { %108 = vmatpush1.msra.mxu0 %v4071_v6  ;;  %v4135_v17 = vld [vmem:[%s6855_s1 + $0x140] sm:$0xff]  ;;  %177 = vmatpush1.msra.mxu1 %v4117_v14  ;;  %v4141_v18 = vld [vmem:[%s6855_s1 + $0x1b0] sm:$0xff]  ;;  %v4146_v19 = vld [vmem:[%s6855_s1 + $0x198] sm:$0xff] }
   0x8   :  { %109 = vmatprep.subr.mxu0 %v4077_v7  ;;  %v4152_v20 = vld [vmem:[%s6855_s1 + $0x128] sm:$0xff]  ;;  %178 = vmatprep.subr.mxu1 %v4129_v16  ;;  %v4158_v21 = vld [vmem:[%s6855_s1 + $0x190] sm:$0xff]  ;;  %v4164_v22 = vld [vmem:[%s6855_s1 + $0x120] sm:$0xff] }
   0x9   :  { %110 = vmatpush1.msra.mxu0 %v4083_v8  ;;  %179 = vmatpush1.msra.mxu1 %v4141_v18  ;;  %v4170_v23 = vld [vmem:[%s6855_s1 + $0x178] sm:$0xff]  ;;  %v4176_v24 = vld [vmem:[%s6855_s1 + $0x108] sm:$0xff]  ;;  %v4182_v25 = vld [vmem:[%s6855_s1 + $0x170] sm:$0xff] }
   0xa   :  { %111 = vmatprep.subr.mxu0 %v4094_v10  ;;  %180 = vmatprep.subr.mxu1 %v4146_v19  ;;  %v4188_v26 = vld [vmem:[%s6855_s1 + $0x100] sm:$0xff]  ;;  %v4194_v27 = vld [vmem:[%s6855_s1 + $0x158] sm:$0xff]  ;;  %v4200_v28 = vld [vmem:[%s6855_s1 + $0xe8] sm:$0xff] }
   0xb   :  { %112 = vmatpush1.msra.mxu0 %v4106_v12  ;;  %181 = vmatpush1.msra.mxu1 %v4158_v21  ;;  %v4206_v29 = vld [vmem:[%s6855_s1 + $0x150] sm:$0xff]  ;;  %v4212_v30 = vld [vmem:[%s6855_s1 + $0xe0] sm:$0xff]  ;;  %v4218_v31 = vld [vmem:[%s6855_s1 + $0x138] sm:$0xff] }
   0xc   :  { %113 = vmatprep.subr.mxu0 %v4123_v15  ;;  %182 = vmatprep.subr.mxu1 %v4170_v23  ;;  %v4224_v32 = vld [vmem:[%s6855_s1 + $0xc8] sm:$0xff]  ;;  %v4230_v33 = vld [vmem:[%s6855_s1 + $0x130] sm:$0xff]  ;;  %v4236_v34 = vld [vmem:[%s6855_s1 + $0xc0] sm:$0xff] }
   0xd   :  { %114 = vmatpush1.msra.mxu0 %v4135_v17  ;;  %183 = vmatpush1.msra.mxu1 %v4182_v25  ;;  %v4242_v35 = vld [vmem:[%s6855_s1 + $0x118] sm:$0xff]  ;;  %v4248_v36 = vld [vmem:[%s6855_s1 + $0xa8] sm:$0xff]  ;;  %v4254_v37 = vld [vmem:[%s6855_s1 + $0x110] sm:$0xff] }
   0xe   :  { %115 = vmatprep.subr.mxu0 %v4152_v20  ;;  %184 = vmatprep.subr.mxu1 %v4194_v27  ;;  %v4260_v38 = vld [vmem:[%s6855_s1 + $0xa0] sm:$0xff]  ;;  %v4266_v39 = vld [vmem:[%s6855_s1 + $0xf8] sm:$0xff]  ;;  %v4272_v40 = vld [vmem:[%s6855_s1 + $0x88] sm:$0xff] }
   0xf   :  { %116 = vmatpush1.msra.mxu0 %v4164_v22  ;;  %185 = vmatpush1.msra.mxu1 %v4206_v29  ;;  %7061 = vst [vmem:[#allocation12_spill] sm:$0xff] %v4272_v40  ;;  %v4278_v41 = vld [vmem:[%s6855_s1 + $0xf0] sm:$0xff]  ;;  %v4284_v42 = vld [vmem:[%s6855_s1 + $0x80] sm:$0xff]  ;;  %v4290_v43 = vld [vmem:[%s6855_s1 + $0xd8] sm:$0xff] }
  0x10   :  { %117 = vmatprep.subr.mxu0 %v4176_v24  ;;  %186 = vmatprep.subr.mxu1 %v4218_v31  ;;  %7062 = vst [vmem:[#allocation13_spill] sm:$0xff] %v4284_v42  ;;  %v4296_v44 = vld [vmem:[%s6855_s1 + $0x68] sm:$0xff]  ;;  %v4302_v45 = vld [vmem:[%s6855_s1 + $0xd0] sm:$0xff] }
  0x11   :  { %118 = vmatpush1.msra.mxu0 %v4188_v26  ;;  %187 = vmatpush1.msra.mxu1 %v4230_v33  ;;  %7063 = vst [vmem:[#allocation14_spill] sm:$0xff] %v4296_v44 }
  0x12   :  { %119 = vmatprep.subr.mxu0 %v4200_v28  ;;  %188 = vmatprep.subr.mxu1 %v4242_v35 }
  0x13   :  { %120 = vmatpush1.msra.mxu0 %v4212_v30  ;;  %189 = vmatpush1.msra.mxu1 %v4254_v37 }
  0x14   :  { %121 = vmatprep.subr.mxu0 %v4224_v32  ;;  %190 = vmatprep.subr.mxu1 %v4266_v39 }
  0x15   :  { %122 = vmatpush1.msra.mxu0 %v4236_v34 }
  0x16   :  { %123 = vmatprep.subr.mxu0 %v4248_v36 }
  0x17   :  { %124 = vmatpush1.msra.mxu0 %v4260_v38 }
  0x18   :  { %13 = vsyncpa [#allocation7], 0  ;;  %125 = vmatprep.subr.mxu0 %v4272_v40  ;;  %v4308_v46 = vld [vmem:[%s6855_s1 + $0x60] sm:$0xff]  ;;  %191 = vmatpush1.msra.mxu1 %v4278_v41  ;;  %v4314_v47 = vld [vmem:[%s6855_s1 + $0xb8] sm:$0xff]  ;;  %vm834_vm0 = vcmask 1041408   ;;  %vm836_vm1 = vcmask 1043456  }
  0x19   :  { %7064 = vst [vmem:[#allocation15_spill] sm:$0xff] %v4308_v46  ;;  %126 = vmatpush1.msra.mxu0 %v4284_v42  ;;  %v4320_v48 = vld [vmem:[%s6855_s1 + $0x48] sm:$0xff]  ;;  %192 = vmatprep.subr.mxu1 %v4290_v43  ;;  %v4326_v49 = vld [vmem:[%s6855_s1 + $0xb0] sm:$0xff]  ;;  %v4332_v50 = vld [vmem:[%s6855_s1 + $0x40] sm:$0xff]  ;;  %vm838_vm2 = vcmask 1045504  }
  0x1a   :  { %7065 = vst [vmem:[#allocation16_spill] sm:$0xff] %v4320_v48  ;;  %7066 = vst [vmem:[#allocation17_spill] sm:$0xff] %v4326_v49  ;;  %127 = vmatprep.subr.mxu0 %v4296_v44  ;;  %193 = vmatpush1.msra.mxu1 %v4302_v45  ;;  %v4338_v51 = vld [vmem:[%s6855_s1 + $0x98] sm:$0xff]  ;;  %v4344_v52 = vld [vmem:[%s6855_s1 + $0x28] sm:$0xff] }
  0x1b   :  { %7067 = vst [vmem:[#allocation18_spill] sm:$0xff] %v4332_v50  ;;  %7068 = vst [vmem:[#allocation19_spill] sm:$0xff] %v4338_v51  ;;  %128 = vmatpush1.msra.mxu0 %v4308_v46  ;;  %194 = vmatprep.subr.mxu1 %v4314_v47  ;;  %v4350_v53 = vld [vmem:[%s6855_s1 + $0x90] sm:$0xff]  ;;  %v4356_v54 = vld [vmem:[%s6855_s1 + $0x20] sm:$0xff] }
  0x1c   :  { %7069 = vst [vmem:[#allocation20_spill] sm:$0xff] %v4344_v52  ;;  %7070 = vst [vmem:[#allocation21_spill] sm:$0xff] %v4350_v53  ;;  %129 = vmatprep.subr.mxu0 %v4320_v48  ;;  %195 = vmatpush1.msra.mxu1 %v4326_v49  ;;  %v4362_v55 = vld [vmem:[%s6855_s1 + $0x78] sm:$0xff]  ;;  %v4368_v56 = vld [vmem:[%s6855_s1 + $0x8] sm:$0xff] }
  0x1d   :  { %7071 = vst [vmem:[#allocation22_spill] sm:$0xff] %v4356_v54  ;;  %7072 = vst [vmem:[#allocation23_spill] sm:$0xff] %v4362_v55  ;;  %130 = vmatpush1.msra.mxu0 %v4332_v50  ;;  %196 = vmatprep.subr.mxu1 %v4338_v51  ;;  %v4374_v57 = vld [vmem:[%s6855_s1 + $0x70] sm:$0xff]  ;;  %v4380_v58 = vld [vmem:[%s6855_s1] sm:$0xff] }
  0x1e   :  { %7073 = vst [vmem:[#allocation24_spill] sm:$0xff] %v4368_v56  ;;  %7074 = vst [vmem:[#allocation25_spill] sm:$0xff] %v4374_v57  ;;  %131 = vmatprep.subr.mxu0 %v4344_v52  ;;  %197 = vmatpush1.msra.mxu1 %v4350_v53  ;;  %v4386_v59 = vld [vmem:[%s6855_s1 + $0x58] sm:$0xff]  ;;  %v94_v60 = vld [vmem:[#allocation4] sm:$0x3] }
  0x1f   :  { %7075 = vst [vmem:[#allocation26_spill] sm:$0xff] %v4380_v58  ;;  %7076 = vst [vmem:[#allocation27_spill] sm:$0xff] %v4386_v59  ;;  %132 = vmatpush1.msra.mxu0 %v4356_v54  ;;  %198 = vmatprep.subr.mxu1 %v4362_v55  ;;  %v4393_v61 = vld [vmem:[%s6855_s1 + $0x50] sm:$0xff]  ;;  %v4400_v62 = vld [vmem:[%s6855_s1 + $0x38] sm:$0xff] }
  0x20   :  { %7077 = vst [vmem:[#allocation28_spill] sm:$0xff] %v4393_v61  ;;  %133 = vmatprep.subr.mxu0 %v4368_v56  ;;  %199 = vmatpush1.msra.mxu1 %v4374_v57  ;;  %7078 = vst [vmem:[#allocation29_spill] sm:$0xff] %v4400_v62  ;;  %v4407_v63 = vld [vmem:[%s6855_s1 + $0x30] sm:$0xff]  ;;  %v4413_v4 = vld [vmem:[%s6855_s1 + $0x18] sm:$0xff] }
  0x21   :  { %134 = vmatpush1.msra.mxu0 %v4380_v58  ;;  %200 = vmatprep.subr.mxu1 %v4386_v59  ;;  %7079 = vst [vmem:[#allocation30_spill] sm:$0xff] %v4407_v63  ;;  %7080 = vst [vmem:[#allocation31_spill] sm:$0xff] %v4413_v4  ;;  %v4419_v58 = vld [vmem:[%s6855_s1 + $0x10] sm:$0xff] }
  0x22   :  { %168 = vmatmul.mubr.f32.vlgmr.msra.gmra.mxu0 %v94_v60  ;;  %201 = vmatpush1.msra.mxu1 %v4393_v61  ;;  %7081 = vst [vmem:[#allocation32_spill] sm:$0xff] %v4419_v58 }
  0x23   :  { %202 = vmatprep.subr.mxu1 %v4400_v62  ;;  %273 = vmatprep.subr.mxu0 %v4037_v0 }
  0x24   :  { %203 = vmatpush1.msra.mxu1 %v4407_v63  ;;  %274 = vmatpush1.msra.mxu0 %v4042_v1 }
  0x25   :  { %204 = vmatprep.subr.mxu1 %v4413_v4  ;;  %275 = vmatprep.subr.mxu0 %v4047_v2 }
  0x26   :  { %205 = vmatpush1.msra.mxu1 %v4419_v58  ;;  %276 = vmatpush1.msra.mxu0 %v4053_v3 }
  0x27   :  { %239 = vmatmul.mubr.f32.vlgmr.msra.gmra.mxu1 %v94_v60  ;;  %344 = vmatprep.subr.mxu1 %v4088_v9  ;;  %v7082_v60 = vld [vmem:[#allocation26_spill] sm:$0xff] }
  0x28   :  { %345 = vmatpush1.msra.mxu1 %v4100_v11  ;;  %277 = vmatprep.subr.mxu0 %v4064_v5 }
  0x29   :  { %346 = vmatprep.subr.mxu1 %v4112_v13  ;;  %278 = vmatpush1.msra.mxu0 %v4071_v6 }
  0x2a   :  { %347 = vmatpush1.msra.mxu1 %v4117_v14  ;;  %279 = vmatprep.subr.mxu0 %v4077_v7 }
  0x2b   :  { %348 = vmatprep.subr.mxu1 %v4129_v16  ;;  %280 = vmatpush1.msra.mxu0 %v4083_v8 }
  0x2c   :  { %349 = vmatpush1.msra.mxu1 %v4141_v18  ;;  %281 = vmatprep.subr.mxu0 %v4094_v10 }
  0x2d   :  { %350 = vmatprep.subr.mxu1 %v4146_v19  ;;  %282 = vmatpush1.msra.mxu0 %v4106_v12 }
  0x2e   :  { %351 = vmatpush1.msra.mxu1 %v4158_v21  ;;  %283 = vmatprep.subr.mxu0 %v4123_v15 }
  0x2f   :  { %352 = vmatprep.subr.mxu1 %v4170_v23  ;;  %284 = vmatpush1.msra.mxu0 %v4135_v17 }
  0x30   :  { %353 = vmatpush1.msra.mxu1 %v4182_v25  ;;  %285 = vmatprep.subr.mxu0 %v4152_v20 }
  0x31   :  { %354 = vmatprep.subr.mxu1 %v4194_v27  ;;  %286 = vmatpush1.msra.mxu0 %v4164_v22 }
  0x32   :  { %355 = vmatpush1.msra.mxu1 %v4206_v29  ;;  %287 = vmatprep.subr.mxu0 %v4176_v24 }
  0x33   :  { %356 = vmatprep.subr.mxu1 %v4218_v31  ;;  %288 = vmatpush1.msra.mxu0 %v4188_v26 }
  0x34   :  { %357 = vmatpush1.msra.mxu1 %v4230_v33  ;;  %289 = vmatprep.subr.mxu0 %v4200_v28 }
  0x35   :  { %358 = vmatprep.subr.mxu1 %v4242_v35  ;;  %290 = vmatpush1.msra.mxu0 %v4212_v30 }
  0x36   :  { %359 = vmatpush1.msra.mxu1 %v4254_v37  ;;  %291 = vmatprep.subr.mxu0 %v4224_v32 }
  0x37   :  { %360 = vmatprep.subr.mxu1 %v4266_v39  ;;  %292 = vmatpush1.msra.mxu0 %v4236_v34 }
  0x38   :  { %361 = vmatpush1.msra.mxu1 %v4278_v41  ;;  %293 = vmatprep.subr.mxu0 %v4248_v36 }
  0x39   :  { %362 = vmatprep.subr.mxu1 %v4290_v43  ;;  %294 = vmatpush1.msra.mxu0 %v4260_v38 }
  0x3a   :  { %363 = vmatpush1.msra.mxu1 %v4302_v45  ;;  %295 = vmatprep.subr.mxu0 %v4272_v40 }
  0x3b   :  { %364 = vmatprep.subr.mxu1 %v4314_v47  ;;  %296 = vmatpush1.msra.mxu0 %v4284_v42 }
  0x3c   :  { %365 = vmatpush1.msra.mxu1 %v4326_v49  ;;  %297 = vmatprep.subr.mxu0 %v4296_v44 }
  0x3d   :  { %366 = vmatprep.subr.mxu1 %v4338_v51  ;;  %298 = vmatpush1.msra.mxu0 %v4308_v46 }
  0x3e   :  { %367 = vmatpush1.msra.mxu1 %v4350_v53  ;;  %299 = vmatprep.subr.mxu0 %v4320_v48  ;;  %v7083_v48 = vmov 0.0  }
  0x3f   :  { %368 = vmatprep.subr.mxu1 %v4362_v55  ;;  %300 = vmatpush1.msra.mxu0 %v4332_v50 }
  0x40   :  { %369 = vmatpush1.msra.mxu1 %v4374_v57  ;;  %301 = vmatprep.subr.mxu0 %v4344_v52  ;;  %v95_v57 = vld [vmem:[#allocation6] sm:$0x3] }
  0x41   :  { %370 = vmatprep.subr.mxu1 %v4386_v59  ;;  %302 = vmatpush1.msra.mxu0 %v4356_v54 }
  0x42   :  { %371 = vmatpush1.msra.mxu1 %v4393_v61  ;;  %303 = vmatprep.subr.mxu0 %v4368_v56  ;;  %v4495_v56 = vld [vmem:[%s6854_s0] sm:$0xff]  ;;  %v4512_v61 = vld [vmem:[%s6854_s0 + $0x10] sm:$0xff] }
  0x43   :  { %372 = vmatprep.subr.mxu1 %v4400_v62  ;;  %304 = vmatpush1.msra.mxu0 %v7082_v60  ;;  %7084 = vst [vmem:[#allocation33_spill] sm:$0xff] %v4495_v56  ;;  %v4507_v62 = vld [vmem:[%s6854_s0 + $0x18] sm:$0xff] }
  0x44   :  { %373 = vmatpush1.msra.mxu1 %v4407_v63  ;;  %337 = vmatprep.mubr.f32.mxu0 %v7083_v48  ;;  %v4500_v63 = vld [vmem:[%s6854_s0 + $0x8] sm:$0xff] }
  0x45   :  { %374 = vmatprep.subr.mxu1 %v4413_v4  ;;  %408 = vmatprep.mubr.f32.mxu1 %v7083_v48  ;;  %7085 = vst [vmem:[#allocation34_spill] sm:$0xff] %v4500_v63 }
  0x46   :  { %375 = vmatpush1.msra.mxu1 %v4419_v58  ;;  %461 = vmatprep.subr.mxu0 %v4037_v0 }
  0x47   :  { %532 = vmatprep.subr.mxu1 %v4088_v9 }
  0xe2   :  { %v169_v60 = vpop.f32.mrf.mxu0 }
  0xe3   :  { %v245_v4 = vadd.f32 %v169_v60, %v4495_v56 }
  0xe4   :  { %v171_v48 = vpop.f32.mrf.mxu0 }
  0xe5   :  { %v3440_v54 = vmul.f32 -1.442695, %v245_v4  ;;  %v246_v58 = vadd.f32 %v171_v48, %v4500_v63 }
  0xe7   :  { %3562 = vpow2.f32 %v3440_v54  ;;  %v3441_v0 = vmul.f32 -1.442695, %v246_v58  ;;  %v240_v9 = vpop.f32.mrf.mxu1 }
  0xe8   :  { %v247_v4 = vadd.f32 %v240_v9, %v4512_v61 }
  0xe9   :  { %3564 = vpow2.f32 %v3441_v0  ;;  %v242_v52 = vpop.f32.mrf.mxu1 }
  0xea   :  { %v248_v60 = vadd.f32 %v242_v52, %v4507_v62  ;;  %3566 = vtanh.f32 %v247_v4 }
  0xec   :  { %v3442_v48 = vmul.f32 -1.442695, %v248_v60 }
  0xee   :  { %3568 = vpow2.f32 %v3442_v48  ;;  %v7096_v48 = vld [vmem:[#allocation20_spill] sm:$0xff] }
  0xf4   :  { %v3563_v54 = vpop.eup %3562 }
  0xf5   :  { %v252_v58 = vadd.f32 1.0, %v3563_v54  ;;  %v7097_v54 = vld [vmem:[#allocation29_spill] sm:$0xff] }
  0xf6   :  { %v3565_v0 = vpop.eup %3564 }
  0xf7   :  { %3570 = vrcp.f32 %v252_v58  ;;  %v258_v63 = vadd.f32 1.0, %v3565_v0  ;;  %v3567_v56 = vpop.eup %3566  ;;  %v7098_v58 = vld [vmem:[#allocation22_spill] sm:$0xff] }
  0xf8   :  { %v7099_v0 = vld [vmem:[#allocation30_spill] sm:$0xff] }
  0xf9   :  { %3572 = vrcp.f32 %v258_v63  ;;  %v7095_v63 = vld [vmem:[#allocation28_spill] sm:$0xff] }
  0xfb   :  { %v3569_v50 = vpop.eup %3568 }
  0xfc   :  { %v265_v55 = vadd.f32 1.0, %v3569_v50  ;;  %v7089_v50 = vld [vmem:[#allocation23_spill] sm:$0xff] }
  0xfe   :  { %3574 = vrcp.f32 %v265_v55  ;;  %v7091_v55 = vld [vmem:[#allocation25_spill] sm:$0xff] }
 0x104   :  { %v3571_v59 = vpop.eup %3570 }
 0x105   :  { %v269_v53 = vmul.f32 %v3571_v59, %v3567_v56  ;;  %v7092_v56 = vld [vmem:[#allocation16_spill] sm:$0xff]  ;;  %v7094_v59 = vld [vmem:[#allocation18_spill] sm:$0xff] }
 0x106   :  { %v3573_v46 = vpop.eup %3572 }
 0x107   :  { %v268_v44 = vmul.f32 %v3573_v46, %v95_v57  ;;  %v7088_v46 = vld [vmem:[#allocation14_spill] sm:$0xff]  ;;  %v7093_v57 = vld [vmem:[#allocation27_spill] sm:$0xff] }
 0x109   :  { %v4516_v52 = vadd.f32 %v269_v53, %v268_v44  ;;  %v7087_v44 = vld [vmem:[#allocation21_spill] sm:$0xff]  ;;  %v7090_v53 = vld [vmem:[#allocation15_spill] sm:$0xff] }
 0x10b   :  { %3576 = vtanh.f32 %v4516_v52  ;;  %v3575_v9 = vpop.eup %3574 }
 0x118   :  { %v3577_v60 = vpop.eup %3576 }
 0x119   :  { %v4519_v4 = vmul.f32 %v3577_v60, %v3575_v9  ;;  %v7100_v9 = vld [vmem:[#allocation24_spill] sm:$0xff]  ;;  %v7101_v60 = vld [vmem:[#allocation31_spill] sm:$0xff] }
 0x11b   :  { %7086 = vst [vmem:[#allocation35_spill] sm:$0xff] %v4519_v4  ;;  %338 = vmatmul.mubr.f32.vlgmr.msra.gmra.mxu0 %v4519_v4  ;;  %409 = vmatmul.mubr.f32.vlgmr.msra.gmra.mxu1 %v4519_v4  ;;  %v7102_v4 = vld [vmem:[#allocation26_spill] sm:$0xff] }
 0x11c   :  { %462 = vmatpush1.msra.mxu0 %v4042_v1  ;;  %533 = vmatpush1.msra.mxu1 %v4100_v11 }
 0x11d   :  { %463 = vmatprep.subr.mxu0 %v4047_v2  ;;  %534 = vmatprep.subr.mxu1 %v4112_v13 }
 0x11e   :  { %464 = vmatpush1.msra.mxu0 %v4053_v3  ;;  %535 = vmatpush1.msra.mxu1 %v4117_v14 }
 0x11f   :  { %465 = vmatprep.subr.mxu0 %v4064_v5  ;;  %536 = vmatprep.subr.mxu1 %v4129_v16 }
 0x120   :  { %466 = vmatpush1.msra.mxu0 %v4071_v6  ;;  %537 = vmatpush1.msra.mxu1 %v4141_v18 }
 0x121   :  { %467 = vmatprep.subr.mxu0 %v4077_v7  ;;  %538 = vmatprep.subr.mxu1 %v4146_v19 }
 0x122   :  { %468 = vmatpush1.msra.mxu0 %v4083_v8  ;;  %539 = vmatpush1.msra.mxu1 %v4158_v21 }
 0x123   :  { %469 = vmatprep.subr.mxu0 %v4094_v10  ;;  %540 = vmatprep.subr.mxu1 %v4170_v23 }
 0x124   :  { %470 = vmatpush1.msra.mxu0 %v4106_v12  ;;  %541 = vmatpush1.msra.mxu1 %v4182_v25 }
 0x125   :  { %471 = vmatprep.subr.mxu0 %v4123_v15  ;;  %542 = vmatprep.subr.mxu1 %v4194_v27 }
 0x126   :  { %472 = vmatpush1.msra.mxu0 %v4135_v17  ;;  %543 = vmatpush1.msra.mxu1 %v4206_v29 }
 0x127   :  { %473 = vmatprep.subr.mxu0 %v4152_v20  ;;  %544 = vmatprep.subr.mxu1 %v4218_v31 }
 0x128   :  { %474 = vmatpush1.msra.mxu0 %v4164_v22  ;;  %545 = vmatpush1.msra.mxu1 %v4230_v33 }
 0x129   :  { %475 = vmatprep.subr.mxu0 %v4176_v24  ;;  %546 = vmatprep.subr.mxu1 %v4242_v35 }
 0x12a   :  { %476 = vmatpush1.msra.mxu0 %v4188_v26  ;;  %547 = vmatpush1.msra.mxu1 %v4254_v37 }
 0x12b   :  { %477 = vmatprep.subr.mxu0 %v4200_v28  ;;  %548 = vmatprep.subr.mxu1 %v4266_v39 }
 0x12c   :  { %478 = vmatpush1.msra.mxu0 %v4212_v30  ;;  %549 = vmatpush1.msra.mxu1 %v4278_v41 }
 0x12d   :  { %479 = vmatprep.subr.mxu0 %v4224_v32  ;;  %550 = vmatprep.subr.mxu1 %v4290_v43 }
 0x12e   :  { %480 = vmatpush1.msra.mxu0 %v4236_v34  ;;  %551 = vmatpush1.msra.mxu1 %v4302_v45 }
 0x12f   :  { %481 = vmatprep.subr.mxu0 %v4248_v36  ;;  %552 = vmatprep.subr.mxu1 %v4314_v47 }
 0x130   :  { %482 = vmatpush1.msra.mxu0 %v4260_v38  ;;  %553 = vmatpush1.msra.mxu1 %v4326_v49 }
 0x131   :  { %483 = vmatprep.subr.mxu0 %v4272_v40  ;;  %554 = vmatprep.subr.mxu1 %v4338_v51 }
 0x132   :  { %484 = vmatpush1.msra.mxu0 %v4284_v42  ;;  %555 = vmatpush1.msra.mxu1 %v7087_v44 }
 0x133   :  { %485 = vmatprep.subr.mxu0 %v7088_v46  ;;  %556 = vmatprep.subr.mxu1 %v7089_v50  ;;  %v7108_v50 = vld [vmem:[#allocation34_spill] sm:$0xff] }
 0x134   :  { %486 = vmatpush1.msra.mxu0 %v7090_v53  ;;  %557 = vmatpush1.msra.mxu1 %v7091_v55 }
 0x135   :  { %487 = vmatprep.subr.mxu0 %v7092_v56  ;;  %558 = vmatprep.subr.mxu1 %v7093_v57  ;;  %v7103_v56 = vmov 0.0   ;;  %v7104_v57 = vld [vmem:[#allocation32_spill] sm:$0xff] }
 0x136   :  { %488 = vmatpush1.msra.mxu0 %v7094_v59  ;;  %559 = vmatpush1.msra.mxu1 %v7095_v63  ;;  %v7105_v63 = vld [vmem:[#allocation10_spill] sm:$0xff] }
 0x137   :  { %489 = vmatprep.subr.mxu0 %v7096_v48  ;;  %560 = vmatprep.subr.mxu1 %v7097_v54  ;;  %v7106_v48 = vld [vmem:[#allocation11_spill] sm:$0xff] }
 0x138   :  { %490 = vmatpush1.msra.mxu0 %v7098_v58  ;;  %561 = vmatpush1.msra.mxu1 %v7099_v0  ;;  %v7107_v0 = vld [vmem:[#allocation33_spill] sm:$0xff] }
 0x139   :  { %491 = vmatprep.subr.mxu0 %v7100_v9  ;;  %562 = vmatprep.subr.mxu1 %v7101_v60 }
 0x13a   :  { %492 = vmatpush1.msra.mxu0 %v7102_v4  ;;  %525 = vmatprep.mubr.f32.mxu0 %v7103_v56 }
 0x13b   :  { %563 = vmatpush1.msra.mxu1 %v7104_v57  ;;  %596 = vmatprep.mubr.f32.mxu1 %v7103_v56 }
 0x13c   :  { %649 = vmatprep.subr.mxu0 %v7105_v63  ;;  %720 = vmatprep.subr.mxu1 %v7106_v48 }
 0x1db   :  { %v339_v54 = vpop.f32.mrf.mxu0  ;;  %v410_v9 = vpop.f32.mrf.mxu1 }
 0x1dc   :  { %v419_v58 = vrot.slane %v339_v54, 6  ;;  %v421_v63 = vrot.slane %v410_v9, 6 }
 0x1dd   :  { %v341_v59 = vpop.f32.mrf.mxu0  ;;  %v412_v44 = vpop.f32.mrf.mxu1 }
 0x1de   :  { %v427_v55 = vadd.f32 %v419_v58, %v7107_v0  ;;  %v420_v53 = vrot.slane %v341_v59, 6  ;;  %v422_v57 = vrot.slane %v412_v44, 6  ;;  %v429_v54 = vadd.f32 %v421_v63, %v4512_v61 }
 0x1e0   :  { %v3443_v60 = vmul.f32 -1.442695, %v427_v55  ;;  %v428_v4 = vadd.f32 %v420_v53, %v7108_v50  ;;  %v430_v56 = vadd.f32 %v422_v57, %v4507_v62 }
 0x1e2   :  { %3578 = vpow2.f32 %v3443_v60  ;;  %v3444_v46 = vmul.f32 -1.442695, %v428_v4  ;;  %v3445_v42 = vmul.f32 -1.442695, %v430_v56  ;;  %v7111_v60 = vld [vmem:[#allocation13_spill] sm:$0xff] }
 0x1e4   :  { %3580 = vpow2.f32 %v3444_v46  ;;  %v451_v46 = vrot.slane %v4516_v52, 6  ;;  %v7109_v52 = vld [vmem:[#allocation12_spill] sm:$0xff] }
 0x1e5   :  { %3582 = vpow2.f32 %v3445_v42 }
 0x1ef   :  { %v3579_v48 = vpop.eup %3578 }
 0x1f0   :  { %v434_v51 = vadd.f32 1.0, %v3579_v48  ;;  %v7110_v48 = vld [vmem:[#allocation19_spill] sm:$0xff] }
 0x1f1   :  { %v3581_v40 = vpop.eup %3580 }
 0x1f2   :  { %3584 = vrcp.f32 %v434_v51  ;;  %v440_v59 = vadd.f32 1.0, %v3581_v40  ;;  %v3583_v53 = vpop.eup %3582 }
 0x1f3   :  { %3586 = vtanh.f32 %v429_v54  ;;  %v447_v58 = vadd.f32 1.0, %v3583_v53  ;;  %v7112_v54 = vld [vmem:[#allocation21_spill] sm:$0xff]  ;;  %v7114_v53 = vld [vmem:[#allocation23_spill] sm:$0xff] }
 0x1f4   :  { %3588 = vrcp.f32 %v440_v59  ;;  %v7113_v59 = vld [vmem:[#allocation14_spill] sm:$0xff] }
 0x1f5   :  { %3590 = vrcp.f32 %v447_v58  ;;  %v7119_v58 = vld [vmem:[#allocation18_spill] sm:$0xff] }
 0x1ff   :  { %v3585_v55 = vpop.eup %3584 }
 0x200   :  { %v3587_v4 = vpop.eup %3586 }
 0x201   :  { %v3589_v44 = vpop.eup %3588  ;;  %v454_v57 = vmul.f32 %v3587_v4, %v3585_v55  ;;  %v7115_v55 = vld [vmem:[#allocation15_spill] sm:$0xff]  ;;  %v7116_v4 = vld [vmem:[#allocation25_spill] sm:$0xff] }
 0x202   :  { %v453_v9 = vmul.f32 %v3589_v44, %v451_v46  ;;  %v3591_v63 = vpop.eup %3590  ;;  %v7117_v46 = vld [vmem:[#allocation16_spill] sm:$0xff]  ;;  %v7118_v44 = vld [vmem:[#allocation27_spill] sm:$0xff] }
 0x204   :  { %v4594_v56 = vadd.f32 %v454_v57, %v453_v9  ;;  %v7120_v57 = vld [vmem:[#allocation28_spill] sm:$0xff] }
 0x205   :  { %v7121_v9 = vld [vmem:[#allocation20_spill] sm:$0xff] }
 0x206   :  { %3592 = vtanh.f32 %v4594_v56 }
 0x213   :  { %v3593_v42 = vpop.eup %3592 }
 0x214   :  { %v4597_v51 = vmul.f32 %v3593_v42, %v3591_v63  ;;  %v7122_v63 = vld [vmem:[#allocation29_spill] sm:$0xff]  ;;  %v7123_v42 = vld [vmem:[#allocation22_spill] sm:$0xff] }
 0x216   :  { %v459_v40 = vrot.slane %v4597_v51, 2 }
 0x218   :  { %526 = vmatmul.mubr.f32.vlgmr.msra.gmra.mxu0 %v459_v40  ;;  %597 = vmatmul.mubr.f32.vlgmr.msra.gmra.mxu1 %v459_v40  ;;  %v7124_v40 = vld [vmem:[#allocation30_spill] sm:$0xff] }
 0x219   :  { %650 = vmatpush1.msra.mxu0 %v4042_v1  ;;  %721 = vmatpush1.msra.mxu1 %v4100_v11 }
 0x21a   :  { %651 = vmatprep.subr.mxu0 %v4047_v2  ;;  %722 = vmatprep.subr.mxu1 %v4112_v13 }
 0x21b   :  { %652 = vmatpush1.msra.mxu0 %v4053_v3  ;;  %723 = vmatpush1.msra.mxu1 %v4117_v14 }
 0x21c   :  { %653 = vmatprep.subr.mxu0 %v4064_v5  ;;  %724 = vmatprep.subr.mxu1 %v4129_v16 }
 0x21d   :  { %654 = vmatpush1.msra.mxu0 %v4071_v6  ;;  %725 = vmatpush1.msra.mxu1 %v4141_v18 }
 0x21e   :  { %655 = vmatprep.subr.mxu0 %v4077_v7  ;;  %726 = vmatprep.subr.mxu1 %v4146_v19 }
 0x21f   :  { %656 = vmatpush1.msra.mxu0 %v4083_v8  ;;  %727 = vmatpush1.msra.mxu1 %v4158_v21 }
 0x220   :  { %657 = vmatprep.subr.mxu0 %v4094_v10  ;;  %728 = vmatprep.subr.mxu1 %v4170_v23 }
 0x221   :  { %658 = vmatpush1.msra.mxu0 %v4106_v12  ;;  %729 = vmatpush1.msra.mxu1 %v4182_v25 }
 0x222   :  { %659 = vmatprep.subr.mxu0 %v4123_v15  ;;  %730 = vmatprep.subr.mxu1 %v4194_v27 }
 0x223   :  { %660 = vmatpush1.msra.mxu0 %v4135_v17  ;;  %731 = vmatpush1.msra.mxu1 %v4206_v29 }
 0x224   :  { %661 = vmatprep.subr.mxu0 %v4152_v20  ;;  %732 = vmatprep.subr.mxu1 %v4218_v31 }
 0x225   :  { %662 = vmatpush1.msra.mxu0 %v4164_v22  ;;  %733 = vmatpush1.msra.mxu1 %v4230_v33 }
 0x226   :  { %663 = vmatprep.subr.mxu0 %v4176_v24  ;;  %734 = vmatprep.subr.mxu1 %v4242_v35 }
 0x227   :  { %664 = vmatpush1.msra.mxu0 %v4188_v26  ;;  %735 = vmatpush1.msra.mxu1 %v4254_v37 }
 0x228   :  { %665 = vmatprep.subr.mxu0 %v4200_v28  ;;  %736 = vmatprep.subr.mxu1 %v4266_v39 }
 0x229   :  { %666 = vmatpush1.msra.mxu0 %v4212_v30  ;;  %737 = vmatpush1.msra.mxu1 %v4278_v41 }
 0x22a   :  { %667 = vmatprep.subr.mxu0 %v4224_v32  ;;  %738 = vmatprep.subr.mxu1 %v4290_v43 }
 0x22b   :  { %668 = vmatpush1.msra.mxu0 %v4236_v34  ;;  %739 = vmatpush1.msra.mxu1 %v4302_v45 }
 0x22c   :  { %669 = vmatprep.subr.mxu0 %v4248_v36  ;;  %740 = vmatprep.subr.mxu1 %v4314_v47 }
 0x22d   :  { %670 = vmatpush1.msra.mxu0 %v4260_v38  ;;  %741 = vmatpush1.msra.mxu1 %v4326_v49 }
 0x22e   :  { %671 = vmatprep.subr.mxu0 %v7109_v52  ;;  %742 = vmatprep.subr.mxu1 %v7110_v48 }
 0x22f   :  { %672 = vmatpush1.msra.mxu0 %v7111_v60  ;;  %743 = vmatpush1.msra.mxu1 %v7112_v54 }
 0x230   :  { %673 = vmatprep.subr.mxu0 %v7113_v59  ;;  %744 = vmatprep.subr.mxu1 %v7114_v53  ;;  %v7125_v53 = vld [vmem:[#allocation24_spill] sm:$0xff] }
 0x231   :  { %674 = vmatpush1.msra.mxu0 %v7115_v55  ;;  %745 = vmatpush1.msra.mxu1 %v7116_v4  ;;  %v7126_v55 = vld [vmem:[#allocation31_spill] sm:$0xff]  ;;  %v7127_v4 = vld [vmem:[#allocation26_spill] sm:$0xff] }
 0x232   :  { %675 = vmatprep.subr.mxu0 %v7117_v46  ;;  %746 = vmatprep.subr.mxu1 %v7118_v44  ;;  %v7128_v46 = vmov 0.0   ;;  %v7129_v44 = vld [vmem:[#allocation32_spill] sm:$0xff] }
 0x233   :  { %676 = vmatpush1.msra.mxu0 %v7119_v58  ;;  %747 = vmatpush1.msra.mxu1 %v7120_v57  ;;  %v7130_v57 = vld [vmem:[#allocation10_spill] sm:$0xff] }
 0x234   :  { %677 = vmatprep.subr.mxu0 %v7121_v9  ;;  %748 = vmatprep.subr.mxu1 %v7122_v63  ;;  %v7131_v9 = vld [vmem:[#allocation11_spill] sm:$0xff] }
 0x235   :  { %678 = vmatpush1.msra.mxu0 %v7123_v42  ;;  %749 = vmatpush1.msra.mxu1 %v7124_v40 }
 0x236   :  { %679 = vmatprep.subr.mxu0 %v7125_v53  ;;  %750 = vmatprep.subr.mxu1 %v7126_v55 }
 0x237   :  { %680 = vmatpush1.msra.mxu0 %v7127_v4  ;;  %713 = vmatprep.mubr.f32.mxu0 %v7128_v46 }
 0x238   :  { %751 = vmatpush1.msra.mxu1 %v7129_v44  ;;  %784 = vmatprep.mubr.f32.mxu1 %v7128_v46 }
 0x239   :  { %851 = vmatprep.subr.mxu0 %v7130_v57  ;;  %922 = vmatprep.subr.mxu1 %v7131_v9 }
 0x2d8   :  { %v527_v63 = vpop.f32.mrf.mxu0  ;;  %v598_v53 = vpop.f32.mrf.mxu1 }
 0x2d9   :  { %v607_v42 = vrot.slane %v527_v63, 4  ;;  %v609_v57 = vrot.slane %v598_v53, 4 }
 0x2da   :  { %v529_v58 = vpop.f32.mrf.mxu0  ;;  %v600_v60 = vpop.f32.mrf.mxu1 }
 0x2db   :  { %v615_v40 = vadd.f32 %v607_v42, %v7107_v0  ;;  %v608_v59 = vrot.slane %v529_v58, 4  ;;  %v610_v44 = vrot.slane %v600_v60, 4  ;;  %v617_v63 = vadd.f32 %v609_v57, %v4512_v61 }
 0x2dd   :  { %v3446_v55 = vmul.f32 -1.442695, %v615_v40  ;;  %v616_v4 = vadd.f32 %v608_v59, %v7108_v50  ;;  %v618_v46 = vadd.f32 %v610_v44, %v4507_v62 }
 0x2df   :  { %3594 = vpow2.f32 %v3446_v55  ;;  %v3447_v54 = vmul.f32 -1.442695, %v616_v4  ;;  %v3448_v48 = vmul.f32 -1.442695, %v618_v46 }
 0x2e1   :  { %3596 = vpow2.f32 %v3447_v54  ;;  %v639_v54 = vrot.slane %v4594_v56, 6 }
 0x2e2   :  { %3598 = vpow2.f32 %v3448_v48  ;;  %v7132_v48 = vld [vmem:[#allocation35_spill] sm:$0xff] }
 0x2e3   :  { %v835_v57 = vsel %vm834_vm0, %v7132_v48, %v4597_v51  ;;  %v4789_v48 = vld [vmem:[%s6855_s1 + $0x1d8] sm:$0xff] }
 0x2ec   :  { %v3595_v9 = vpop.eup %3594 }
 0x2ed   :  { %v622_v52 = vadd.f32 1.0, %v3595_v9 }
 0x2ee   :  { %v3597_v49 = vpop.eup %3596 }
 0x2ef   :  { %3600 = vrcp.f32 %v622_v52  ;;  %v628_v58 = vadd.f32 1.0, %v3597_v49  ;;  %v3599_v59 = vpop.eup %3598 }
 0x2f0   :  { %3602 = vtanh.f32 %v617_v63  ;;  %v635_v42 = vadd.f32 1.0, %v3599_v59 }
 0x2f1   :  { %3604 = vrcp.f32 %v628_v58 }
 0x2f2   :  { %3606 = vrcp.f32 %v635_v42 }
 0x2fc   :  { %v3601_v55 = vpop.eup %3600 }
 0x2fd   :  { %v3603_v4 = vpop.eup %3602 }
 0x2fe   :  { %v3605_v60 = vpop.eup %3604  ;;  %v642_v44 = vmul.f32 %v3603_v4, %v3601_v55 }
 0x2ff   :  { %v641_v53 = vmul.f32 %v3605_v60, %v639_v54  ;;  %v3607_v40 = vpop.eup %3606 }
 0x301   :  { %v4671_v46 = vadd.f32 %v642_v44, %v641_v53 }
 0x303   :  { %3608 = vtanh.f32 %v4671_v46  ;;  %v827_v59 = vrot.slane %v4671_v46, 6  ;;  %v4771_v46 = vld [vmem:[%s6855_s1 + $0x1e0] sm:$0xff] }
 0x310   :  { %v3609_v52 = vpop.eup %3608 }
 0x311   :  { %v645_v49 = vmul.f32 %v3609_v52, %v3607_v40  ;;  %v4777_v52 = vld [vmem:[%s6855_s1 + $0x1f0] sm:$0xff] }
 0x313   :  { %v647_v9 = vrot.slane %v645_v49, 4  ;;  %v4678_v56 = vsel %vm836_vm1, %v835_v57, %v645_v49  ;;  %v4783_v49 = vld [vmem:[%s6855_s1 + $0x1c8] sm:$0xff]  ;;  %v4795_v57 = vld [vmem:[%s6855_s1 + $0x1c0] sm:$0xff] }
 0x315   :  { %714 = vmatmul.mubr.f32.vlgmr.msra.gmra.mxu0 %v647_v9  ;;  %785 = vmatmul.mubr.f32.vlgmr.msra.gmra.mxu1 %v647_v9  ;;  %v4801_v9 = vld [vmem:[%s6855_s1 + $0x1d0] sm:$0xff] }
 0x316   :  { %852 = vmatpush1.msra.mxu0 %v4042_v1  ;;  %923 = vmatpush1.msra.mxu1 %v4100_v11  ;;  %v7133_v1 = vld [vmem:[#allocation17_spill] sm:$0xff] }
 0x317   :  { %853 = vmatprep.subr.mxu0 %v4047_v2  ;;  %924 = vmatprep.subr.mxu1 %v4112_v13  ;;  %v7134_v2 = vld [vmem:[#allocation12_spill] sm:$0xff]  ;;  %v7141_v11 = vld [vmem:[#allocation25_spill] sm:$0xff]  ;;  %v7143_v13 = vld [vmem:[#allocation27_spill] sm:$0xff] }
 0x318   :  { %854 = vmatpush1.msra.mxu0 %v4053_v3  ;;  %925 = vmatpush1.msra.mxu1 %v4117_v14  ;;  %v7135_v3 = vld [vmem:[#allocation19_spill] sm:$0xff]  ;;  %v7144_v14 = vld [vmem:[#allocation18_spill] sm:$0xff] }
 0x319   :  { %855 = vmatprep.subr.mxu0 %v4064_v5  ;;  %926 = vmatprep.subr.mxu1 %v4129_v16  ;;  %v7136_v5 = vld [vmem:[#allocation13_spill] sm:$0xff]  ;;  %v7146_v16 = vld [vmem:[#allocation20_spill] sm:$0xff] }
 0x31a   :  { %856 = vmatpush1.msra.mxu0 %v4071_v6  ;;  %927 = vmatpush1.msra.mxu1 %v4141_v18  ;;  %v7137_v6 = vld [vmem:[#allocation21_spill] sm:$0xff]  ;;  %v7148_v18 = vld [vmem:[#allocation22_spill] sm:$0xff] }
 0x31b   :  { %857 = vmatprep.subr.mxu0 %v4077_v7  ;;  %928 = vmatprep.subr.mxu1 %v4146_v19  ;;  %v7138_v7 = vld [vmem:[#allocation14_spill] sm:$0xff] }
 0x31c   :  { %858 = vmatpush1.msra.mxu0 %v4083_v8  ;;  %929 = vmatpush1.msra.mxu1 %v4158_v21  ;;  %v7139_v8 = vld [vmem:[#allocation23_spill] sm:$0xff]  ;;  %v7149_v19 = vld [vmem:[#allocation30_spill] sm:$0xff] }
 0x31d   :  { %859 = vmatprep.subr.mxu0 %v4094_v10  ;;  %930 = vmatprep.subr.mxu1 %v4170_v23  ;;  %v7140_v10 = vld [vmem:[#allocation15_spill] sm:$0xff]  ;;  %v7153_v23 = vmov 0.0  }
 0x31e   :  { %860 = vmatpush1.msra.mxu0 %v4106_v12  ;;  %931 = vmatpush1.msra.mxu1 %v4182_v25  ;;  %v7142_v12 = vld [vmem:[#allocation16_spill] sm:$0xff]  ;;  %v7151_v21 = vld [vmem:[#allocation31_spill] sm:$0xff]  ;;  %v4747_v25 = vld [vmem:[%s6855_s1 + $0x1e8] sm:$0xff] }
 0x31f   :  { %861 = vmatprep.subr.mxu0 %v4123_v15  ;;  %932 = vmatprep.subr.mxu1 %v4194_v27  ;;  %v7145_v15 = vld [vmem:[#allocation28_spill] sm:$0xff]  ;;  %7155 = vst [vmem:[#allocation33_spill] sm:$0xff] %v4747_v25 }
 0x320   :  { %862 = vmatpush1.msra.mxu0 %v4135_v17  ;;  %933 = vmatpush1.msra.mxu1 %v4206_v29  ;;  %v7147_v17 = vld [vmem:[#allocation29_spill] sm:$0xff] }
 0x321   :  { %863 = vmatprep.subr.mxu0 %v4152_v20  ;;  %934 = vmatprep.subr.mxu1 %v4218_v31  ;;  %v7150_v20 = vld [vmem:[#allocation24_spill] sm:$0xff] }
 0x322   :  { %864 = vmatpush1.msra.mxu0 %v4164_v22  ;;  %935 = vmatpush1.msra.mxu1 %v4230_v33  ;;  %v7152_v22 = vld [vmem:[#allocation26_spill] sm:$0xff] }
 0x323   :  { %865 = vmatprep.subr.mxu0 %v4176_v24  ;;  %936 = vmatprep.subr.mxu1 %v4242_v35  ;;  %v7154_v24 = vld [vmem:[#allocation32_spill] sm:$0xff] }
 0x324   :  { %866 = vmatpush1.msra.mxu0 %v4188_v26  ;;  %937 = vmatpush1.msra.mxu1 %v4254_v37  ;;  %v4753_v26 = vld [vmem:[%s6855_s1 + $0x1f8] sm:$0xff] }
 0x325   :  { %867 = vmatprep.subr.mxu0 %v4200_v28  ;;  %938 = vmatprep.subr.mxu1 %v4266_v39  ;;  %7156 = vst [vmem:[#allocation34_spill] sm:$0xff] %v4753_v26 }
 0x326   :  { %868 = vmatpush1.msra.mxu0 %v4212_v30  ;;  %939 = vmatpush1.msra.mxu1 %v4278_v41 }
 0x327   :  { %869 = vmatprep.subr.mxu0 %v4224_v32  ;;  %940 = vmatprep.subr.mxu1 %v4290_v43 }
 0x328   :  { %870 = vmatpush1.msra.mxu0 %v4236_v34  ;;  %941 = vmatpush1.msra.mxu1 %v4302_v45 }
 0x329   :  { %871 = vmatprep.subr.mxu0 %v4248_v36  ;;  %942 = vmatprep.subr.mxu1 %v4314_v47 }
 0x32a   :  { %872 = vmatpush1.msra.mxu0 %v4260_v38  ;;  %943 = vmatpush1.msra.mxu1 %v7133_v1  ;;  %v4813_v1 = vld [vmem:[%s6855_s1 + $0x1b8] sm:$0xff] }
 0x32b   :  { %873 = vmatprep.subr.mxu0 %v7134_v2  ;;  %944 = vmatprep.subr.mxu1 %v7135_v3  ;;  %v4819_v2 = vld [vmem:[%s6855_s1 + $0x1a0] sm:$0xff]  ;;  %v4825_v3 = vld [vmem:[%s6855_s1 + $0x1b0] sm:$0xff] }
 0x32c   :  { %874 = vmatpush1.msra.mxu0 %v7136_v5  ;;  %945 = vmatpush1.msra.mxu1 %v7137_v6  ;;  %v4831_v5 = vld [vmem:[%s6855_s1 + $0x188] sm:$0xff]  ;;  %v4837_v6 = vld [vmem:[%s6855_s1 + $0x198] sm:$0xff] }
 0x32d   :  { %875 = vmatprep.subr.mxu0 %v7138_v7  ;;  %946 = vmatprep.subr.mxu1 %v7139_v8  ;;  %v4843_v7 = vld [vmem:[%s6855_s1 + $0x180] sm:$0xff]  ;;  %v4849_v8 = vld [vmem:[%s6855_s1 + $0x190] sm:$0xff] }
 0x32e   :  { %876 = vmatpush1.msra.mxu0 %v7140_v10  ;;  %947 = vmatpush1.msra.mxu1 %v7141_v11  ;;  %v4855_v10 = vld [vmem:[%s6855_s1 + $0x168] sm:$0xff]  ;;  %v4861_v11 = vld [vmem:[%s6855_s1 + $0x178] sm:$0xff] }
 0x32f   :  { %877 = vmatprep.subr.mxu0 %v7142_v12  ;;  %948 = vmatprep.subr.mxu1 %v7143_v13  ;;  %v4867_v12 = vld [vmem:[%s6855_s1 + $0x160] sm:$0xff] }
 0x330   :  { %878 = vmatpush1.msra.mxu0 %v7144_v14  ;;  %949 = vmatpush1.msra.mxu1 %v7145_v15  ;;  %v4873_v14 = vld [vmem:[%s6855_s1 + $0x170] sm:$0xff] }
 0x331   :  { %879 = vmatprep.subr.mxu0 %v7146_v16  ;;  %950 = vmatprep.subr.mxu1 %v7147_v17  ;;  %v4879_v16 = vld [vmem:[%s6855_s1 + $0x148] sm:$0xff] }
 0x332   :  { %880 = vmatpush1.msra.mxu0 %v7148_v18  ;;  %951 = vmatpush1.msra.mxu1 %v7149_v19  ;;  %v4885_v18 = vld [vmem:[%s6855_s1 + $0x158] sm:$0xff] }
 0x333   :  { %881 = vmatprep.subr.mxu0 %v7150_v20  ;;  %952 = vmatprep.subr.mxu1 %v7151_v21  ;;  %v4891_v20 = vld [vmem:[%s6855_s1 + $0x140] sm:$0xff] }
 0x334   :  { %882 = vmatpush1.msra.mxu0 %v7152_v22  ;;  %915 = vmatprep.mubr.f32.mxu0 %v7153_v23  ;;  %v4897_v22 = vld [vmem:[%s6855_s1 + $0x150] sm:$0xff] }
 0x335   :  { %953 = vmatpush1.msra.mxu1 %v7154_v24  ;;  %986 = vmatprep.mubr.f32.mxu1 %v7153_v23 }
 0x336   :  { %1024 = vmatprep.subr.mxu0 %v4747_v25  ;;  %1095 = vmatprep.subr.mxu1 %v4753_v26 }
 0x3d5   :  { %v715_v27 = vpop.f32.mrf.mxu0  ;;  %v786_v31 = vpop.f32.mrf.mxu1 }
 0x3d6   :  { %v795_v28 = vrot.slane %v715_v27, 2  ;;  %v797_v39 = vrot.slane %v786_v31, 2  ;;  %v4903_v27 = vld [vmem:[%s6855_s1 + $0x128] sm:$0xff] }
 0x3d7   :  { %v717_v29 = vpop.f32.mrf.mxu0  ;;  %v788_v36 = vpop.f32.mrf.mxu1  ;;  %v4927_v31 = vld [vmem:[%s6855_s1 + $0x108] sm:$0xff] }
 0x3d8   :  { %v803_v30 = vadd.f32 %v795_v28, %v7107_v0  ;;  %v796_v32 = vrot.slane %v717_v29, 2  ;;  %v798_v37 = vrot.slane %v788_v36, 2  ;;  %v805_v45 = vadd.f32 %v797_v39, %v4512_v61  ;;  %v4909_v28 = vld [vmem:[%s6855_s1 + $0x138] sm:$0xff]  ;;  %v4915_v29 = vld [vmem:[%s6855_s1 + $0x120] sm:$0xff]  ;;  %v4975_v39 = vld [vmem:[%s6855_s1 + $0xc8] sm:$0xff] }
 0x3d9   :  { %v4957_v36 = vld [vmem:[%s6855_s1 + $0xf8] sm:$0xff] }
 0x3da   :  { %v3449_v33 = vmul.f32 -1.442695, %v803_v30  ;;  %v804_v34 = vadd.f32 %v796_v32, %v7108_v50  ;;  %v806_v38 = vadd.f32 %v798_v37, %v4507_v62  ;;  %v4921_v30 = vld [vmem:[%s6855_s1 + $0x130] sm:$0xff]  ;;  %v4933_v32 = vld [vmem:[%s6855_s1 + $0x118] sm:$0xff]  ;;  %v4963_v37 = vld [vmem:[%s6855_s1 + $0xe0] sm:$0xff] }
 0x3dc   :  { %3610 = vpow2.f32 %v3449_v33  ;;  %v3450_v35 = vmul.f32 -1.442695, %v804_v34  ;;  %v3451_v41 = vmul.f32 -1.442695, %v806_v38  ;;  %v4939_v33 = vld [vmem:[%s6855_s1 + $0x100] sm:$0xff]  ;;  %v4945_v34 = vld [vmem:[%s6855_s1 + $0x110] sm:$0xff] }
 0x3dd   :  { %v4969_v38 = vld [vmem:[%s6855_s1 + $0xf0] sm:$0xff] }
 0x3de   :  { %3612 = vpow2.f32 %v3450_v35  ;;  %v4951_v35 = vld [vmem:[%s6855_s1 + $0xe8] sm:$0xff] }
 0x3df   :  { %3614 = vpow2.f32 %v3451_v41  ;;  %v4981_v41 = vld [vmem:[%s6855_s1 + $0xd8] sm:$0xff] }
 0x3e9   :  { %v3611_v43 = vpop.eup %3610 }
 0x3ea   :  { %v810_v47 = vadd.f32 1.0, %v3611_v43  ;;  %v4987_v43 = vld [vmem:[%s6855_s1 + $0xc0] sm:$0xff] }
 0x3eb   :  { %v3613_v51 = vpop.eup %3612 }
 0x3ec   :  { %3616 = vrcp.f32 %v810_v47  ;;  %v816_v0 = vadd.f32 1.0, %v3613_v51  ;;  %v3615_v50 = vpop.eup %3614  ;;  %v4999_v47 = vld [vmem:[%s6855_s1 + $0xa8] sm:$0xff]  ;;  %v5005_v51 = vld [vmem:[%s6855_s1 + $0xb8] sm:$0xff] }
 0x3ed   :  { %3618 = vtanh.f32 %v805_v45  ;;  %v823_v4 = vadd.f32 1.0, %v3615_v50  ;;  %v4993_v45 = vld [vmem:[%s6855_s1 + $0xd0] sm:$0xff] }
 0x3ee   :  { %3620 = vrcp.f32 %v816_v0  ;;  %v5011_v0 = vld [vmem:[%s6855_s1 + $0xa0] sm:$0xff]  ;;  %v5017_v50 = vld [vmem:[%s6855_s1 + $0xb0] sm:$0xff] }
 0x3ef   :  { %3622 = vrcp.f32 %v823_v4  ;;  %v5047_v4 = vld [vmem:[%s6855_s1 + $0x68] sm:$0xff] }
 0x3f0   :  { %7162 = vst [vmem:[#allocation19_spill] sm:$0xff] %v5047_v4 }
 0x3f9   :  { %v3617_v63 = vpop.eup %3616 }
 0x3fa   :  { %v3619_v58 = vpop.eup %3618 }
 0x3fb   :  { %v3621_v55 = vpop.eup %3620  ;;  %v830_v62 = vmul.f32 %v3619_v58, %v3617_v63  ;;  %v5023_v63 = vld [vmem:[%s6855_s1 + $0x88] sm:$0xff]  ;;  %v5029_v58 = vld [vmem:[%s6855_s1 + $0x98] sm:$0xff] }
 0x3fc   :  { %v829_v54 = vmul.f32 %v3621_v55, %v827_v59  ;;  %v3623_v61 = vpop.eup %3622  ;;  %7158 = vst [vmem:[#allocation11_spill] sm:$0xff] %v5023_v63  ;;  %7159 = vst [vmem:[#allocation35_spill] sm:$0xff] %v5029_v58  ;;  %v5035_v59 = vld [vmem:[%s6855_s1 + $0x80] sm:$0xff]  ;;  %v5041_v55 = vld [vmem:[%s6855_s1 + $0x90] sm:$0xff] }
 0x3fd   :  { %7160 = vst [vmem:[#allocation17_spill] sm:$0xff] %v5035_v59  ;;  %7161 = vst [vmem:[#allocation12_spill] sm:$0xff] %v5041_v55 }
 0x3fe   :  { %v4761_v60 = vadd.f32 %v830_v62, %v829_v54  ;;  %v5053_v62 = vld [vmem:[%s6855_s1 + $0x78] sm:$0xff]  ;;  %v5059_v54 = vld [vmem:[%s6855_s1 + $0x60] sm:$0xff] }
 0x3ff   :  { %7163 = vst [vmem:[#allocation13_spill] sm:$0xff] %v5053_v62  ;;  %7164 = vst [vmem:[#allocation21_spill] sm:$0xff] %v5059_v54 }
 0x400   :  { %3624 = vtanh.f32 %v4761_v60 }
 0x40d   :  { %v3625_v42 = vpop.eup %3624 }
 0x40e   :  { %v833_v44 = vmul.f32 %v3625_v42, %v3623_v61  ;;  %v5065_v61 = vld [vmem:[%s6855_s1 + $0x70] sm:$0xff]  ;;  %v5071_v42 = vld [vmem:[%s6855_s1 + $0x48] sm:$0xff] }
 0x40f   :  { %7165 = vst [vmem:[#allocation14_spill] sm:$0xff] %v5065_v61  ;;  %7166 = vst [vmem:[#allocation23_spill] sm:$0xff] %v5071_v42 }
 0x410   :  { %v849_v53 = vrot.slane %v833_v44, 6  ;;  %v4766_v40 = vsel %vm838_vm2, %v4678_v56, %v833_v44  ;;  %v4807_v56 = vld [vmem:[%s6855_s1 + $0x1a8] sm:$0xff]  ;;  %v5078_v44 = vld [vmem:[%s6855_s1 + $0x40] sm:$0xff] }
 0x411   :  { %7157 = vst [vmem:[#allocation10_spill] sm:$0xff] %v4766_v40  ;;  %7167 = vst [vmem:[#allocation15_spill] sm:$0xff] %v5078_v44  ;;  %v5122_v40 = vld [vmem:[%s6854_s0 + $0x28] sm:$0xff] }
 0x412   :  { %916 = vmatmul.mubr.f32.vlgmr.msra.gmra.mxu0 %v849_v53  ;;  %987 = vmatmul.mubr.f32.vlgmr.msra.gmra.mxu1 %v849_v53  ;;  %v5085_v53 = vld [vmem:[%s6855_s1 + $0x28] sm:$0xff]  ;;  %7173 = vst [vmem:[#allocation20_spill] sm:$0xff] %v5122_v40 }
 0x413   :  { %1025 = vmatpush1.msra.mxu0 %v4771_v46  ;;  %1096 = vmatpush1.msra.mxu1 %v4777_v52  ;;  %7168 = vst [vmem:[#allocation25_spill] sm:$0xff] %v5085_v53 }
 0x414   :  { %1026 = vmatprep.subr.mxu0 %v4783_v49  ;;  %1097 = vmatprep.subr.mxu1 %v4789_v48 }
 0x415   :  { %1027 = vmatpush1.msra.mxu0 %v4795_v57  ;;  %1098 = vmatpush1.msra.mxu1 %v4801_v9 }
 0x416   :  { %1028 = vmatprep.subr.mxu0 %v4807_v56  ;;  %1099 = vmatprep.subr.mxu1 %v4813_v1 }
 0x417   :  { %1029 = vmatpush1.msra.mxu0 %v4819_v2  ;;  %1100 = vmatpush1.msra.mxu1 %v4825_v3 }
 0x418   :  { %1030 = vmatprep.subr.mxu0 %v4831_v5  ;;  %1101 = vmatprep.subr.mxu1 %v4837_v6 }
 0x419   :  { %1031 = vmatpush1.msra.mxu0 %v4843_v7  ;;  %1102 = vmatpush1.msra.mxu1 %v4849_v8 }
 0x41a   :  { %1032 = vmatprep.subr.mxu0 %v4855_v10  ;;  %1103 = vmatprep.subr.mxu1 %v4861_v11 }
 0x41b   :  { %1033 = vmatpush1.msra.mxu0 %v4867_v12  ;;  %1104 = vmatpush1.msra.mxu1 %v4873_v14 }
 0x41c   :  { %1034 = vmatprep.subr.mxu0 %v4879_v16  ;;  %1105 = vmatprep.subr.mxu1 %v4885_v18 }
 0x41d   :  { %1035 = vmatpush1.msra.mxu0 %v4891_v20  ;;  %1106 = vmatpush1.msra.mxu1 %v4897_v22 }
 0x41e   :  { %1036 = vmatprep.subr.mxu0 %v4903_v27  ;;  %1107 = vmatprep.subr.mxu1 %v4909_v28 }
 0x41f   :  { %1037 = vmatpush1.msra.mxu0 %v4915_v29  ;;  %1108 = vmatpush1.msra.mxu1 %v4921_v30 }
 0x420   :  { %1038 = vmatprep.subr.mxu0 %v4927_v31  ;;  %1109 = vmatprep.subr.mxu1 %v4933_v32 }
 0x421   :  { %1039 = vmatpush1.msra.mxu0 %v4939_v33  ;;  %1110 = vmatpush1.msra.mxu1 %v4945_v34 }
 0x422   :  { %1040 = vmatprep.subr.mxu0 %v4951_v35  ;;  %1111 = vmatprep.subr.mxu1 %v4957_v36 }
 0x423   :  { %1041 = vmatpush1.msra.mxu0 %v4963_v37  ;;  %1112 = vmatpush1.msra.mxu1 %v4969_v38 }
 0x424   :  { %1042 = vmatprep.subr.mxu0 %v4975_v39  ;;  %1113 = vmatprep.subr.mxu1 %v4981_v41 }
 0x425   :  { %1043 = vmatpush1.msra.mxu0 %v4987_v43  ;;  %1114 = vmatpush1.msra.mxu1 %v4993_v45 }
 0x426   :  { %1044 = vmatprep.subr.mxu0 %v4999_v47  ;;  %1115 = vmatprep.subr.mxu1 %v5005_v51 }
 0x427   :  { %1045 = vmatpush1.msra.mxu0 %v5011_v0  ;;  %1116 = vmatpush1.msra.mxu1 %v5017_v50 }
 0x428   :  { %1046 = vmatprep.subr.mxu0 %v5023_v63  ;;  %1117 = vmatprep.subr.mxu1 %v5029_v58 }
 0x429   :  { %1047 = vmatpush1.msra.mxu0 %v5035_v59  ;;  %1118 = vmatpush1.msra.mxu1 %v5041_v55 }
 0x42a   :  { %1048 = vmatprep.subr.mxu0 %v5047_v4  ;;  %1119 = vmatprep.subr.mxu1 %v5053_v62 }
 0x42b   :  { %1049 = vmatpush1.msra.mxu0 %v5059_v54  ;;  %1120 = vmatpush1.msra.mxu1 %v5065_v61 }
 0x42c   :  { %1050 = vmatprep.subr.mxu0 %v5071_v42  ;;  %1121 = vmatprep.subr.mxu1 %v7143_v13  ;;  %v5092_v13 = vld [vmem:[%s6855_s1 + $0x20] sm:$0xff] }
 0x42d   :  { %1051 = vmatpush1.msra.mxu0 %v5078_v44  ;;  %1122 = vmatpush1.msra.mxu1 %v7145_v15  ;;  %7169 = vst [vmem:[#allocation16_spill] sm:$0xff] %v5092_v13  ;;  %v5099_v15 = vld [vmem:[%s6855_s1 + $0x8] sm:$0xff] }
 0x42e   :  { %1052 = vmatprep.subr.mxu0 %v5085_v53  ;;  %1123 = vmatprep.subr.mxu1 %v7147_v17  ;;  %7170 = vst [vmem:[#allocation27_spill] sm:$0xff] %v5099_v15  ;;  %v5106_v17 = vld [vmem:[%s6855_s1] sm:$0xff] }
 0x42f   :  { %1053 = vmatpush1.msra.mxu0 %v5092_v13  ;;  %1124 = vmatpush1.msra.mxu1 %v7149_v19  ;;  %7171 = vst [vmem:[#allocation18_spill] sm:$0xff] %v5106_v17  ;;  %v5117_v19 = vld [vmem:[%s6854_s0 + $0x20] sm:$0xff]  ;;  %v5129_v13 = vld [vmem:[%s6854_s0 + $0x38] sm:$0xff] }
 0x430   :  { %1054 = vmatprep.subr.mxu0 %v5099_v15  ;;  %1125 = vmatprep.subr.mxu1 %v7151_v21  ;;  %7172 = vst [vmem:[#allocation28_spill] sm:$0xff] %v5117_v19  ;;  %7174 = vst [vmem:[#allocation29_spill] sm:$0xff] %v5129_v13 }
 0x431   :  { %1055 = vmatpush1.msra.mxu0 %v5106_v17  ;;  %1088 = vmatprep.mubr.f32.mxu0 %v7153_v23 }
 0x432   :  { %1126 = vmatpush1.msra.mxu1 %v7154_v24  ;;  %1159 = vmatprep.mubr.f32.mxu1 %v7153_v23 }
 0x433   :  { %1212 = vmatprep.subr.mxu0 %v4747_v25  ;;  %1283 = vmatprep.subr.mxu1 %v4753_v26 }
 0x4d2   :  { %v917_v21 = vpop.f32.mrf.mxu0  ;;  %v988_v25 = vpop.f32.mrf.mxu1 }
 0x4d3   :  { %v993_v17 = vadd.f32 %v5117_v19, %v917_v21  ;;  %v5135_v21 = vld [vmem:[%s6854_s0 + $0x30] sm:$0xff] }
 0x4d4   :  { %v919_v24 = vpop.f32.mrf.mxu0  ;;  %v990_v53 = vpop.f32.mrf.mxu1 }
 0x4d5   :  { %v3456_v15 = vmul.f32 -1.442695, %v993_v17  ;;  %v994_v23 = vadd.f32 %v5122_v40, %v919_v24  ;;  %v996_v44 = vadd.f32 %v5129_v13, %v990_v53  ;;  %v1017_v53 = vrot.slane %v4761_v60, 6  ;;  %v7176_v60 = vld [vmem:[#allocation19_spill] sm:$0xff] }
 0x4d7   :  { %3626 = vpow2.f32 %v3456_v15  ;;  %v3457_v26 = vmul.f32 -1.442695, %v994_v23  ;;  %v3458_v17 = vmul.f32 -1.442695, %v996_v44  ;;  %v995_v15 = vadd.f32 %v5135_v21, %v988_v25 }
 0x4d9   :  { %3628 = vpow2.f32 %v3457_v26 }
 0x4da   :  { %3630 = vpow2.f32 %v3458_v17 }
 0x4e4   :  { %v3627_v19 = vpop.eup %3626 }
 0x4e5   :  { %v1000_v24 = vadd.f32 1.0, %v3627_v19 }
 0x4e6   :  { %v3629_v23 = vpop.eup %3628 }
 0x4e7   :  { %3632 = vrcp.f32 %v1000_v24  ;;  %v1006_v26 = vadd.f32 1.0, %v3629_v23  ;;  %v3631_v40 = vpop.eup %3630  ;;  %v5214_v24 = vld [vmem:[%s6855_s1 + $0x38] sm:$0xff] }
 0x4e8   :  { %3634 = vtanh.f32 %v995_v15  ;;  %v1013_v54 = vadd.f32 1.0, %v3631_v40  ;;  %v7177_v40 = vld [vmem:[#allocation13_spill] sm:$0xff]  ;;  %7185 = vst [vmem:[#allocation31_spill] sm:$0xff] %v5214_v24  ;;  %v7186_v23 = vld [vmem:[#allocation16_spill] sm:$0xff] }
 0x4e9   :  { %3636 = vrcp.f32 %v1006_v26  ;;  %v7184_v15 = vld [vmem:[#allocation25_spill] sm:$0xff]  ;;  %v5221_v26 = vld [vmem:[%s6855_s1 + $0x30] sm:$0xff] }
 0x4ea   :  { %3638 = vrcp.f32 %v1013_v54  ;;  %v7180_v54 = vld [vmem:[#allocation23_spill] sm:$0xff]  ;;  %7187 = vst [vmem:[#allocation26_spill] sm:$0xff] %v5221_v26 }
 0x4f4   :  { %v3633_v42 = vpop.eup %3632 }
 0x4f5   :  { %v3635_v61 = vpop.eup %3634 }
 0x4f6   :  { %v3637_v13 = vpop.eup %3636  ;;  %v1020_v62 = vmul.f32 %v3635_v61, %v3633_v42  ;;  %v5200_v61 = vld [vmem:[%s6855_s1 + $0x58] sm:$0xff]  ;;  %v7182_v42 = vld [vmem:[#allocation15_spill] sm:$0xff] }
 0x4f7   :  { %v1019_v4 = vmul.f32 %v3637_v13, %v1017_v53  ;;  %v3639_v25 = vpop.eup %3638  ;;  %7181 = vst [vmem:[#allocation30_spill] sm:$0xff] %v5200_v61  ;;  %v5207_v13 = vld [vmem:[%s6855_s1 + $0x50] sm:$0xff] }
 0x4f8   :  { %7183 = vst [vmem:[#allocation24_spill] sm:$0xff] %v5207_v13  ;;  %v7188_v53 = vld [vmem:[#allocation27_spill] sm:$0xff] }
 0x4f9   :  { %v5139_v44 = vadd.f32 %v1020_v62, %v1019_v4  ;;  %v7178_v4 = vld [vmem:[#allocation21_spill] sm:$0xff]  ;;  %v7179_v62 = vld [vmem:[#allocation14_spill] sm:$0xff] }
 0x4fb   :  { %3640 = vtanh.f32 %v5139_v44 }
 0x508   :  { %v3641_v19 = vpop.eup %3640 }
 0x509   :  { %v5142_v17 = vmul.f32 %v3641_v19, %v3639_v25  ;;  %v5228_v25 = vld [vmem:[%s6855_s1 + $0x18] sm:$0xff]  ;;  %v7190_v19 = vld [vmem:[#allocation18_spill] sm:$0xff] }
 0x50a   :  { %7189 = vst [vmem:[#allocation32_spill] sm:$0xff] %v5228_v25 }
 0x50b   :  { %7175 = vst [vmem:[#allocation22_spill] sm:$0xff] %v5142_v17  ;;  %1089 = vmatmul.mubr.f32.vlgmr.msra.gmra.mxu0 %v5142_v17  ;;  %1160 = vmatmul.mubr.f32.vlgmr.msra.gmra.mxu1 %v5142_v17  ;;  %v7191_v17 = vmov 0.0  }
 0x50c   :  { %1213 = vmatpush1.msra.mxu0 %v4771_v46  ;;  %1284 = vmatpush1.msra.mxu1 %v4777_v52 }
 0x50d   :  { %1214 = vmatprep.subr.mxu0 %v4783_v49  ;;  %1285 = vmatprep.subr.mxu1 %v4789_v48 }
 0x50e   :  { %1215 = vmatpush1.msra.mxu0 %v4795_v57  ;;  %1286 = vmatpush1.msra.mxu1 %v4801_v9 }
 0x50f   :  { %1216 = vmatprep.subr.mxu0 %v4807_v56  ;;  %1287 = vmatprep.subr.mxu1 %v4813_v1 }
 0x510   :  { %1217 = vmatpush1.msra.mxu0 %v4819_v2  ;;  %1288 = vmatpush1.msra.mxu1 %v4825_v3 }
 0x511   :  { %1218 = vmatprep.subr.mxu0 %v4831_v5  ;;  %1289 = vmatprep.subr.mxu1 %v4837_v6 }
 0x512   :  { %1219 = vmatpush1.msra.mxu0 %v4843_v7  ;;  %1290 = vmatpush1.msra.mxu1 %v4849_v8 }
 0x513   :  { %1220 = vmatprep.subr.mxu0 %v4855_v10  ;;  %1291 = vmatprep.subr.mxu1 %v4861_v11 }
 0x514   :  { %1221 = vmatpush1.msra.mxu0 %v4867_v12  ;;  %1292 = vmatpush1.msra.mxu1 %v4873_v14 }
 0x515   :  { %1222 = vmatprep.subr.mxu0 %v4879_v16  ;;  %1293 = vmatprep.subr.mxu1 %v4885_v18 }
 0x516   :  { %1223 = vmatpush1.msra.mxu0 %v4891_v20  ;;  %1294 = vmatpush1.msra.mxu1 %v4897_v22 }
 0x517   :  { %1224 = vmatprep.subr.mxu0 %v4903_v27  ;;  %1295 = vmatprep.subr.mxu1 %v4909_v28 }
 0x518   :  { %1225 = vmatpush1.msra.mxu0 %v4915_v29  ;;  %1296 = vmatpush1.msra.mxu1 %v4921_v30 }
 0x519   :  { %1226 = vmatprep.subr.mxu0 %v4927_v31  ;;  %1297 = vmatprep.subr.mxu1 %v4933_v32 }
 0x51a   :  { %1227 = vmatpush1.msra.mxu0 %v4939_v33  ;;  %1298 = vmatpush1.msra.mxu1 %v4945_v34 }
 0x51b   :  { %1228 = vmatprep.subr.mxu0 %v4951_v35  ;;  %1299 = vmatprep.subr.mxu1 %v4957_v36 }
 0x51c   :  { %1229 = vmatpush1.msra.mxu0 %v4963_v37  ;;  %1300 = vmatpush1.msra.mxu1 %v4969_v38 }
 0x51d   :  { %1230 = vmatprep.subr.mxu0 %v4975_v39  ;;  %1301 = vmatprep.subr.mxu1 %v4981_v41 }
 0x51e   :  { %1231 = vmatpush1.msra.mxu0 %v4987_v43  ;;  %1302 = vmatpush1.msra.mxu1 %v4993_v45 }
 0x51f   :  { %1232 = vmatprep.subr.mxu0 %v4999_v47  ;;  %1303 = vmatprep.subr.mxu1 %v5005_v51 }
 0x520   :  { %1233 = vmatpush1.msra.mxu0 %v5011_v0  ;;  %1304 = vmatpush1.msra.mxu1 %v5017_v50 }
 0x521   :  { %1234 = vmatprep.subr.mxu0 %v5023_v63  ;;  %1305 = vmatprep.subr.mxu1 %v5029_v58 }
 0x522   :  { %1235 = vmatpush1.msra.mxu0 %v5035_v59  ;;  %1306 = vmatpush1.msra.mxu1 %v5041_v55 }
 0x523   :  { %1236 = vmatprep.subr.mxu0 %v7176_v60  ;;  %1307 = vmatprep.subr.mxu1 %v7177_v40 }
 0x524   :  { %1237 = vmatpush1.msra.mxu0 %v7178_v4  ;;  %1308 = vmatpush1.msra.mxu1 %v7179_v62  ;;  %v7196_v62 = vld [vmem:[#allocation20_spill] sm:$0xff] }
 0x525   :  { %1238 = vmatprep.subr.mxu0 %v7180_v54  ;;  %1309 = vmatprep.subr.mxu1 %v5200_v61 }
 0x526   :  { %1239 = vmatpush1.msra.mxu0 %v7182_v42  ;;  %1310 = vmatpush1.msra.mxu1 %v5207_v13  ;;  %v7195_v13 = vld [vmem:[#allocation28_spill] sm:$0xff] }
 0x527   :  { %1240 = vmatprep.subr.mxu0 %v7184_v15  ;;  %1311 = vmatprep.subr.mxu1 %v5214_v24 }
 0x528   :  { %1241 = vmatpush1.msra.mxu0 %v7186_v23  ;;  %1312 = vmatpush1.msra.mxu1 %v5221_v26  ;;  %v5236_v23 = vld [vmem:[%s6855_s1 + $0x10] sm:$0xff]  ;;  %v7194_v26 = vld [vmem:[#allocation34_spill] sm:$0xff] }
 0x529   :  { %1242 = vmatprep.subr.mxu0 %v7188_v53  ;;  %1313 = vmatprep.subr.mxu1 %v5228_v25  ;;  %7192 = vst [vmem:[#allocation36_spill] sm:$0xff] %v5236_v23  ;;  %v7193_v53 = vld [vmem:[#allocation33_spill] sm:$0xff] }
 0x52a   :  { %1243 = vmatpush1.msra.mxu0 %v7190_v19  ;;  %1276 = vmatprep.mubr.f32.mxu0 %v7191_v17 }
 0x52b   :  { %1314 = vmatpush1.msra.mxu1 %v5236_v23  ;;  %1347 = vmatprep.mubr.f32.mxu1 %v7191_v17  ;;  %v7197_v17 = vld [vmem:[#allocation29_spill] sm:$0xff] }
 0x52c   :  { %1400 = vmatprep.subr.mxu0 %v7193_v53  ;;  %1471 = vmatprep.subr.mxu1 %v7194_v26 }
 0x5cb   :  { %v1090_v24 = vpop.f32.mrf.mxu0  ;;  %v1161_v42 = vpop.f32.mrf.mxu1 }
 0x5cc   :  { %v1170_v15 = vrot.slane %v1090_v24, 6  ;;  %v1172_v53 = vrot.slane %v1161_v42, 6 }
 0x5cd   :  { %v1092_v25 = vpop.f32.mrf.mxu0  ;;  %v1163_v60 = vpop.f32.mrf.mxu1 }
 0x5ce   :  { %v1178_v19 = vadd.f32 %v7195_v13, %v1170_v15  ;;  %v1171_v61 = vrot.slane %v1092_v25, 6  ;;  %v1173_v23 = vrot.slane %v1163_v60, 6  ;;  %v1180_v24 = vadd.f32 %v5135_v21, %v1172_v53 }
 0x5d0   :  { %v3459_v54 = vmul.f32 -1.442695, %v1178_v19  ;;  %v1179_v4 = vadd.f32 %v7196_v62, %v1171_v61  ;;  %v1181_v55 = vadd.f32 %v7197_v17, %v1173_v23 }
 0x5d2   :  { %3642 = vpow2.f32 %v3459_v54  ;;  %v3460_v40 = vmul.f32 -1.442695, %v1179_v4  ;;  %v3461_v59 = vmul.f32 -1.442695, %v1181_v55 }
 0x5d4   :  { %3644 = vpow2.f32 %v3460_v40  ;;  %v1202_v40 = vrot.slane %v5139_v44, 6 }
 0x5d5   :  { %3646 = vpow2.f32 %v3461_v59 }
 0x5df   :  { %v3643_v26 = vpop.eup %3642 }
 0x5e0   :  { %v1185_v58 = vadd.f32 1.0, %v3643_v26 }
 0x5e1   :  { %v3645_v63 = vpop.eup %3644 }
 0x5e2   :  { %3648 = vrcp.f32 %v1185_v58  ;;  %v1191_v15 = vadd.f32 1.0, %v3645_v63  ;;  %v3647_v61 = vpop.eup %3646 }
 0x5e3   :  { %3650 = vtanh.f32 %v1180_v24  ;;  %v1198_v25 = vadd.f32 1.0, %v3647_v61 }
 0x5e4   :  { %3652 = vrcp.f32 %v1191_v15 }
 0x5e5   :  { %3654 = vrcp.f32 %v1198_v25 }
 0x5ef   :  { %v3649_v54 = vpop.eup %3648 }
 0x5f0   :  { %v3651_v4 = vpop.eup %3650 }
 0x5f1   :  { %v3653_v60 = vpop.eup %3652  ;;  %v1205_v23 = vmul.f32 %v3651_v4, %v3649_v54 }
 0x5f2   :  { %v1204_v42 = vmul.f32 %v3653_v60, %v1202_v40  ;;  %v3655_v19 = vpop.eup %3654  ;;  %v7219_v40 = vld [vmem:[#allocation22_spill] sm:$0xff] }
 0x5f4   :  { %v5247_v55 = vadd.f32 %v1205_v23, %v1204_v42  ;;  %v1654_v23 = vld [vmem:[%s6856_s2 + $0x1e0] sm:$0xff]  ;;  %v1656_v42 = vld [vmem:[%s6856_s2 + $0x1f0] sm:$0xff] }
 0x5f6   :  { %3656 = vtanh.f32 %v5247_v55  ;;  %v1390_v53 = vrot.slane %v5247_v55, 6 }
 0x603   :  { %v3657_v59 = vpop.eup %3656 }
 0x604   :  { %v5250_v58 = vmul.f32 %v3657_v59, %v3655_v19  ;;  %v1651_v19 = vld [vmem:[%s6856_s2 + $0x1c8] sm:$0xff]  ;;  %v1653_v59 = vld [vmem:[%s6856_s2 + $0x1d8] sm:$0xff] }
 0x606   :  { %v1210_v63 = vrot.slane %v5250_v58, 2  ;;  %v1585_v60 = vsel %vm834_vm0, %v7219_v40, %v5250_v58  ;;  %v1650_v58 = vld [vmem:[%s6856_s2 + $0x1c0] sm:$0xff]  ;;  %v1595_v40 = vld [vmem:[%s6856_s2 + $0x8] sm:$0xff] }
 0x608   :  { %1277 = vmatmul.mubr.f32.vlgmr.msra.gmra.mxu0 %v1210_v63  ;;  %1348 = vmatmul.mubr.f32.vlgmr.msra.gmra.mxu1 %v1210_v63  ;;  %v1652_v63 = vld [vmem:[%s6856_s2 + $0x1d0] sm:$0xff] }
 0x609   :  { %1401 = vmatpush1.msra.mxu0 %v4771_v46  ;;  %1472 = vmatpush1.msra.mxu1 %v4777_v52  ;;  %v7198_v46 = vld [vmem:[#allocation11_spill] sm:$0xff] }
 0x60a   :  { %1402 = vmatprep.subr.mxu0 %v4783_v49  ;;  %1473 = vmatprep.subr.mxu1 %v4789_v48  ;;  %v7199_v52 = vld [vmem:[#allocation35_spill] sm:$0xff]  ;;  %v7200_v49 = vld [vmem:[#allocation17_spill] sm:$0xff]  ;;  %v7201_v48 = vld [vmem:[#allocation12_spill] sm:$0xff] }
 0x60b   :  { %1403 = vmatpush1.msra.mxu0 %v4795_v57  ;;  %1474 = vmatpush1.msra.mxu1 %v4801_v9  ;;  %v7202_v57 = vld [vmem:[#allocation19_spill] sm:$0xff]  ;;  %v7203_v9 = vld [vmem:[#allocation13_spill] sm:$0xff] }
 0x60c   :  { %1404 = vmatprep.subr.mxu0 %v4807_v56  ;;  %1475 = vmatprep.subr.mxu1 %v4813_v1  ;;  %v7204_v56 = vld [vmem:[#allocation21_spill] sm:$0xff]  ;;  %v7205_v1 = vld [vmem:[#allocation14_spill] sm:$0xff] }
 0x60d   :  { %1405 = vmatpush1.msra.mxu0 %v4819_v2  ;;  %1476 = vmatpush1.msra.mxu1 %v4825_v3  ;;  %v7206_v2 = vld [vmem:[#allocation23_spill] sm:$0xff]  ;;  %v7207_v3 = vld [vmem:[#allocation30_spill] sm:$0xff] }
 0x60e   :  { %1406 = vmatprep.subr.mxu0 %v4831_v5  ;;  %1477 = vmatprep.subr.mxu1 %v4837_v6  ;;  %v7208_v5 = vld [vmem:[#allocation15_spill] sm:$0xff]  ;;  %v7209_v6 = vld [vmem:[#allocation24_spill] sm:$0xff] }
 0x60f   :  { %1407 = vmatpush1.msra.mxu0 %v4843_v7  ;;  %1478 = vmatpush1.msra.mxu1 %v4849_v8  ;;  %v7210_v7 = vld [vmem:[#allocation25_spill] sm:$0xff]  ;;  %v7211_v8 = vld [vmem:[#allocation31_spill] sm:$0xff] }
 0x610   :  { %1408 = vmatprep.subr.mxu0 %v4855_v10  ;;  %1479 = vmatprep.subr.mxu1 %v4861_v11  ;;  %v7212_v10 = vld [vmem:[#allocation16_spill] sm:$0xff]  ;;  %v7213_v11 = vld [vmem:[#allocation26_spill] sm:$0xff] }
 0x611   :  { %1409 = vmatpush1.msra.mxu0 %v4867_v12  ;;  %1480 = vmatpush1.msra.mxu1 %v4873_v14  ;;  %v7214_v12 = vld [vmem:[#allocation27_spill] sm:$0xff]  ;;  %v7215_v14 = vld [vmem:[#allocation32_spill] sm:$0xff] }
 0x612   :  { %1410 = vmatprep.subr.mxu0 %v4879_v16  ;;  %1481 = vmatprep.subr.mxu1 %v4885_v18  ;;  %v7216_v16 = vld [vmem:[#allocation18_spill] sm:$0xff]  ;;  %v7217_v18 = vld [vmem:[#allocation36_spill] sm:$0xff] }
 0x613   :  { %1411 = vmatpush1.msra.mxu0 %v4891_v20  ;;  %1482 = vmatpush1.msra.mxu1 %v4897_v22  ;;  %v7218_v20 = vmov 0.0   ;;  %v1655_v22 = vld [vmem:[%s6856_s2 + $0x1e8] sm:$0xff] }
 0x614   :  { %1412 = vmatprep.subr.mxu0 %v4903_v27  ;;  %1483 = vmatprep.subr.mxu1 %v4909_v28  ;;  %v1657_v27 = vld [vmem:[%s6856_s2 + $0x1f8] sm:$0xff] }
 0x615   :  { %1413 = vmatpush1.msra.mxu0 %v4915_v29  ;;  %1484 = vmatpush1.msra.mxu1 %v4921_v30 }
 0x616   :  { %1414 = vmatprep.subr.mxu0 %v4927_v31  ;;  %1485 = vmatprep.subr.mxu1 %v4933_v32 }
 0x617   :  { %1415 = vmatpush1.msra.mxu0 %v4939_v33  ;;  %1486 = vmatpush1.msra.mxu1 %v4945_v34 }
 0x618   :  { %1416 = vmatprep.subr.mxu0 %v4951_v35  ;;  %1487 = vmatprep.subr.mxu1 %v4957_v36 }
 0x619   :  { %1417 = vmatpush1.msra.mxu0 %v4963_v37  ;;  %1488 = vmatpush1.msra.mxu1 %v4969_v38 }
 0x61a   :  { %1418 = vmatprep.subr.mxu0 %v4975_v39  ;;  %1489 = vmatprep.subr.mxu1 %v4981_v41 }
 0x61b   :  { %1419 = vmatpush1.msra.mxu0 %v4987_v43  ;;  %1490 = vmatpush1.msra.mxu1 %v4993_v45 }
 0x61c   :  { %1420 = vmatprep.subr.mxu0 %v4999_v47  ;;  %1491 = vmatprep.subr.mxu1 %v5005_v51 }
 0x61d   :  { %1421 = vmatpush1.msra.mxu0 %v5011_v0  ;;  %1492 = vmatpush1.msra.mxu1 %v5017_v50 }
 0x61e   :  { %1422 = vmatprep.subr.mxu0 %v7198_v46  ;;  %1493 = vmatprep.subr.mxu1 %v7199_v52  ;;  %v1647_v46 = vld [vmem:[%s6856_s2 + $0x1a8] sm:$0xff]  ;;  %v1649_v52 = vld [vmem:[%s6856_s2 + $0x1b8] sm:$0xff] }
 0x61f   :  { %1423 = vmatpush1.msra.mxu0 %v7200_v49  ;;  %1494 = vmatpush1.msra.mxu1 %v7201_v48  ;;  %v1646_v49 = vld [vmem:[%s6856_s2 + $0x1a0] sm:$0xff]  ;;  %v1648_v48 = vld [vmem:[%s6856_s2 + $0x1b0] sm:$0xff] }
 0x620   :  { %1424 = vmatprep.subr.mxu0 %v7202_v57  ;;  %1495 = vmatprep.subr.mxu1 %v7203_v9  ;;  %v1643_v57 = vld [vmem:[%s6856_s2 + $0x188] sm:$0xff]  ;;  %v1645_v9 = vld [vmem:[%s6856_s2 + $0x198] sm:$0xff] }
 0x621   :  { %1425 = vmatpush1.msra.mxu0 %v7204_v56  ;;  %1496 = vmatpush1.msra.mxu1 %v7205_v1  ;;  %v1642_v56 = vld [vmem:[%s6856_s2 + $0x180] sm:$0xff]  ;;  %v1644_v1 = vld [vmem:[%s6856_s2 + $0x190] sm:$0xff] }
 0x622   :  { %1426 = vmatprep.subr.mxu0 %v7206_v2  ;;  %1497 = vmatprep.subr.mxu1 %v7207_v3  ;;  %v1639_v2 = vld [vmem:[%s6856_s2 + $0x168] sm:$0xff]  ;;  %v1641_v3 = vld [vmem:[%s6856_s2 + $0x178] sm:$0xff] }
 0x623   :  { %1427 = vmatpush1.msra.mxu0 %v7208_v5  ;;  %1498 = vmatpush1.msra.mxu1 %v7209_v6  ;;  %v1638_v5 = vld [vmem:[%s6856_s2 + $0x160] sm:$0xff]  ;;  %v1640_v6 = vld [vmem:[%s6856_s2 + $0x170] sm:$0xff] }
 0x624   :  { %1428 = vmatprep.subr.mxu0 %v7210_v7  ;;  %1499 = vmatprep.subr.mxu1 %v7211_v8  ;;  %v1635_v7 = vld [vmem:[%s6856_s2 + $0x148] sm:$0xff]  ;;  %v1637_v8 = vld [vmem:[%s6856_s2 + $0x158] sm:$0xff] }
 0x625   :  { %1429 = vmatpush1.msra.mxu0 %v7212_v10  ;;  %1500 = vmatpush1.msra.mxu1 %v7213_v11  ;;  %v1634_v10 = vld [vmem:[%s6856_s2 + $0x140] sm:$0xff]  ;;  %v1636_v11 = vld [vmem:[%s6856_s2 + $0x150] sm:$0xff] }
 0x626   :  { %1430 = vmatprep.subr.mxu0 %v7214_v12  ;;  %1501 = vmatprep.subr.mxu1 %v7215_v14  ;;  %v1631_v12 = vld [vmem:[%s6856_s2 + $0x128] sm:$0xff]  ;;  %v1633_v14 = vld [vmem:[%s6856_s2 + $0x138] sm:$0xff] }
 0x627   :  { %1431 = vmatpush1.msra.mxu0 %v7216_v16  ;;  %1502 = vmatpush1.msra.mxu1 %v7217_v18  ;;  %v1630_v16 = vld [vmem:[%s6856_s2 + $0x120] sm:$0xff]  ;;  %v1632_v18 = vld [vmem:[%s6856_s2 + $0x130] sm:$0xff] }
 0x628   :  { %1464 = vmatprep.mubr.f32.mxu0 %v7218_v20  ;;  %1535 = vmatprep.mubr.f32.mxu1 %v7218_v20 }
 0x629   :  { %1680 = vmatprep.subr.mxu0 %v1655_v22  ;;  %1757 = vmatprep.subr.mxu1 %v1657_v27  ;;  %v1627_v22 = vld [vmem:[%s6856_s2 + $0x108] sm:$0xff]  ;;  %v1629_v27 = vld [vmem:[%s6856_s2 + $0x118] sm:$0xff] }
 0x6c8   :  { %v1278_v28 = vpop.f32.mrf.mxu0  ;;  %v1349_v32 = vpop.f32.mrf.mxu1 }
 0x6c9   :  { %v1358_v29 = vrot.slane %v1278_v28, 4  ;;  %v1360_v41 = vrot.slane %v1349_v32, 4  ;;  %v1626_v28 = vld [vmem:[%s6856_s2 + $0x100] sm:$0xff] }
 0x6ca   :  { %v1280_v30 = vpop.f32.mrf.mxu0  ;;  %v1351_v37 = vpop.f32.mrf.mxu1  ;;  %v1622_v32 = vld [vmem:[%s6856_s2 + $0xe0] sm:$0xff] }
 0x6cb   :  { %v1366_v31 = vadd.f32 %v7195_v13, %v1358_v29  ;;  %v1359_v33 = vrot.slane %v1280_v30, 4  ;;  %v1361_v38 = vrot.slane %v1351_v37, 4  ;;  %v1368_v47 = vadd.f32 %v5135_v21, %v1360_v41  ;;  %v1628_v29 = vld [vmem:[%s6856_s2 + $0x110] sm:$0xff]  ;;  %v1623_v30 = vld [vmem:[%s6856_s2 + $0xe8] sm:$0xff]  ;;  %v1614_v41 = vld [vmem:[%s6856_s2 + $0xa0] sm:$0xff] }
 0x6cc   :  { %v1620_v37 = vld [vmem:[%s6856_s2 + $0xd0] sm:$0xff] }
 0x6cd   :  { %v3462_v34 = vmul.f32 -1.442695, %v1366_v31  ;;  %v1367_v35 = vadd.f32 %v7196_v62, %v1359_v33  ;;  %v1369_v39 = vadd.f32 %v7197_v17, %v1361_v38  ;;  %v1625_v31 = vld [vmem:[%s6856_s2 + $0xf8] sm:$0xff]  ;;  %v1624_v33 = vld [vmem:[%s6856_s2 + $0xf0] sm:$0xff]  ;;  %v1615_v38 = vld [vmem:[%s6856_s2 + $0xa8] sm:$0xff] }
 0x6cf   :  { %3658 = vpow2.f32 %v3462_v34  ;;  %v3463_v36 = vmul.f32 -1.442695, %v1367_v35  ;;  %v3464_v43 = vmul.f32 -1.442695, %v1369_v39  ;;  %v1619_v34 = vld [vmem:[%s6856_s2 + $0xc8] sm:$0xff]  ;;  %v1621_v35 = vld [vmem:[%s6856_s2 + $0xd8] sm:$0xff] }
 0x6d0   :  { %v1617_v39 = vld [vmem:[%s6856_s2 + $0xb8] sm:$0xff] }
 0x6d1   :  { %3660 = vpow2.f32 %v3463_v36  ;;  %v1618_v36 = vld [vmem:[%s6856_s2 + $0xc0] sm:$0xff] }
 0x6d2   :  { %3662 = vpow2.f32 %v3464_v43  ;;  %v1616_v43 = vld [vmem:[%s6856_s2 + $0xb0] sm:$0xff] }
 0x6dc   :  { %v3659_v45 = vpop.eup %3658 }
 0x6dd   :  { %v1373_v51 = vadd.f32 1.0, %v3659_v45  ;;  %v1611_v45 = vld [vmem:[%s6856_s2 + $0x88] sm:$0xff] }
 0x6de   :  { %v3661_v0 = vpop.eup %3660 }
 0x6df   :  { %3664 = vrcp.f32 %v1373_v51  ;;  %v1379_v50 = vadd.f32 1.0, %v3661_v0  ;;  %v3663_v44 = vpop.eup %3662  ;;  %v1610_v51 = vld [vmem:[%s6856_s2 + $0x80] sm:$0xff]  ;;  %v1612_v0 = vld [vmem:[%s6856_s2 + $0x90] sm:$0xff] }
 0x6e0   :  { %3666 = vtanh.f32 %v1368_v47  ;;  %v1386_v24 = vadd.f32 1.0, %v3663_v44  ;;  %v1613_v47 = vld [vmem:[%s6856_s2 + $0x98] sm:$0xff] }
 0x6e1   :  { %3668 = vrcp.f32 %v1379_v50  ;;  %v1607_v50 = vld [vmem:[%s6856_s2 + $0x68] sm:$0xff]  ;;  %v1609_v44 = vld [vmem:[%s6856_s2 + $0x78] sm:$0xff] }
 0x6e2   :  { %3670 = vrcp.f32 %v1386_v24  ;;  %v1602_v24 = vld [vmem:[%s6856_s2 + $0x40] sm:$0xff] }
 0x6ec   :  { %v3665_v62 = vpop.eup %3664 }
 0x6ed   :  { %v3667_v13 = vpop.eup %3666 }
 0x6ee   :  { %v3669_v26 = vpop.eup %3668  ;;  %v1393_v17 = vmul.f32 %v3667_v13, %v3665_v62  ;;  %v1606_v62 = vld [vmem:[%s6856_s2 + $0x60] sm:$0xff]  ;;  %v1608_v13 = vld [vmem:[%s6856_s2 + $0x70] sm:$0xff] }
 0x6ef   :  { %v1392_v15 = vmul.f32 %v3669_v26, %v1390_v53  ;;  %v3671_v21 = vpop.eup %3670  ;;  %v1603_v53 = vld [vmem:[%s6856_s2 + $0x48] sm:$0xff]  ;;  %v1605_v26 = vld [vmem:[%s6856_s2 + $0x58] sm:$0xff] }
 0x6f1   :  { %v5328_v61 = vadd.f32 %v1393_v17, %v1392_v15  ;;  %v1604_v17 = vld [vmem:[%s6856_s2 + $0x50] sm:$0xff]  ;;  %v1599_v15 = vld [vmem:[%s6856_s2 + $0x28] sm:$0xff] }
 0x6f3   :  { %3672 = vtanh.f32 %v5328_v61 }
 0x700   :  { %v3673_v54 = vpop.eup %3672 }
 0x701   :  { %v1396_v4 = vmul.f32 %v3673_v54, %v3671_v21  ;;  %v1601_v21 = vld [vmem:[%s6856_s2 + $0x38] sm:$0xff]  ;;  %v1598_v54 = vld [vmem:[%s6856_s2 + $0x20] sm:$0xff] }
 0x703   :  { %v1398_v25 = vrot.slane %v1396_v4, 4  ;;  %v5341_v55 = vsel %vm836_vm1, %v1585_v60, %v1396_v4  ;;  %v1600_v4 = vld [vmem:[%s6856_s2 + $0x30] sm:$0xff]  ;;  %v1597_v60 = vld [vmem:[%s6856_s2 + $0x18] sm:$0xff] }
 0x705   :  { %1465 = vmatmul.mubr.f32.vlgmr.msra.gmra.mxu0 %v1398_v25  ;;  %1536 = vmatmul.mubr.f32.vlgmr.msra.gmra.mxu1 %v1398_v25  ;;  %v1594_v25 = vld [vmem:[%s6856_s2] sm:$0xff] }
 0x706   :  { %1681 = vmatpush1.msra.mxu0 %v1654_v23  ;;  %1758 = vmatpush1.msra.mxu1 %v1656_v42  ;;  %v1596_v23 = vld [vmem:[%s6856_s2 + $0x10] sm:$0xff]  ;;  %v7220_v42 = vld [vmem:[#allocation10_spill] sm:$0xff] }
 0x707   :  { %1682 = vmatprep.subr.mxu0 %v1651_v19  ;;  %1759 = vmatprep.subr.mxu1 %v1653_v59  ;;  %v5532_v19 = vld [vmem:[%s6855_s1 + $0x3e8] sm:$0xff]  ;;  %v5537_v59 = vld [vmem:[%s6855_s1 + $0x3f8] sm:$0xff] }
 0x708   :  { %1683 = vmatpush1.msra.mxu0 %v1650_v58  ;;  %1760 = vmatpush1.msra.mxu1 %v1652_v63  ;;  %7221 = vst [vmem:[#allocation33_spill] sm:$0xff] %v5532_v19  ;;  %7222 = vst [vmem:[#allocation34_spill] sm:$0xff] %v5537_v59  ;;  %v5544_v58 = vld [vmem:[%s6855_s1 + $0x3e0] sm:$0xff]  ;;  %v5549_v63 = vld [vmem:[%s6855_s1 + $0x3f0] sm:$0xff] }
 0x709   :  { %1684 = vmatprep.subr.mxu0 %v1647_v46  ;;  %1761 = vmatprep.subr.mxu1 %v1649_v52  ;;  %v5556_v46 = vld [vmem:[%s6855_s1 + $0x3c8] sm:$0xff]  ;;  %v5561_v52 = vld [vmem:[%s6855_s1 + $0x3d8] sm:$0xff] }
 0x70a   :  { %1685 = vmatpush1.msra.mxu0 %v1646_v49  ;;  %1762 = vmatpush1.msra.mxu1 %v1648_v48  ;;  %v5568_v49 = vld [vmem:[%s6855_s1 + $0x3c0] sm:$0xff]  ;;  %v5573_v48 = vld [vmem:[%s6855_s1 + $0x3d0] sm:$0xff] }
 0x70b   :  { %1686 = vmatprep.subr.mxu0 %v1643_v57  ;;  %1763 = vmatprep.subr.mxu1 %v1645_v9  ;;  %v5580_v57 = vld [vmem:[%s6855_s1 + $0x3a8] sm:$0xff]  ;;  %v5585_v9 = vld [vmem:[%s6855_s1 + $0x3b8] sm:$0xff] }
 0x70c   :  { %1687 = vmatpush1.msra.mxu0 %v1642_v56  ;;  %1764 = vmatpush1.msra.mxu1 %v1644_v1  ;;  %v5592_v56 = vld [vmem:[%s6855_s1 + $0x3a0] sm:$0xff]  ;;  %v5597_v1 = vld [vmem:[%s6855_s1 + $0x3b0] sm:$0xff] }
 0x70d   :  { %1688 = vmatprep.subr.mxu0 %v1639_v2  ;;  %1765 = vmatprep.subr.mxu1 %v1641_v3  ;;  %v5604_v2 = vld [vmem:[%s6855_s1 + $0x388] sm:$0xff]  ;;  %v5609_v3 = vld [vmem:[%s6855_s1 + $0x398] sm:$0xff] }
 0x70e   :  { %1689 = vmatpush1.msra.mxu0 %v1638_v5  ;;  %1766 = vmatpush1.msra.mxu1 %v1640_v6  ;;  %v5614_v5 = vld [vmem:[%s6855_s1 + $0x380] sm:$0xff]  ;;  %v5621_v6 = vld [vmem:[%s6855_s1 + $0x390] sm:$0xff] }
 0x70f   :  { %1690 = vmatprep.subr.mxu0 %v1635_v7  ;;  %1767 = vmatprep.subr.mxu1 %v1637_v8  ;;  %v5626_v7 = vld [vmem:[%s6855_s1 + $0x368] sm:$0xff]  ;;  %v5631_v8 = vld [vmem:[%s6855_s1 + $0x378] sm:$0xff] }
 0x710   :  { %1691 = vmatpush1.msra.mxu0 %v1634_v10  ;;  %1768 = vmatpush1.msra.mxu1 %v1636_v11  ;;  %v5638_v10 = vld [vmem:[%s6855_s1 + $0x360] sm:$0xff]  ;;  %v5643_v11 = vld [vmem:[%s6855_s1 + $0x370] sm:$0xff] }
 0x711   :  { %1692 = vmatprep.subr.mxu0 %v1631_v12  ;;  %1769 = vmatprep.subr.mxu1 %v1633_v14  ;;  %v5648_v12 = vld [vmem:[%s6855_s1 + $0x348] sm:$0xff]  ;;  %v5655_v14 = vld [vmem:[%s6855_s1 + $0x358] sm:$0xff] }
 0x712   :  { %1693 = vmatpush1.msra.mxu0 %v1630_v16  ;;  %1770 = vmatpush1.msra.mxu1 %v1632_v18  ;;  %v5660_v16 = vld [vmem:[%s6855_s1 + $0x340] sm:$0xff]  ;;  %v5665_v18 = vld [vmem:[%s6855_s1 + $0x350] sm:$0xff] }
 0x713   :  { %1694 = vmatprep.subr.mxu0 %v1627_v22  ;;  %1771 = vmatprep.subr.mxu1 %v1629_v27  ;;  %v5672_v22 = vld [vmem:[%s6855_s1 + $0x328] sm:$0xff]  ;;  %v5677_v27 = vld [vmem:[%s6855_s1 + $0x338] sm:$0xff] }
 0x714   :  { %1695 = vmatpush1.msra.mxu0 %v1626_v28  ;;  %1772 = vmatpush1.msra.mxu1 %v1628_v29  ;;  %v5684_v28 = vld [vmem:[%s6855_s1 + $0x320] sm:$0xff]  ;;  %v5689_v29 = vld [vmem:[%s6855_s1 + $0x330] sm:$0xff] }
 0x715   :  { %1696 = vmatprep.subr.mxu0 %v1623_v30  ;;  %1773 = vmatprep.subr.mxu1 %v1625_v31  ;;  %v5696_v30 = vld [vmem:[%s6855_s1 + $0x308] sm:$0xff]  ;;  %v5701_v31 = vld [vmem:[%s6855_s1 + $0x318] sm:$0xff] }
 0x716   :  { %1697 = vmatpush1.msra.mxu0 %v1622_v32  ;;  %1774 = vmatpush1.msra.mxu1 %v1624_v33  ;;  %v5708_v32 = vld [vmem:[%s6855_s1 + $0x300] sm:$0xff]  ;;  %v5713_v33 = vld [vmem:[%s6855_s1 + $0x310] sm:$0xff] }
 0x717   :  { %1698 = vmatprep.subr.mxu0 %v1619_v34  ;;  %1775 = vmatprep.subr.mxu1 %v1621_v35  ;;  %v5720_v34 = vld [vmem:[%s6855_s1 + $0x2e8] sm:$0xff]  ;;  %v5725_v35 = vld [vmem:[%s6855_s1 + $0x2f8] sm:$0xff] }
 0x718   :  { %1699 = vmatpush1.msra.mxu0 %v1618_v36  ;;  %1776 = vmatpush1.msra.mxu1 %v1620_v37  ;;  %v5732_v36 = vld [vmem:[%s6855_s1 + $0x2e0] sm:$0xff]  ;;  %v5737_v37 = vld [vmem:[%s6855_s1 + $0x2f0] sm:$0xff] }
 0x719   :  { %1700 = vmatprep.subr.mxu0 %v1615_v38  ;;  %1777 = vmatprep.subr.mxu1 %v1617_v39  ;;  %v5744_v38 = vld [vmem:[%s6855_s1 + $0x2c8] sm:$0xff]  ;;  %v5749_v39 = vld [vmem:[%s6855_s1 + $0x2d8] sm:$0xff] }
 0x71a   :  { %1701 = vmatpush1.msra.mxu0 %v1614_v41  ;;  %1778 = vmatpush1.msra.mxu1 %v1616_v43  ;;  %v5756_v41 = vld [vmem:[%s6855_s1 + $0x2c0] sm:$0xff]  ;;  %v5761_v43 = vld [vmem:[%s6855_s1 + $0x2d0] sm:$0xff] }
 0x71b   :  { %1702 = vmatprep.subr.mxu0 %v1611_v45  ;;  %1779 = vmatprep.subr.mxu1 %v1613_v47  ;;  %v5768_v45 = vld [vmem:[%s6855_s1 + $0x2a8] sm:$0xff]  ;;  %v5773_v47 = vld [vmem:[%s6855_s1 + $0x2b8] sm:$0xff] }
 0x71c   :  { %1703 = vmatpush1.msra.mxu0 %v1610_v51  ;;  %1780 = vmatpush1.msra.mxu1 %v1612_v0  ;;  %v5780_v51 = vld [vmem:[%s6855_s1 + $0x2a0] sm:$0xff]  ;;  %v5785_v0 = vld [vmem:[%s6855_s1 + $0x2b0] sm:$0xff] }
 0x71d   :  { %1704 = vmatprep.subr.mxu0 %v1607_v50  ;;  %1781 = vmatprep.subr.mxu1 %v1609_v44  ;;  %v5792_v50 = vld [vmem:[%s6855_s1 + $0x288] sm:$0xff]  ;;  %v5797_v44 = vld [vmem:[%s6855_s1 + $0x298] sm:$0xff] }
 0x71e   :  { %1705 = vmatpush1.msra.mxu0 %v1606_v62  ;;  %1782 = vmatpush1.msra.mxu1 %v1608_v13  ;;  %7223 = vst [vmem:[#allocation28_spill] sm:$0xff] %v5792_v50  ;;  %7224 = vst [vmem:[#allocation20_spill] sm:$0xff] %v5797_v44  ;;  %v5804_v62 = vld [vmem:[%s6855_s1 + $0x280] sm:$0xff]  ;;  %v5809_v13 = vld [vmem:[%s6855_s1 + $0x290] sm:$0xff] }
 0x71f   :  { %1706 = vmatprep.subr.mxu0 %v1603_v53  ;;  %1783 = vmatprep.subr.mxu1 %v1605_v26  ;;  %7225 = vst [vmem:[#allocation29_spill] sm:$0xff] %v5804_v62  ;;  %7226 = vst [vmem:[#allocation11_spill] sm:$0xff] %v5809_v13  ;;  %v5816_v53 = vld [vmem:[%s6855_s1 + $0x268] sm:$0xff]  ;;  %v5821_v26 = vld [vmem:[%s6855_s1 + $0x278] sm:$0xff] }
 0x720   :  { %1707 = vmatpush1.msra.mxu0 %v1602_v24  ;;  %1784 = vmatpush1.msra.mxu1 %v1604_v17  ;;  %7227 = vst [vmem:[#allocation35_spill] sm:$0xff] %v5816_v53  ;;  %7228 = vst [vmem:[#allocation17_spill] sm:$0xff] %v5821_v26  ;;  %v5828_v24 = vld [vmem:[%s6855_s1 + $0x260] sm:$0xff]  ;;  %v5833_v17 = vld [vmem:[%s6855_s1 + $0x270] sm:$0xff] }
 0x721   :  { %1708 = vmatprep.subr.mxu0 %v1599_v15  ;;  %1785 = vmatprep.subr.mxu1 %v1601_v21  ;;  %7229 = vst [vmem:[#allocation12_spill] sm:$0xff] %v5828_v24  ;;  %7230 = vst [vmem:[#allocation19_spill] sm:$0xff] %v5833_v17  ;;  %v5840_v15 = vld [vmem:[%s6855_s1 + $0x248] sm:$0xff]  ;;  %v5845_v21 = vld [vmem:[%s6855_s1 + $0x258] sm:$0xff] }
 0x722   :  { %1709 = vmatpush1.msra.mxu0 %v1598_v54  ;;  %1786 = vmatpush1.msra.mxu1 %v1600_v4  ;;  %7231 = vst [vmem:[#allocation13_spill] sm:$0xff] %v5840_v15  ;;  %7232 = vst [vmem:[#allocation21_spill] sm:$0xff] %v5845_v21  ;;  %v5852_v54 = vld [vmem:[%s6855_s1 + $0x240] sm:$0xff]  ;;  %v5857_v4 = vld [vmem:[%s6855_s1 + $0x250] sm:$0xff] }
 0x723   :  { %1710 = vmatprep.subr.mxu0 %v1595_v40  ;;  %1787 = vmatprep.subr.mxu1 %v1597_v60  ;;  %7233 = vst [vmem:[#allocation14_spill] sm:$0xff] %v5852_v54  ;;  %7234 = vst [vmem:[#allocation23_spill] sm:$0xff] %v5857_v4  ;;  %v5866_v40 = vld [vmem:[%s6855_s1 + $0x228] sm:$0xff]  ;;  %v5871_v60 = vld [vmem:[%s6855_s1 + $0x238] sm:$0xff] }
 0x724   :  { %1711 = vmatpush1.msra.mxu0 %v1594_v25  ;;  %1744 = vmatprep.mubr.f32.mxu0 %v7218_v20  ;;  %7235 = vst [vmem:[#allocation30_spill] sm:$0xff] %v5866_v40  ;;  %7236 = vst [vmem:[#allocation15_spill] sm:$0xff] %v5871_v60  ;;  %v5876_v25 = vld [vmem:[%s6855_s1 + $0x220] sm:$0xff] }
 0x725   :  { %1788 = vmatpush1.msra.mxu1 %v1596_v23  ;;  %1821 = vmatprep.mubr.f32.mxu1 %v7218_v20  ;;  %7237 = vst [vmem:[#allocation24_spill] sm:$0xff] %v5876_v25  ;;  %v5883_v23 = vld [vmem:[%s6855_s1 + $0x230] sm:$0xff] }
 0x726   :  { %1745 = vmatmul.mubr.f32.vlgmr.msra.gmra.mxu0 %v7220_v42  ;;  %1822 = vmatmul.mubr.f32.vlgmr.msra.gmra.mxu1 %v7220_v42  ;;  %7238 = vst [vmem:[#allocation25_spill] sm:$0xff] %v5883_v23  ;;  %v5888_v42 = vld [vmem:[%s6855_s1 + $0x208] sm:$0xff] }
 0x727   :  { %1750 = vmatprep.mubr.f32.mxu0 %v7218_v20  ;;  %1827 = vmatprep.mubr.f32.mxu1 %v7218_v20  ;;  %7239 = vst [vmem:[#allocation31_spill] sm:$0xff] %v5888_v42 }
 0x728   :  { %1917 = vmatprep.subr.mxu0 %v5532_v19  ;;  %1988 = vmatprep.subr.mxu1 %v5537_v59 }
 0x729   :  { %1918 = vmatpush1.msra.mxu0 %v5544_v58  ;;  %1989 = vmatpush1.msra.mxu1 %v5549_v63 }
 0x72a   :  { %1919 = vmatprep.subr.mxu0 %v5556_v46  ;;  %1990 = vmatprep.subr.mxu1 %v5561_v52 }
 0x72b   :  { %1920 = vmatpush1.msra.mxu0 %v5568_v49  ;;  %1991 = vmatpush1.msra.mxu1 %v5573_v48 }
 0x72c   :  { %1921 = vmatprep.subr.mxu0 %v5580_v57  ;;  %1992 = vmatprep.subr.mxu1 %v5585_v9 }
 0x72d   :  { %1922 = vmatpush1.msra.mxu0 %v5592_v56  ;;  %1993 = vmatpush1.msra.mxu1 %v5597_v1 }
 0x72e   :  { %1923 = vmatprep.subr.mxu0 %v5604_v2  ;;  %1994 = vmatprep.subr.mxu1 %v5609_v3 }
 0x72f   :  { %1924 = vmatpush1.msra.mxu0 %v5614_v5  ;;  %1995 = vmatpush1.msra.mxu1 %v5621_v6 }
 0x730   :  { %1925 = vmatprep.subr.mxu0 %v5626_v7  ;;  %1996 = vmatprep.subr.mxu1 %v5631_v8 }
 0x731   :  { %1926 = vmatpush1.msra.mxu0 %v5638_v10  ;;  %1997 = vmatpush1.msra.mxu1 %v5643_v11 }
 0x732   :  { %1927 = vmatprep.subr.mxu0 %v5648_v12  ;;  %1998 = vmatprep.subr.mxu1 %v5655_v14 }
 0x733   :  { %1928 = vmatpush1.msra.mxu0 %v5660_v16  ;;  %1999 = vmatpush1.msra.mxu1 %v5665_v18 }
 0x734   :  { %1929 = vmatprep.subr.mxu0 %v5672_v22  ;;  %2000 = vmatprep.subr.mxu1 %v5677_v27 }
 0x735   :  { %1930 = vmatpush1.msra.mxu0 %v5684_v28  ;;  %2001 = vmatpush1.msra.mxu1 %v5689_v29 }
 0x736   :  { %1931 = vmatprep.subr.mxu0 %v5696_v30  ;;  %2002 = vmatprep.subr.mxu1 %v5701_v31 }
 0x737   :  { %1932 = vmatpush1.msra.mxu0 %v5708_v32  ;;  %2003 = vmatpush1.msra.mxu1 %v5713_v33 }
 0x738   :  { %1933 = vmatprep.subr.mxu0 %v5720_v34  ;;  %2004 = vmatprep.subr.mxu1 %v5725_v35 }
 0x739   :  { %1934 = vmatpush1.msra.mxu0 %v5732_v36  ;;  %2005 = vmatpush1.msra.mxu1 %v5737_v37 }
 0x73a   :  { %1935 = vmatprep.subr.mxu0 %v5744_v38  ;;  %2006 = vmatprep.subr.mxu1 %v5749_v39 }
 0x73b   :  { %1936 = vmatpush1.msra.mxu0 %v5756_v41  ;;  %2007 = vmatpush1.msra.mxu1 %v5761_v43 }
 0x73c   :  { %1937 = vmatprep.subr.mxu0 %v5768_v45  ;;  %2008 = vmatprep.subr.mxu1 %v5773_v47 }
 0x73d   :  { %1938 = vmatpush1.msra.mxu0 %v5780_v51  ;;  %2009 = vmatpush1.msra.mxu1 %v5785_v0 }
 0x73e   :  { %1939 = vmatprep.subr.mxu0 %v5792_v50  ;;  %2010 = vmatprep.subr.mxu1 %v5797_v44 }
 0x73f   :  { %1940 = vmatpush1.msra.mxu0 %v5804_v62  ;;  %2011 = vmatpush1.msra.mxu1 %v5809_v13 }
 0x740   :  { %1941 = vmatprep.subr.mxu0 %v5816_v53  ;;  %2012 = vmatprep.subr.mxu1 %v5821_v26 }
 0x741   :  { %1942 = vmatpush1.msra.mxu0 %v5828_v24  ;;  %2013 = vmatpush1.msra.mxu1 %v5833_v17 }
 0x742   :  { %1943 = vmatprep.subr.mxu0 %v5840_v15  ;;  %2014 = vmatprep.subr.mxu1 %v5845_v21  ;;  %v5893_v21 = vld [vmem:[%s6855_s1 + $0x218] sm:$0xff] }
 0x743   :  { %1944 = vmatpush1.msra.mxu0 %v5852_v54  ;;  %2015 = vmatpush1.msra.mxu1 %v5857_v4  ;;  %7240 = vst [vmem:[#allocation16_spill] sm:$0xff] %v5893_v21  ;;  %v5900_v4 = vld [vmem:[%s6855_s1 + $0x200] sm:$0xff]  ;;  %v5905_v54 = vld [vmem:[%s6855_s1 + $0x210] sm:$0xff] }
 0x744   :  { %1945 = vmatprep.subr.mxu0 %v5866_v40  ;;  %2016 = vmatprep.subr.mxu1 %v5871_v60  ;;  %7241 = vst [vmem:[#allocation26_spill] sm:$0xff] %v5900_v4  ;;  %7242 = vst [vmem:[#allocation27_spill] sm:$0xff] %v5905_v54 }
 0x745   :  { %1946 = vmatpush1.msra.mxu0 %v5876_v25  ;;  %2017 = vmatpush1.msra.mxu1 %v5883_v23  ;;  %v3882_v25 = vld [vmem:[%s6854_s0 + $0x20] sm:$0xff] }
 0x746   :  { %1947 = vmatprep.subr.mxu0 %v5888_v42  ;;  %2018 = vmatprep.subr.mxu1 %v5893_v21 }
 0x747   :  { %1948 = vmatpush1.msra.mxu0 %v5900_v4  ;;  %2019 = vmatpush1.msra.mxu1 %v5905_v54  ;;  %v3883_v4 = vld [vmem:[%s6854_s0 + $0x28] sm:$0xff] }
 0x748   :  { %2087 = vmatprep.subr.mxu0 %v5532_v19  ;;  %2158 = vmatprep.subr.mxu1 %v5537_v59 }
 0x7c5   :  { %v1466_v60 = vpop.f32.mrf.mxu0  ;;  %v1537_v17 = vpop.f32.mrf.mxu1 }
 0x7c6   :  { %v1546_v40 = vrot.slane %v1466_v60, 2  ;;  %v3884_v60 = vld [vmem:[%s6854_s0 + $0x38] sm:$0xff]  ;;  %v1548_v53 = vrot.slane %v1537_v17, 2 }
 0x7c7   :  { %v1468_v15 = vpop.f32.mrf.mxu0  ;;  %v1539_v21 = vpop.f32.mrf.mxu1 }
 0x7c8   :  { %v1554_v23 = vadd.f32 %v3882_v25, %v1546_v40  ;;  %v1547_v42 = vrot.slane %v1468_v15, 2  ;;  %v1549_v59 = vrot.slane %v1539_v21, 2  ;;  %v3885_v15 = vld [vmem:[%s6854_s0 + $0x30] sm:$0xff] }
 0x7ca   :  { %v3465_v24 = vmul.f32 -1.442695, %v1554_v23  ;;  %v1555_v54 = vadd.f32 %v3883_v4, %v1547_v42  ;;  %v1557_v26 = vadd.f32 %v3884_v60, %v1549_v59  ;;  %v1556_v23 = vadd.f32 %v3885_v15, %v1548_v53  ;;  %v7245_v15 = vld [vmem:[#allocation35_spill] sm:$0xff] }
 0x7cb   :  { %v1578_v59 = vrot.slane %v5328_v61, 6  ;;  %v1908_v61 = vld [vmem:[#allocation4 + $0x2] sm:$0x3] }
 0x7cc   :  { %3674 = vpow2.f32 %v3465_v24  ;;  %v3466_v19 = vmul.f32 -1.442695, %v1555_v54  ;;  %v3467_v40 = vmul.f32 -1.442695, %v1557_v26 }
 0x7ce   :  { %3676 = vpow2.f32 %v3466_v19 }
 0x7cf   :  { %3678 = vpow2.f32 %v3467_v40 }
 0x7d9   :  { %v3675_v25 = vpop.eup %3674 }
 0x7da   :  { %v1561_v13 = vadd.f32 1.0, %v3675_v25 }
 0x7db   :  { %v3677_v4 = vpop.eup %3676 }
 0x7dc   :  { %3680 = vrcp.f32 %v1561_v13  ;;  %v1567_v24 = vadd.f32 1.0, %v3677_v4  ;;  %v3679_v19 = vpop.eup %3678  ;;  %v7247_v4 = vld [vmem:[#allocation12_spill] sm:$0xff] }
 0x7dd   :  { %3682 = vtanh.f32 %v1556_v23  ;;  %v1574_v26 = vadd.f32 1.0, %v3679_v19  ;;  %v7246_v23 = vld [vmem:[#allocation17_spill] sm:$0xff] }
 0x7de   :  { %3684 = vrcp.f32 %v1567_v24  ;;  %v7248_v24 = vld [vmem:[#allocation19_spill] sm:$0xff]  ;;  %v7249_v19 = vld [vmem:[#allocation13_spill] sm:$0xff] }
 0x7df   :  { %3686 = vrcp.f32 %v1574_v26  ;;  %v7254_v26 = vld [vmem:[#allocation15_spill] sm:$0xff] }
 0x7e9   :  { %v3681_v21 = vpop.eup %3680 }
 0x7ea   :  { %v3683_v54 = vpop.eup %3682 }
 0x7eb   :  { %v3685_v17 = vpop.eup %3684  ;;  %v1581_v42 = vmul.f32 %v3683_v54, %v3681_v21  ;;  %v7250_v21 = vld [vmem:[#allocation21_spill] sm:$0xff]  ;;  %v7251_v54 = vld [vmem:[#allocation14_spill] sm:$0xff] }
 0x7ec   :  { %v1580_v60 = vmul.f32 %v3685_v17, %v1578_v59  ;;  %v3687_v53 = vpop.eup %3686  ;;  %v7252_v59 = vld [vmem:[#allocation23_spill] sm:$0xff]  ;;  %v7253_v17 = vld [vmem:[#allocation30_spill] sm:$0xff] }
 0x7ee   :  { %v1582_v62 = vadd.f32 %v1581_v42, %v1580_v60  ;;  %v7255_v42 = vld [vmem:[#allocation24_spill] sm:$0xff]  ;;  %v7256_v60 = vld [vmem:[#allocation25_spill] sm:$0xff] }
 0x7f0   :  { %3688 = vtanh.f32 %v1582_v62  ;;  %1591 = vst [vmem:[#allocation6 - $0x6] sm:$0xc0] %v1582_v62  ;;  %v7244_v62 = vld [vmem:[#allocation11_spill] sm:$0xff] }
 0x7fd   :  { %v3689_v25 = vpop.eup %3688 }
 0x7fe   :  { %v1584_v40 = vmul.f32 %v3689_v25, %v3687_v53  ;;  %v7257_v53 = vld [vmem:[#allocation31_spill] sm:$0xff]  ;;  %v7258_v25 = vld [vmem:[#allocation16_spill] sm:$0xff] }
 0x800   :  { %v1587_v13 = vsel %vm838_vm2, %v5341_v55, %v1584_v40  ;;  %1590 = vst [vmem:[#allocation4 - $0x6] sm:$0xc0] %v1584_v40  ;;  %v7243_v55 = vld [vmem:[#allocation29_spill] sm:$0xff]  ;;  %v7259_v40 = vld [vmem:[#allocation26_spill] sm:$0xff] }
 0x801   :  { %1751 = vmatmul.mubr.f32.gmra.mxu0 %v1587_v13  ;;  %1828 = vmatmul.mubr.f32.gmra.mxu1 %v1587_v13  ;;  %v7260_v13 = vld [vmem:[#allocation27_spill] sm:$0xff] }
 0x802   :  { %1981 = vmatprep.mubr.f32.mxu0 %v7218_v20  ;;  %2052 = vmatprep.mubr.f32.mxu1 %v7218_v20 }
 0x805   :  { %1982 = vmatmul.mubr.f32.vlgmr.msra.gmra.mxu0 %v1908_v61  ;;  %2053 = vmatmul.mubr.f32.vlgmr.msra.gmra.mxu1 %v1908_v61  ;;  %v7261_v61 = vld [vmem:[#allocation33_spill] sm:$0xff] }
 0x806   :  { %2088 = vmatpush1.msra.mxu0 %v5544_v58  ;;  %2159 = vmatpush1.msra.mxu1 %v5549_v63 }
 0x807   :  { %2089 = vmatprep.subr.mxu0 %v5556_v46  ;;  %2160 = vmatprep.subr.mxu1 %v5561_v52 }
 0x808   :  { %2090 = vmatpush1.msra.mxu0 %v5568_v49  ;;  %2161 = vmatpush1.msra.mxu1 %v5573_v48 }
 0x809   :  { %2091 = vmatprep.subr.mxu0 %v5580_v57  ;;  %2162 = vmatprep.subr.mxu1 %v5585_v9 }
 0x80a   :  { %2092 = vmatpush1.msra.mxu0 %v5592_v56  ;;  %2163 = vmatpush1.msra.mxu1 %v5597_v1 }
 0x80b   :  { %2093 = vmatprep.subr.mxu0 %v5604_v2  ;;  %2164 = vmatprep.subr.mxu1 %v5609_v3 }
 0x80c   :  { %2094 = vmatpush1.msra.mxu0 %v5614_v5  ;;  %2165 = vmatpush1.msra.mxu1 %v5621_v6 }
 0x80d   :  { %2095 = vmatprep.subr.mxu0 %v5626_v7  ;;  %2166 = vmatprep.subr.mxu1 %v5631_v8 }
 0x80e   :  { %2096 = vmatpush1.msra.mxu0 %v5638_v10  ;;  %2167 = vmatpush1.msra.mxu1 %v5643_v11 }
 0x80f   :  { %2097 = vmatprep.subr.mxu0 %v5648_v12  ;;  %2168 = vmatprep.subr.mxu1 %v5655_v14 }
 0x810   :  { %2098 = vmatpush1.msra.mxu0 %v5660_v16  ;;  %2169 = vmatpush1.msra.mxu1 %v5665_v18 }
 0x811   :  { %2099 = vmatprep.subr.mxu0 %v5672_v22  ;;  %2170 = vmatprep.subr.mxu1 %v5677_v27 }
 0x812   :  { %2100 = vmatpush1.msra.mxu0 %v5684_v28  ;;  %2171 = vmatpush1.msra.mxu1 %v5689_v29 }
 0x813   :  { %2101 = vmatprep.subr.mxu0 %v5696_v30  ;;  %2172 = vmatprep.subr.mxu1 %v5701_v31 }
 0x814   :  { %2102 = vmatpush1.msra.mxu0 %v5708_v32  ;;  %2173 = vmatpush1.msra.mxu1 %v5713_v33 }
 0x815   :  { %2103 = vmatprep.subr.mxu0 %v5720_v34  ;;  %2174 = vmatprep.subr.mxu1 %v5725_v35 }
 0x816   :  { %2104 = vmatpush1.msra.mxu0 %v5732_v36  ;;  %2175 = vmatpush1.msra.mxu1 %v5737_v37 }
 0x817   :  { %2105 = vmatprep.subr.mxu0 %v5744_v38  ;;  %2176 = vmatprep.subr.mxu1 %v5749_v39 }
 0x818   :  { %2106 = vmatpush1.msra.mxu0 %v5756_v41  ;;  %2177 = vmatpush1.msra.mxu1 %v5761_v43 }
 0x819   :  { %2107 = vmatprep.subr.mxu0 %v5768_v45  ;;  %2178 = vmatprep.subr.mxu1 %v5773_v47 }
 0x81a   :  { %2108 = vmatpush1.msra.mxu0 %v5780_v51  ;;  %2179 = vmatpush1.msra.mxu1 %v5785_v0 }
 0x81b   :  { %2109 = vmatprep.subr.mxu0 %v5792_v50  ;;  %2180 = vmatprep.subr.mxu1 %v5797_v44 }
 0x81c   :  { %2110 = vmatpush1.msra.mxu0 %v7243_v55  ;;  %2181 = vmatpush1.msra.mxu1 %v7244_v62 }
 0x81d   :  { %2111 = vmatprep.subr.mxu0 %v7245_v15  ;;  %2182 = vmatprep.subr.mxu1 %v7246_v23 }
 0x81e   :  { %2112 = vmatpush1.msra.mxu0 %v7247_v4  ;;  %2183 = vmatpush1.msra.mxu1 %v7248_v24 }
 0x81f   :  { %2113 = vmatprep.subr.mxu0 %v7249_v19  ;;  %2184 = vmatprep.subr.mxu1 %v7250_v21 }
 0x820   :  { %2114 = vmatpush1.msra.mxu0 %v7251_v54  ;;  %2185 = vmatpush1.msra.mxu1 %v7252_v59  ;;  %v1746_v59 = vpop.f32.mrf.mxu0  ;;  %v1823_v54 = vpop.f32.mrf.mxu1 }
 0x821   :  { %2115 = vmatprep.subr.mxu0 %v7253_v17  ;;  %2186 = vmatprep.subr.mxu1 %v7254_v26  ;;  %v7262_v17 = vld [vmem:[#allocation34_spill] sm:$0xff]  ;;  %v1660_v26 = vlaneseq }
 0x822   :  { %2116 = vmatpush1.msra.mxu0 %v7255_v42  ;;  %2187 = vmatpush1.msra.mxu1 %v7256_v60 }
 0x823   :  { %2117 = vmatprep.subr.mxu0 %v7257_v53  ;;  %2188 = vmatprep.subr.mxu1 %v7258_v25  ;;  %v1661_v42 = vshrl.u32 %v1660_v26, 7  ;;  %v1658_v25 = vld [vmem:[%s6857_s3] sm:$0xf]  ;;  %v1748_v53 = vpop.f32.mrf.mxu0 }
 0x824   :  { %2118 = vmatpush1.msra.mxu0 %v7259_v40  ;;  %2151 = vmatprep.mubr.f32.mxu0 %v7218_v20 }
 0x825   :  { %2189 = vmatpush1.msra.mxu1 %v7260_v13  ;;  %2222 = vmatprep.mubr.f32.mxu1 %v7218_v20  ;;  %v1662_v60 = vsub.s32 0, %v1661_v42  ;;  %v1666_v40 = vsub.s32 1, %v1661_v42  ;;  %v1825_v13 = vpop.f32.mrf.mxu1  ;;  %v1674_v15 = vsub.s32 3, %v1661_v42 }
 0x826   :  { %2275 = vmatprep.subr.mxu0 %v7261_v61  ;;  %2346 = vmatprep.subr.mxu1 %v7262_v17 }
 0x827   :  { %v6001_v21 = vrot.slane %v1658_v25, %v1662_v60  ;;  %v6005_v20 = vrot.slane %v1658_v25, %v1666_v40 }
 0x829   :  { %7263 = vst [vmem:[#allocation32_spill] sm:$0xff] %v6001_v21  ;;  %7265 = vst [vmem:[#allocation36_spill] sm:$0xff] %v6005_v20  ;;  %v6012_v26 = vadd.f32 %v1746_v59, %v6001_v21  ;;  %v6015_v4 = vadd.f32 %v1748_v53, %v6005_v20  ;;  %v1670_v59 = vsub.s32 2, %v1661_v42 }
 0x82b   :  { %v6026_v20 = vrot.slane %v1658_v25, %v1670_v59 }
 0x82d   :  { %7271 = vst [vmem:[#allocation40_spill] sm:$0xff] %v6026_v20 }
 0x8c1   :  { %v6003_v19 = vpop.f32.mrf.mxu0  ;;  %v6007_v61 = vpop.f32.mrf.mxu1 }
 0x8c2   :  { %7264 = vst [vmem:[#allocation18_spill] sm:$0xff] %v6003_v19  ;;  %7266 = vst [vmem:[#allocation22_spill] sm:$0xff] %v6007_v61 }
 0x8c3   :  { %v6009_v17 = vpop.f32.mrf.mxu0  ;;  %v6017_v23 = vpop.f32.mrf.mxu1 }
 0x8c4   :  { %7267 = vst [vmem:[#allocation10_spill] sm:$0xff] %v6009_v17  ;;  %7268 = vst [vmem:[#allocation37_spill] sm:$0xff] %v6017_v23  ;;  %v6021_v17 = vrot.slane %v1658_v25, %v1674_v15  ;;  %v6030_v23 = vadd.f32 %v1823_v54, %v6026_v20  ;;  %v1910_v25 = vld [vmem:[#allocation6 + $0x2] sm:$0x3] }
 0x8c5   :  { %v1983_v24 = vpop.f32.mrf.mxu0  ;;  %v2054_v61 = vpop.f32.mrf.mxu1 }
 0x8c6   :  { %v2059_v60 = vadd.f32 %v1983_v24, %v6012_v26  ;;  %7269 = vst [vmem:[#allocation38_spill] sm:$0xff] %v6021_v17  ;;  %v6024_v53 = vadd.f32 %v1825_v13, %v6021_v17 }
 0x8c7   :  { %v1985_v62 = vpop.f32.mrf.mxu0  ;;  %v2056_v21 = vpop.f32.mrf.mxu1 }
 0x8c8   :  { %v3532_v19 = vmul.f32 -1.442695, %v2059_v60  ;;  %v2060_v40 = vadd.f32 %v1985_v62, %v6015_v4  ;;  %7270 = vst [vmem:[#allocation39_spill] sm:$0xff] %v6024_v53  ;;  %v2062_v24 = vadd.f32 %v2056_v21, %v6024_v53 }
 0x8ca   :  { %3690 = vpow2.f32 %v3532_v19  ;;  %v3533_v55 = vmul.f32 -1.442695, %v2060_v40  ;;  %v3534_v60 = vmul.f32 -1.442695, %v2062_v24  ;;  %v2061_v19 = vadd.f32 %v2054_v61, %v6030_v23 }
 0x8cc   :  { %3692 = vpow2.f32 %v3533_v55 }
 0x8cd   :  { %3694 = vpow2.f32 %v3534_v60 }
 0x8d7   :  { %v3691_v62 = vpop.eup %3690 }
 0x8d8   :  { %v2066_v40 = vadd.f32 1.0, %v3691_v62  ;;  %v7275_v62 = vld [vmem:[#allocation35_spill] sm:$0xff] }
 0x8d9   :  { %v3693_v15 = vpop.eup %3692 }
 0x8da   :  { %3696 = vrcp.f32 %v2066_v40  ;;  %v2072_v55 = vadd.f32 1.0, %v3693_v15  ;;  %v3695_v42 = vpop.eup %3694  ;;  %v7277_v40 = vld [vmem:[#allocation12_spill] sm:$0xff]  ;;  %v7278_v15 = vld [vmem:[#allocation19_spill] sm:$0xff] }
 0x8db   :  { %3698 = vtanh.f32 %v2061_v19  ;;  %v2079_v21 = vadd.f32 1.0, %v3695_v42  ;;  %v7276_v19 = vld [vmem:[#allocation17_spill] sm:$0xff] }
 0x8dc   :  { %3700 = vrcp.f32 %v2072_v55  ;;  %v7279_v55 = vld [vmem:[#allocation13_spill] sm:$0xff] }
 0x8dd   :  { %3702 = vrcp.f32 %v2079_v21  ;;  %v7280_v42 = vld [vmem:[#allocation21_spill] sm:$0xff]  ;;  %v7284_v21 = vld [vmem:[#allocation15_spill] sm:$0xff] }
 0x8e7   :  { %v3697_v13 = vpop.eup %3696 }
 0x8e8   :  { %v3699_v59 = vpop.eup %3698 }
 0x8e9   :  { %v3701_v17 = vpop.eup %3700  ;;  %v2083_v53 = vmul.f32 %v3699_v59, %v3697_v13  ;;  %v7281_v13 = vld [vmem:[#allocation14_spill] sm:$0xff] }
 0x8ea   :  { %v2082_v54 = vmul.f32 %v3701_v17, %v1910_v25  ;;  %v3703_v61 = vpop.eup %3702  ;;  %v7273_v17 = vld [vmem:[#allocation29_spill] sm:$0xff]  ;;  %v7282_v25 = vld [vmem:[#allocation23_spill] sm:$0xff]  ;;  %v7283_v59 = vld [vmem:[#allocation30_spill] sm:$0xff] }
 0x8ec   :  { %v6033_v20 = vadd.f32 %v2083_v53, %v2082_v54  ;;  %v7274_v53 = vld [vmem:[#allocation11_spill] sm:$0xff]  ;;  %v7285_v54 = vld [vmem:[#allocation24_spill] sm:$0xff] }
 0x8ee   :  { %3704 = vtanh.f32 %v6033_v20 }
 0x8fb   :  { %v3705_v24 = vpop.eup %3704 }
 0x8fc   :  { %v6036_v60 = vmul.f32 %v3705_v24, %v3703_v61  ;;  %v7286_v61 = vld [vmem:[#allocation25_spill] sm:$0xff]  ;;  %v7287_v24 = vld [vmem:[#allocation31_spill] sm:$0xff] }
 0x8fe   :  { %7272 = vst [vmem:[#allocation41_spill] sm:$0xff] %v6036_v60  ;;  %2152 = vmatmul.mubr.f32.vlgmr.msra.gmra.mxu0 %v6036_v60  ;;  %2223 = vmatmul.mubr.f32.vlgmr.msra.gmra.mxu1 %v6036_v60  ;;  %v7288_v60 = vld [vmem:[#allocation16_spill] sm:$0xff] }
 0x8ff   :  { %2276 = vmatpush1.msra.mxu0 %v5544_v58  ;;  %2347 = vmatpush1.msra.mxu1 %v5549_v63 }
 0x900   :  { %2277 = vmatprep.subr.mxu0 %v5556_v46  ;;  %2348 = vmatprep.subr.mxu1 %v5561_v52 }
 0x901   :  { %2278 = vmatpush1.msra.mxu0 %v5568_v49  ;;  %2349 = vmatpush1.msra.mxu1 %v5573_v48 }
 0x902   :  { %2279 = vmatprep.subr.mxu0 %v5580_v57  ;;  %2350 = vmatprep.subr.mxu1 %v5585_v9 }
 0x903   :  { %2280 = vmatpush1.msra.mxu0 %v5592_v56  ;;  %2351 = vmatpush1.msra.mxu1 %v5597_v1 }
 0x904   :  { %2281 = vmatprep.subr.mxu0 %v5604_v2  ;;  %2352 = vmatprep.subr.mxu1 %v5609_v3 }
 0x905   :  { %2282 = vmatpush1.msra.mxu0 %v5614_v5  ;;  %2353 = vmatpush1.msra.mxu1 %v5621_v6 }
 0x906   :  { %2283 = vmatprep.subr.mxu0 %v5626_v7  ;;  %2354 = vmatprep.subr.mxu1 %v5631_v8 }
 0x907   :  { %2284 = vmatpush1.msra.mxu0 %v5638_v10  ;;  %2355 = vmatpush1.msra.mxu1 %v5643_v11 }
 0x908   :  { %2285 = vmatprep.subr.mxu0 %v5648_v12  ;;  %2356 = vmatprep.subr.mxu1 %v5655_v14 }
 0x909   :  { %2286 = vmatpush1.msra.mxu0 %v5660_v16  ;;  %2357 = vmatpush1.msra.mxu1 %v5665_v18 }
 0x90a   :  { %2287 = vmatprep.subr.mxu0 %v5672_v22  ;;  %2358 = vmatprep.subr.mxu1 %v5677_v27 }
 0x90b   :  { %2288 = vmatpush1.msra.mxu0 %v5684_v28  ;;  %2359 = vmatpush1.msra.mxu1 %v5689_v29 }
 0x90c   :  { %2289 = vmatprep.subr.mxu0 %v5696_v30  ;;  %2360 = vmatprep.subr.mxu1 %v5701_v31 }
 0x90d   :  { %2290 = vmatpush1.msra.mxu0 %v5708_v32  ;;  %2361 = vmatpush1.msra.mxu1 %v5713_v33 }
 0x90e   :  { %2291 = vmatprep.subr.mxu0 %v5720_v34  ;;  %2362 = vmatprep.subr.mxu1 %v5725_v35 }
 0x90f   :  { %2292 = vmatpush1.msra.mxu0 %v5732_v36  ;;  %2363 = vmatpush1.msra.mxu1 %v5737_v37 }
 0x910   :  { %2293 = vmatprep.subr.mxu0 %v5744_v38  ;;  %2364 = vmatprep.subr.mxu1 %v5749_v39 }
 0x911   :  { %2294 = vmatpush1.msra.mxu0 %v5756_v41  ;;  %2365 = vmatpush1.msra.mxu1 %v5761_v43 }
 0x912   :  { %2295 = vmatprep.subr.mxu0 %v5768_v45  ;;  %2366 = vmatprep.subr.mxu1 %v5773_v47 }
 0x913   :  { %2296 = vmatpush1.msra.mxu0 %v5780_v51  ;;  %2367 = vmatpush1.msra.mxu1 %v5785_v0 }
 0x914   :  { %2297 = vmatprep.subr.mxu0 %v5792_v50  ;;  %2368 = vmatprep.subr.mxu1 %v5797_v44 }
 0x915   :  { %2298 = vmatpush1.msra.mxu0 %v7273_v17  ;;  %2369 = vmatpush1.msra.mxu1 %v7274_v53 }
 0x916   :  { %2299 = vmatprep.subr.mxu0 %v7275_v62  ;;  %2370 = vmatprep.subr.mxu1 %v7276_v19 }
 0x917   :  { %2300 = vmatpush1.msra.mxu0 %v7277_v40  ;;  %2371 = vmatpush1.msra.mxu1 %v7278_v15  ;;  %v7289_v15 = vld [vmem:[#allocation26_spill] sm:$0xff] }
 0x918   :  { %2301 = vmatprep.subr.mxu0 %v7279_v55  ;;  %2372 = vmatprep.subr.mxu1 %v7280_v42  ;;  %v7290_v55 = vmov 0.0   ;;  %v7291_v42 = vld [vmem:[#allocation27_spill] sm:$0xff] }
 0x919   :  { %2302 = vmatpush1.msra.mxu0 %v7281_v13  ;;  %2373 = vmatpush1.msra.mxu1 %v7282_v25  ;;  %v7292_v25 = vld [vmem:[#allocation33_spill] sm:$0xff] }
 0x91a   :  { %2303 = vmatprep.subr.mxu0 %v7283_v59  ;;  %2374 = vmatprep.subr.mxu1 %v7284_v21  ;;  %v7293_v59 = vld [vmem:[#allocation34_spill] sm:$0xff] }
 0x91b   :  { %2304 = vmatpush1.msra.mxu0 %v7285_v54  ;;  %2375 = vmatpush1.msra.mxu1 %v7286_v61 }
 0x91c   :  { %2305 = vmatprep.subr.mxu0 %v7287_v24  ;;  %2376 = vmatprep.subr.mxu1 %v7288_v60 }
 0x91d   :  { %2306 = vmatpush1.msra.mxu0 %v7289_v15  ;;  %2339 = vmatprep.mubr.f32.mxu0 %v7290_v55 }
 0x91e   :  { %2377 = vmatpush1.msra.mxu1 %v7291_v42  ;;  %2410 = vmatprep.mubr.f32.mxu1 %v7290_v55  ;;  %v7294_v55 = vld [vmem:[#allocation39_spill] sm:$0xff] }
 0x91f   :  { %2463 = vmatprep.subr.mxu0 %v7292_v25  ;;  %2534 = vmatprep.subr.mxu1 %v7293_v59 }
 0x9be   :  { %v2153_v21 = vpop.f32.mrf.mxu0  ;;  %v2224_v24 = vpop.f32.mrf.mxu1 }
 0x9bf   :  { %v2233_v54 = vrot.slane %v2153_v21, 6  ;;  %v2235_v25 = vrot.slane %v2224_v24, 6  ;;  %v7305_v24 = vld [vmem:[#allocation14_spill] sm:$0xff] }
 0x9c0   :  { %v2155_v13 = vpop.f32.mrf.mxu0  ;;  %v2226_v62 = vpop.f32.mrf.mxu1 }
 0x9c1   :  { %v2241_v61 = vadd.f32 %v2233_v54, %v6012_v26  ;;  %v2234_v40 = vrot.slane %v2155_v13, 6  ;;  %v2236_v42 = vrot.slane %v2226_v62, 6  ;;  %v2243_v21 = vadd.f32 %v2235_v25, %v6030_v23 }
 0x9c3   :  { %v3535_v60 = vmul.f32 -1.442695, %v2241_v61  ;;  %v2242_v15 = vadd.f32 %v2234_v40, %v6015_v4  ;;  %v2244_v53 = vadd.f32 %v2236_v42, %v7294_v55 }
 0x9c5   :  { %3706 = vpow2.f32 %v3535_v60  ;;  %v3536_v19 = vmul.f32 -1.442695, %v2242_v15  ;;  %v3537_v17 = vmul.f32 -1.442695, %v2244_v53 }
 0x9c7   :  { %3708 = vpow2.f32 %v3536_v19  ;;  %v2265_v19 = vrot.slane %v6033_v20, 6  ;;  %v7295_v20 = vld [vmem:[#allocation28_spill] sm:$0xff] }
 0x9c8   :  { %3710 = vpow2.f32 %v3537_v17 }
 0x9d2   :  { %v3707_v59 = vpop.eup %3706 }
 0x9d3   :  { %v2248_v44 = vadd.f32 1.0, %v3707_v59  ;;  %v7304_v59 = vld [vmem:[#allocation21_spill] sm:$0xff] }
 0x9d4   :  { %v3709_v50 = vpop.eup %3708 }
 0x9d5   :  { %3712 = vrcp.f32 %v2248_v44  ;;  %v2254_v13 = vadd.f32 1.0, %v3709_v50  ;;  %v3711_v40 = vpop.eup %3710 }
 0x9d6   :  { %3714 = vtanh.f32 %v2243_v21  ;;  %v2261_v54 = vadd.f32 1.0, %v3711_v40  ;;  %v7306_v21 = vld [vmem:[#allocation23_spill] sm:$0xff] }
 0x9d7   :  { %3716 = vrcp.f32 %v2254_v13  ;;  %v7307_v13 = vld [vmem:[#allocation30_spill] sm:$0xff]  ;;  %v7308_v40 = vld [vmem:[#allocation15_spill] sm:$0xff] }
 0x9d8   :  { %3718 = vrcp.f32 %v2261_v54  ;;  %v7313_v54 = vld [vmem:[#allocation26_spill] sm:$0xff] }
 0x9e2   :  { %v3713_v60 = vpop.eup %3712 }
 0x9e3   :  { %v3715_v15 = vpop.eup %3714 }
 0x9e4   :  { %v3717_v62 = vpop.eup %3716  ;;  %v2268_v42 = vmul.f32 %v3715_v15, %v3713_v60  ;;  %v7309_v60 = vld [vmem:[#allocation24_spill] sm:$0xff]  ;;  %v7310_v15 = vld [vmem:[#allocation25_spill] sm:$0xff] }
 0x9e5   :  { %v2267_v61 = vmul.f32 %v3717_v62, %v2265_v19  ;;  %v3719_v25 = vpop.eup %3718  ;;  %v7311_v19 = vld [vmem:[#allocation31_spill] sm:$0xff]  ;;  %v7312_v62 = vld [vmem:[#allocation16_spill] sm:$0xff] }
 0x9e7   :  { %v6111_v53 = vadd.f32 %v2268_v42, %v2267_v61  ;;  %v7314_v42 = vmov 0.0   ;;  %v7315_v61 = vld [vmem:[#allocation27_spill] sm:$0xff] }
 0x9e9   :  { %3720 = vtanh.f32 %v6111_v53 }
 0x9f6   :  { %v3721_v17 = vpop.eup %3720 }
 0x9f7   :  { %v6114_v44 = vmul.f32 %v3721_v17, %v3719_v25  ;;  %v7316_v25 = vld [vmem:[#allocation33_spill] sm:$0xff]  ;;  %v7317_v17 = vld [vmem:[#allocation34_spill] sm:$0xff] }
 0x9f9   :  { %v2273_v50 = vrot.slane %v6114_v44, 2 }
 0x9fb   :  { %2340 = vmatmul.mubr.f32.vlgmr.msra.gmra.mxu0 %v2273_v50  ;;  %2411 = vmatmul.mubr.f32.vlgmr.msra.gmra.mxu1 %v2273_v50 }
 0x9fc   :  { %2464 = vmatpush1.msra.mxu0 %v5544_v58  ;;  %2535 = vmatpush1.msra.mxu1 %v5549_v63  ;;  %v7296_v58 = vld [vmem:[#allocation20_spill] sm:$0xff]  ;;  %v7297_v63 = vld [vmem:[#allocation29_spill] sm:$0xff] }
 0x9fd   :  { %2465 = vmatprep.subr.mxu0 %v5556_v46  ;;  %2536 = vmatprep.subr.mxu1 %v5561_v52  ;;  %v7298_v46 = vld [vmem:[#allocation11_spill] sm:$0xff] }
 0x9fe   :  { %2466 = vmatpush1.msra.mxu0 %v5568_v49  ;;  %2537 = vmatpush1.msra.mxu1 %v5573_v48  ;;  %v7299_v52 = vld [vmem:[#allocation35_spill] sm:$0xff]  ;;  %v7300_v49 = vld [vmem:[#allocation17_spill] sm:$0xff]  ;;  %v7301_v48 = vld [vmem:[#allocation12_spill] sm:$0xff] }
 0x9ff   :  { %2467 = vmatprep.subr.mxu0 %v5580_v57  ;;  %2538 = vmatprep.subr.mxu1 %v5585_v9  ;;  %v7302_v57 = vld [vmem:[#allocation19_spill] sm:$0xff]  ;;  %v7303_v9 = vld [vmem:[#allocation13_spill] sm:$0xff] }
 0xa00   :  { %2468 = vmatpush1.msra.mxu0 %v5592_v56  ;;  %2539 = vmatpush1.msra.mxu1 %v5597_v1 }
 0xa01   :  { %2469 = vmatprep.subr.mxu0 %v5604_v2  ;;  %2540 = vmatprep.subr.mxu1 %v5609_v3 }
 0xa02   :  { %2470 = vmatpush1.msra.mxu0 %v5614_v5  ;;  %2541 = vmatpush1.msra.mxu1 %v5621_v6 }
 0xa03   :  { %2471 = vmatprep.subr.mxu0 %v5626_v7  ;;  %2542 = vmatprep.subr.mxu1 %v5631_v8 }
 0xa04   :  { %2472 = vmatpush1.msra.mxu0 %v5638_v10  ;;  %2543 = vmatpush1.msra.mxu1 %v5643_v11 }
 0xa05   :  { %2473 = vmatprep.subr.mxu0 %v5648_v12  ;;  %2544 = vmatprep.subr.mxu1 %v5655_v14 }
 0xa06   :  { %2474 = vmatpush1.msra.mxu0 %v5660_v16  ;;  %2545 = vmatpush1.msra.mxu1 %v5665_v18 }
 0xa07   :  { %2475 = vmatprep.subr.mxu0 %v5672_v22  ;;  %2546 = vmatprep.subr.mxu1 %v5677_v27 }
 0xa08   :  { %2476 = vmatpush1.msra.mxu0 %v5684_v28  ;;  %2547 = vmatpush1.msra.mxu1 %v5689_v29 }
 0xa09   :  { %2477 = vmatprep.subr.mxu0 %v5696_v30  ;;  %2548 = vmatprep.subr.mxu1 %v5701_v31 }
 0xa0a   :  { %2478 = vmatpush1.msra.mxu0 %v5708_v32  ;;  %2549 = vmatpush1.msra.mxu1 %v5713_v33 }
 0xa0b   :  { %2479 = vmatprep.subr.mxu0 %v5720_v34  ;;  %2550 = vmatprep.subr.mxu1 %v5725_v35 }
 0xa0c   :  { %2480 = vmatpush1.msra.mxu0 %v5732_v36  ;;  %2551 = vmatpush1.msra.mxu1 %v5737_v37 }
 0xa0d   :  { %2481 = vmatprep.subr.mxu0 %v5744_v38  ;;  %2552 = vmatprep.subr.mxu1 %v5749_v39 }
 0xa0e   :  { %2482 = vmatpush1.msra.mxu0 %v5756_v41  ;;  %2553 = vmatpush1.msra.mxu1 %v5761_v43 }
 0xa0f   :  { %2483 = vmatprep.subr.mxu0 %v5768_v45  ;;  %2554 = vmatprep.subr.mxu1 %v5773_v47 }
 0xa10   :  { %2484 = vmatpush1.msra.mxu0 %v5780_v51  ;;  %2555 = vmatpush1.msra.mxu1 %v5785_v0 }
 0xa11   :  { %2485 = vmatprep.subr.mxu0 %v7295_v20  ;;  %2556 = vmatprep.subr.mxu1 %v7296_v58 }
 0xa12   :  { %2486 = vmatpush1.msra.mxu0 %v7297_v63  ;;  %2557 = vmatpush1.msra.mxu1 %v7298_v46 }
 0xa13   :  { %2487 = vmatprep.subr.mxu0 %v7299_v52  ;;  %2558 = vmatprep.subr.mxu1 %v7300_v49 }
 0xa14   :  { %2488 = vmatpush1.msra.mxu0 %v7301_v48  ;;  %2559 = vmatpush1.msra.mxu1 %v7302_v57 }
 0xa15   :  { %2489 = vmatprep.subr.mxu0 %v7303_v9  ;;  %2560 = vmatprep.subr.mxu1 %v7304_v59 }
 0xa16   :  { %2490 = vmatpush1.msra.mxu0 %v7305_v24  ;;  %2561 = vmatpush1.msra.mxu1 %v7306_v21 }
 0xa17   :  { %2491 = vmatprep.subr.mxu0 %v7307_v13  ;;  %2562 = vmatprep.subr.mxu1 %v7308_v40 }
 0xa18   :  { %2492 = vmatpush1.msra.mxu0 %v7309_v60  ;;  %2563 = vmatpush1.msra.mxu1 %v7310_v15 }
 0xa19   :  { %2493 = vmatprep.subr.mxu0 %v7311_v19  ;;  %2564 = vmatprep.subr.mxu1 %v7312_v62 }
 0xa1a   :  { %2494 = vmatpush1.msra.mxu0 %v7313_v54  ;;  %2527 = vmatprep.mubr.f32.mxu0 %v7314_v42 }
 0xa1b   :  { %2565 = vmatpush1.msra.mxu1 %v7315_v61  ;;  %2598 = vmatprep.mubr.f32.mxu1 %v7314_v42 }
 0xa1c   :  { %2661 = vmatprep.subr.mxu0 %v7316_v25  ;;  %2732 = vmatprep.subr.mxu1 %v7317_v17 }
 0xabb   :  { %v2341_v50 = vpop.f32.mrf.mxu0  ;;  %v2412_v19 = vpop.f32.mrf.mxu1 }
 0xabc   :  { %v2421_v60 = vrot.slane %v2341_v50, 4  ;;  %v2423_v25 = vrot.slane %v2412_v19, 4 }
 0xabd   :  { %v2343_v40 = vpop.f32.mrf.mxu0  ;;  %v2414_v24 = vpop.f32.mrf.mxu1 }
 0xabe   :  { %v2429_v15 = vadd.f32 %v2421_v60, %v6012_v26  ;;  %v2422_v13 = vrot.slane %v2343_v40, 4  ;;  %v2424_v61 = vrot.slane %v2414_v24, 4  ;;  %v2431_v50 = vadd.f32 %v2423_v25, %v6030_v23 }
 0xac0   :  { %v3538_v62 = vmul.f32 -1.442695, %v2429_v15  ;;  %v2430_v54 = vadd.f32 %v2422_v13, %v6015_v4  ;;  %v2432_v42 = vadd.f32 %v2424_v61, %v7294_v55 }
 0xac2   :  { %3722 = vpow2.f32 %v3538_v62  ;;  %v3539_v21 = vmul.f32 -1.442695, %v2430_v54  ;;  %v3540_v59 = vmul.f32 -1.442695, %v2432_v42 }
 0xac4   :  { %3724 = vpow2.f32 %v3539_v21  ;;  %v2453_v21 = vrot.slane %v6111_v53, 6  ;;  %v6200_v53 = vld [vmem:[%s6855_s1 + $0x3e0] sm:$0xff] }
 0xac5   :  { %3726 = vpow2.f32 %v3540_v59 }
 0xacf   :  { %v3723_v17 = vpop.eup %3722 }
 0xad0   :  { %v2436_v9 = vadd.f32 1.0, %v3723_v17 }
 0xad1   :  { %v3725_v57 = vpop.eup %3724 }
 0xad2   :  { %3728 = vrcp.f32 %v2436_v9  ;;  %v2442_v40 = vadd.f32 1.0, %v3725_v57  ;;  %v3727_v13 = vpop.eup %3726  ;;  %v7318_v57 = vld [vmem:[#allocation41_spill] sm:$0xff] }
 0xad3   :  { %3730 = vtanh.f32 %v2431_v50  ;;  %v2449_v62 = vadd.f32 1.0, %v3727_v13  ;;  %v2648_v25 = vsel %vm834_vm0, %v7318_v57, %v6114_v44  ;;  %v6212_v44 = vld [vmem:[%s6855_s1 + $0x3c8] sm:$0xff]  ;;  %v6218_v13 = vld [vmem:[%s6855_s1 + $0x3d8] sm:$0xff] }
 0xad4   :  { %3732 = vrcp.f32 %v2442_v40  ;;  %v6206_v40 = vld [vmem:[%s6855_s1 + $0x3f0] sm:$0xff]  ;;  %v6355_v57 = vld [vmem:[%s6855_s1 + $0x398] sm:$0xff] }
 0xad5   :  { %3734 = vrcp.f32 %v2449_v62 }
 0xadf   :  { %v3729_v60 = vpop.eup %3728 }
 0xae0   :  { %v3731_v15 = vpop.eup %3730 }
 0xae1   :  { %v3733_v24 = vpop.eup %3732  ;;  %v2456_v54 = vmul.f32 %v3731_v15, %v3729_v60  ;;  %v6224_v60 = vld [vmem:[%s6855_s1 + $0x3c0] sm:$0xff]  ;;  %v6230_v15 = vld [vmem:[%s6855_s1 + $0x3d0] sm:$0xff] }
 0xae2   :  { %v2455_v19 = vmul.f32 %v3733_v24, %v2453_v21  ;;  %v3735_v61 = vpop.eup %3734  ;;  %v6236_v21 = vld [vmem:[%s6855_s1 + $0x3a8] sm:$0xff]  ;;  %v6242_v24 = vld [vmem:[%s6855_s1 + $0x3b8] sm:$0xff] }
 0xae4   :  { %v6188_v42 = vadd.f32 %v2456_v54, %v2455_v19 }
 0xae6   :  { %3736 = vtanh.f32 %v6188_v42 }
 0xaf3   :  { %v3737_v59 = vpop.eup %3736 }
 0xaf4   :  { %v2459_v9 = vmul.f32 %v3737_v59, %v3735_v61  ;;  %v6343_v59 = vld [vmem:[%s6855_s1 + $0x3b0] sm:$0xff] }
 0xaf6   :  { %v2461_v17 = vrot.slane %v2459_v9, 4  ;;  %v6195_v50 = vsel %vm836_vm1, %v2648_v25, %v2459_v9  ;;  %v6349_v9 = vld [vmem:[%s6855_s1 + $0x388] sm:$0xff]  ;;  %v6361_v25 = vld [vmem:[%s6855_s1 + $0x380] sm:$0xff] }
 0xaf8   :  { %2528 = vmatmul.mubr.f32.vlgmr.msra.gmra.mxu0 %v2461_v17  ;;  %2599 = vmatmul.mubr.f32.vlgmr.msra.gmra.mxu1 %v2461_v17  ;;  %v6367_v17 = vld [vmem:[%s6855_s1 + $0x390] sm:$0xff] }
 0xaf9   :  { %2662 = vmatpush1.msra.mxu0 %v6200_v53  ;;  %2733 = vmatpush1.msra.mxu1 %v6206_v40 }
 0xafa   :  { %2663 = vmatprep.subr.mxu0 %v6212_v44  ;;  %2734 = vmatprep.subr.mxu1 %v6218_v13 }
 0xafb   :  { %2664 = vmatpush1.msra.mxu0 %v6224_v60  ;;  %2735 = vmatpush1.msra.mxu1 %v6230_v15 }
 0xafc   :  { %2665 = vmatprep.subr.mxu0 %v6236_v21  ;;  %2736 = vmatprep.subr.mxu1 %v6242_v24 }
 0xafd   :  { %2666 = vmatpush1.msra.mxu0 %v5592_v56  ;;  %2737 = vmatpush1.msra.mxu1 %v5597_v1  ;;  %v7319_v56 = vld [vmem:[#allocation19_spill] sm:$0xff]  ;;  %v7320_v1 = vld [vmem:[#allocation13_spill] sm:$0xff] }
 0xafe   :  { %2667 = vmatprep.subr.mxu0 %v5604_v2  ;;  %2738 = vmatprep.subr.mxu1 %v5609_v3  ;;  %v7321_v2 = vld [vmem:[#allocation21_spill] sm:$0xff]  ;;  %v7322_v3 = vld [vmem:[#allocation14_spill] sm:$0xff] }
 0xaff   :  { %2668 = vmatpush1.msra.mxu0 %v5614_v5  ;;  %2739 = vmatpush1.msra.mxu1 %v5621_v6  ;;  %v7323_v5 = vld [vmem:[#allocation23_spill] sm:$0xff]  ;;  %v7324_v6 = vld [vmem:[#allocation30_spill] sm:$0xff] }
 0xb00   :  { %2669 = vmatprep.subr.mxu0 %v5626_v7  ;;  %2740 = vmatprep.subr.mxu1 %v5631_v8  ;;  %v7325_v7 = vld [vmem:[#allocation15_spill] sm:$0xff]  ;;  %v7326_v8 = vld [vmem:[#allocation24_spill] sm:$0xff] }
 0xb01   :  { %2670 = vmatpush1.msra.mxu0 %v5638_v10  ;;  %2741 = vmatpush1.msra.mxu1 %v5643_v11  ;;  %v7327_v10 = vld [vmem:[#allocation25_spill] sm:$0xff]  ;;  %v7328_v11 = vld [vmem:[#allocation31_spill] sm:$0xff] }
 0xb02   :  { %2671 = vmatprep.subr.mxu0 %v5648_v12  ;;  %2742 = vmatprep.subr.mxu1 %v5655_v14  ;;  %v7329_v12 = vld [vmem:[#allocation16_spill] sm:$0xff]  ;;  %v7330_v14 = vld [vmem:[#allocation26_spill] sm:$0xff] }
 0xb03   :  { %2672 = vmatpush1.msra.mxu0 %v5660_v16  ;;  %2743 = vmatpush1.msra.mxu1 %v5665_v18  ;;  %v7331_v16 = vmov 0.0   ;;  %v7332_v18 = vld [vmem:[#allocation27_spill] sm:$0xff] }
 0xb04   :  { %2673 = vmatprep.subr.mxu0 %v5672_v22  ;;  %2744 = vmatprep.subr.mxu1 %v5677_v27  ;;  %v6304_v22 = vld [vmem:[%s6855_s1 + $0x3e8] sm:$0xff]  ;;  %v6310_v27 = vld [vmem:[%s6855_s1 + $0x3f8] sm:$0xff] }
 0xb05   :  { %2674 = vmatpush1.msra.mxu0 %v5684_v28  ;;  %2745 = vmatpush1.msra.mxu1 %v5689_v29  ;;  %7333 = vst [vmem:[#allocation39_spill] sm:$0xff] %v6304_v22  ;;  %7334 = vst [vmem:[#allocation28_spill] sm:$0xff] %v6310_v27 }
 0xb06   :  { %2675 = vmatprep.subr.mxu0 %v5696_v30  ;;  %2746 = vmatprep.subr.mxu1 %v5701_v31 }
 0xb07   :  { %2676 = vmatpush1.msra.mxu0 %v5708_v32  ;;  %2747 = vmatpush1.msra.mxu1 %v5713_v33 }
 0xb08   :  { %2677 = vmatprep.subr.mxu0 %v5720_v34  ;;  %2748 = vmatprep.subr.mxu1 %v5725_v35 }
 0xb09   :  { %2678 = vmatpush1.msra.mxu0 %v5732_v36  ;;  %2749 = vmatpush1.msra.mxu1 %v5737_v37 }
 0xb0a   :  { %2679 = vmatprep.subr.mxu0 %v5744_v38  ;;  %2750 = vmatprep.subr.mxu1 %v5749_v39 }
 0xb0b   :  { %2680 = vmatpush1.msra.mxu0 %v5756_v41  ;;  %2751 = vmatpush1.msra.mxu1 %v5761_v43 }
 0xb0c   :  { %2681 = vmatprep.subr.mxu0 %v5768_v45  ;;  %2752 = vmatprep.subr.mxu1 %v5773_v47 }
 0xb0d   :  { %2682 = vmatpush1.msra.mxu0 %v5780_v51  ;;  %2753 = vmatpush1.msra.mxu1 %v5785_v0 }
 0xb0e   :  { %2683 = vmatprep.subr.mxu0 %v7295_v20  ;;  %2754 = vmatprep.subr.mxu1 %v7296_v58 }
 0xb0f   :  { %2684 = vmatpush1.msra.mxu0 %v7297_v63  ;;  %2755 = vmatpush1.msra.mxu1 %v7298_v46  ;;  %v2641_v63 = vrot.slane %v6188_v42, 6  ;;  %v6337_v42 = vld [vmem:[%s6855_s1 + $0x3a0] sm:$0xff] }
 0xb10   :  { %2685 = vmatprep.subr.mxu0 %v7299_v52  ;;  %2756 = vmatprep.subr.mxu1 %v7300_v49 }
 0xb11   :  { %2686 = vmatpush1.msra.mxu0 %v7301_v48  ;;  %2757 = vmatpush1.msra.mxu1 %v7319_v56  ;;  %v6379_v56 = vld [vmem:[%s6855_s1 + $0x378] sm:$0xff] }
 0xb12   :  { %2687 = vmatprep.subr.mxu0 %v7320_v1  ;;  %2758 = vmatprep.subr.mxu1 %v7321_v2  ;;  %v6385_v1 = vld [vmem:[%s6855_s1 + $0x360] sm:$0xff]  ;;  %v6391_v2 = vld [vmem:[%s6855_s1 + $0x370] sm:$0xff] }
 0xb13   :  { %2688 = vmatpush1.msra.mxu0 %v7322_v3  ;;  %2759 = vmatpush1.msra.mxu1 %v7323_v5  ;;  %v6397_v3 = vld [vmem:[%s6855_s1 + $0x348] sm:$0xff]  ;;  %v6403_v5 = vld [vmem:[%s6855_s1 + $0x358] sm:$0xff] }
 0xb14   :  { %2689 = vmatprep.subr.mxu0 %v7324_v6  ;;  %2760 = vmatprep.subr.mxu1 %v7325_v7  ;;  %v6409_v6 = vld [vmem:[%s6855_s1 + $0x340] sm:$0xff]  ;;  %v6415_v7 = vld [vmem:[%s6855_s1 + $0x350] sm:$0xff] }
 0xb15   :  { %2690 = vmatpush1.msra.mxu0 %v7326_v8  ;;  %2761 = vmatpush1.msra.mxu1 %v7327_v10  ;;  %v6421_v8 = vld [vmem:[%s6855_s1 + $0x328] sm:$0xff]  ;;  %v6427_v10 = vld [vmem:[%s6855_s1 + $0x338] sm:$0xff] }
 0xb16   :  { %2691 = vmatprep.subr.mxu0 %v7328_v11  ;;  %2762 = vmatprep.subr.mxu1 %v7329_v12  ;;  %v6433_v11 = vld [vmem:[%s6855_s1 + $0x320] sm:$0xff]  ;;  %v6439_v12 = vld [vmem:[%s6855_s1 + $0x330] sm:$0xff] }
 0xb17   :  { %2692 = vmatpush1.msra.mxu0 %v7330_v14  ;;  %2725 = vmatprep.mubr.f32.mxu0 %v7331_v16  ;;  %v6445_v14 = vld [vmem:[%s6855_s1 + $0x308] sm:$0xff] }
 0xb18   :  { %2763 = vmatpush1.msra.mxu1 %v7332_v18  ;;  %2796 = vmatprep.mubr.f32.mxu1 %v7331_v16  ;;  %v6451_v18 = vld [vmem:[%s6855_s1 + $0x318] sm:$0xff] }
 0xb19   :  { %2834 = vmatprep.subr.mxu0 %v6304_v22  ;;  %2905 = vmatprep.subr.mxu1 %v6310_v27 }
 0xbb8   :  { %v2529_v28 = vpop.f32.mrf.mxu0  ;;  %v2600_v32 = vpop.f32.mrf.mxu1 }
 0xbb9   :  { %v2609_v29 = vrot.slane %v2529_v28, 2  ;;  %v2611_v41 = vrot.slane %v2600_v32, 2  ;;  %v6457_v28 = vld [vmem:[%s6855_s1 + $0x300] sm:$0xff] }
 0xbba   :  { %v2531_v30 = vpop.f32.mrf.mxu0  ;;  %v2602_v37 = vpop.f32.mrf.mxu1  ;;  %v6481_v32 = vld [vmem:[%s6855_s1 + $0x2e0] sm:$0xff] }
 0xbbb   :  { %v2617_v31 = vadd.f32 %v2609_v29, %v6012_v26  ;;  %v2610_v33 = vrot.slane %v2531_v30, 2  ;;  %v2612_v38 = vrot.slane %v2602_v37, 2  ;;  %v2619_v47 = vadd.f32 %v2611_v41, %v6030_v23  ;;  %v6463_v29 = vld [vmem:[%s6855_s1 + $0x310] sm:$0xff]  ;;  %v6469_v30 = vld [vmem:[%s6855_s1 + $0x2e8] sm:$0xff]  ;;  %v6529_v41 = vld [vmem:[%s6855_s1 + $0x2a0] sm:$0xff] }
 0xbbc   :  { %v6511_v37 = vld [vmem:[%s6855_s1 + $0x2d0] sm:$0xff] }
 0xbbd   :  { %v3541_v34 = vmul.f32 -1.442695, %v2617_v31  ;;  %v2618_v35 = vadd.f32 %v2610_v33, %v6015_v4  ;;  %v2620_v39 = vadd.f32 %v2612_v38, %v7294_v55  ;;  %v6475_v31 = vld [vmem:[%s6855_s1 + $0x2f8] sm:$0xff]  ;;  %v6487_v33 = vld [vmem:[%s6855_s1 + $0x2f0] sm:$0xff]  ;;  %v6517_v38 = vld [vmem:[%s6855_s1 + $0x2a8] sm:$0xff] }
 0xbbf   :  { %3738 = vpow2.f32 %v3541_v34  ;;  %v3542_v36 = vmul.f32 -1.442695, %v2618_v35  ;;  %v3543_v43 = vmul.f32 -1.442695, %v2620_v39  ;;  %v6493_v34 = vld [vmem:[%s6855_s1 + $0x2c8] sm:$0xff]  ;;  %v6499_v35 = vld [vmem:[%s6855_s1 + $0x2d8] sm:$0xff] }
 0xbc0   :  { %v6523_v39 = vld [vmem:[%s6855_s1 + $0x2b8] sm:$0xff] }
 0xbc1   :  { %3740 = vpow2.f32 %v3542_v36  ;;  %v6505_v36 = vld [vmem:[%s6855_s1 + $0x2c0] sm:$0xff] }
 0xbc2   :  { %3742 = vpow2.f32 %v3543_v43  ;;  %v6535_v43 = vld [vmem:[%s6855_s1 + $0x2b0] sm:$0xff] }
 0xbcc   :  { %v3739_v45 = vpop.eup %3738 }
 0xbcd   :  { %v2624_v51 = vadd.f32 1.0, %v3739_v45  ;;  %v6541_v45 = vld [vmem:[%s6855_s1 + $0x288] sm:$0xff] }
 0xbce   :  { %v3741_v0 = vpop.eup %3740  ;;  %7335 = vst [vmem:[#allocation20_spill] sm:$0xff] %v6541_v45 }
 0xbcf   :  { %3744 = vrcp.f32 %v2624_v51  ;;  %v2630_v26 = vadd.f32 1.0, %v3741_v0  ;;  %v3743_v4 = vpop.eup %3742  ;;  %v6553_v51 = vld [vmem:[%s6855_s1 + $0x280] sm:$0xff]  ;;  %v6559_v0 = vld [vmem:[%s6855_s1 + $0x290] sm:$0xff] }
 0xbd0   :  { %3746 = vtanh.f32 %v2619_v47  ;;  %v2637_v52 = vadd.f32 1.0, %v3743_v4  ;;  %v6547_v47 = vld [vmem:[%s6855_s1 + $0x298] sm:$0xff]  ;;  %7337 = vst [vmem:[#allocation11_spill] sm:$0xff] %v6553_v51  ;;  %7338 = vst [vmem:[#allocation35_spill] sm:$0xff] %v6559_v0 }
 0xbd1   :  { %3748 = vrcp.f32 %v2630_v26  ;;  %7336 = vst [vmem:[#allocation29_spill] sm:$0xff] %v6547_v47  ;;  %v6565_v26 = vld [vmem:[%s6855_s1 + $0x268] sm:$0xff]  ;;  %v6571_v4 = vld [vmem:[%s6855_s1 + $0x278] sm:$0xff] }
 0xbd2   :  { %3750 = vrcp.f32 %v2637_v52  ;;  %7339 = vst [vmem:[#allocation17_spill] sm:$0xff] %v6565_v26  ;;  %7340 = vst [vmem:[#allocation12_spill] sm:$0xff] %v6571_v4  ;;  %v6601_v52 = vld [vmem:[%s6855_s1 + $0x240] sm:$0xff] }
 0xbd3   :  { %7345 = vst [vmem:[#allocation13_spill] sm:$0xff] %v6601_v52 }
 0xbdc   :  { %v3745_v20 = vpop.eup %3744 }
 0xbdd   :  { %v3747_v58 = vpop.eup %3746 }
 0xbde   :  { %v3749_v46 = vpop.eup %3748  ;;  %v2644_v55 = vmul.f32 %v3747_v58, %v3745_v20  ;;  %v6577_v20 = vld [vmem:[%s6855_s1 + $0x260] sm:$0xff]  ;;  %v6583_v58 = vld [vmem:[%s6855_s1 + $0x270] sm:$0xff] }
 0xbdf   :  { %v2643_v49 = vmul.f32 %v3749_v46, %v2641_v63  ;;  %v3751_v23 = vpop.eup %3750  ;;  %7341 = vst [vmem:[#allocation33_spill] sm:$0xff] %v6577_v20  ;;  %7342 = vst [vmem:[#allocation34_spill] sm:$0xff] %v6583_v58  ;;  %v6589_v63 = vld [vmem:[%s6855_s1 + $0x248] sm:$0xff]  ;;  %v6595_v46 = vld [vmem:[%s6855_s1 + $0x258] sm:$0xff] }
 0xbe0   :  { %7343 = vst [vmem:[#allocation41_spill] sm:$0xff] %v6589_v63  ;;  %7344 = vst [vmem:[#allocation19_spill] sm:$0xff] %v6595_v46 }
 0xbe1   :  { %v6318_v48 = vadd.f32 %v2644_v55, %v2643_v49  ;;  %v6607_v55 = vld [vmem:[%s6855_s1 + $0x250] sm:$0xff]  ;;  %v6613_v49 = vld [vmem:[%s6855_s1 + $0x228] sm:$0xff] }
 0xbe2   :  { %7346 = vst [vmem:[#allocation21_spill] sm:$0xff] %v6607_v55  ;;  %7347 = vst [vmem:[#allocation14_spill] sm:$0xff] %v6613_v49 }
 0xbe3   :  { %3752 = vtanh.f32 %v6318_v48 }
 0xbf0   :  { %v3753_v62 = vpop.eup %3752 }
 0xbf1   :  { %v2647_v54 = vmul.f32 %v3753_v62, %v3751_v23  ;;  %v6619_v23 = vld [vmem:[%s6855_s1 + $0x238] sm:$0xff]  ;;  %v6625_v62 = vld [vmem:[%s6855_s1 + $0x220] sm:$0xff] }
 0xbf2   :  { %7348 = vst [vmem:[#allocation23_spill] sm:$0xff] %v6619_v23  ;;  %7349 = vst [vmem:[#allocation30_spill] sm:$0xff] %v6625_v62 }
 0xbf3   :  { %v2650_v19 = vsel %vm838_vm2, %v6195_v50, %v2647_v54  ;;  %v2659_v61 = vrot.slane %v2647_v54, 6  ;;  %v6373_v50 = vld [vmem:[%s6855_s1 + $0x368] sm:$0xff]  ;;  %v6631_v54 = vld [vmem:[%s6855_s1 + $0x230] sm:$0xff] }
 0xbf4   :  { %2651 = vst [vmem:[%s6858_s4] sm:$0xff] %v2650_v19  ;;  %7350 = vst [vmem:[#allocation15_spill] sm:$0xff] %v6631_v54  ;;  %v6637_v19 = vld [vmem:[%s6855_s1 + $0x208] sm:$0xff] }
 0xbf5   :  { %2726 = vmatmul.mubr.f32.vlgmr.msra.gmra.mxu0 %v2659_v61  ;;  %2797 = vmatmul.mubr.f32.vlgmr.msra.gmra.mxu1 %v2659_v61  ;;  %7351 = vst [vmem:[#allocation24_spill] sm:$0xff] %v6637_v19  ;;  %v6643_v61 = vld [vmem:[%s6855_s1 + $0x218] sm:$0xff] }
 0xbf6   :  { %2835 = vmatpush1.msra.mxu0 %v6200_v53  ;;  %2906 = vmatpush1.msra.mxu1 %v6206_v40  ;;  %7352 = vst [vmem:[#allocation25_spill] sm:$0xff] %v6643_v61 }
 0xbf7   :  { %2836 = vmatprep.subr.mxu0 %v6212_v44  ;;  %2907 = vmatprep.subr.mxu1 %v6218_v13 }
 0xbf8   :  { %2837 = vmatpush1.msra.mxu0 %v6224_v60  ;;  %2908 = vmatpush1.msra.mxu1 %v6230_v15 }
 0xbf9   :  { %2838 = vmatprep.subr.mxu0 %v6236_v21  ;;  %2909 = vmatprep.subr.mxu1 %v6242_v24 }
 0xbfa   :  { %2839 = vmatpush1.msra.mxu0 %v6337_v42  ;;  %2910 = vmatpush1.msra.mxu1 %v6343_v59 }
 0xbfb   :  { %2840 = vmatprep.subr.mxu0 %v6349_v9  ;;  %2911 = vmatprep.subr.mxu1 %v6355_v57 }
 0xbfc   :  { %2841 = vmatpush1.msra.mxu0 %v6361_v25  ;;  %2912 = vmatpush1.msra.mxu1 %v6367_v17 }
 0xbfd   :  { %2842 = vmatprep.subr.mxu0 %v6373_v50  ;;  %2913 = vmatprep.subr.mxu1 %v6379_v56 }
 0xbfe   :  { %2843 = vmatpush1.msra.mxu0 %v6385_v1  ;;  %2914 = vmatpush1.msra.mxu1 %v6391_v2 }
 0xbff   :  { %2844 = vmatprep.subr.mxu0 %v6397_v3  ;;  %2915 = vmatprep.subr.mxu1 %v6403_v5 }
 0xc00   :  { %2845 = vmatpush1.msra.mxu0 %v6409_v6  ;;  %2916 = vmatpush1.msra.mxu1 %v6415_v7 }
 0xc01   :  { %2846 = vmatprep.subr.mxu0 %v6421_v8  ;;  %2917 = vmatprep.subr.mxu1 %v6427_v10 }
 0xc02   :  { %2847 = vmatpush1.msra.mxu0 %v6433_v11  ;;  %2918 = vmatpush1.msra.mxu1 %v6439_v12 }
 0xc03   :  { %2848 = vmatprep.subr.mxu0 %v6445_v14  ;;  %2919 = vmatprep.subr.mxu1 %v6451_v18 }
 0xc04   :  { %2849 = vmatpush1.msra.mxu0 %v6457_v28  ;;  %2920 = vmatpush1.msra.mxu1 %v6463_v29 }
 0xc05   :  { %2850 = vmatprep.subr.mxu0 %v6469_v30  ;;  %2921 = vmatprep.subr.mxu1 %v6475_v31 }
 0xc06   :  { %2851 = vmatpush1.msra.mxu0 %v6481_v32  ;;  %2922 = vmatpush1.msra.mxu1 %v6487_v33 }
 0xc07   :  { %2852 = vmatprep.subr.mxu0 %v6493_v34  ;;  %2923 = vmatprep.subr.mxu1 %v6499_v35 }
 0xc08   :  { %2853 = vmatpush1.msra.mxu0 %v6505_v36  ;;  %2924 = vmatpush1.msra.mxu1 %v6511_v37 }
 0xc09   :  { %2854 = vmatprep.subr.mxu0 %v6517_v38  ;;  %2925 = vmatprep.subr.mxu1 %v6523_v39 }
 0xc0a   :  { %2855 = vmatpush1.msra.mxu0 %v6529_v41  ;;  %2926 = vmatpush1.msra.mxu1 %v6535_v43 }
 0xc0b   :  { %2856 = vmatprep.subr.mxu0 %v6541_v45  ;;  %2927 = vmatprep.subr.mxu1 %v6547_v47 }
 0xc0c   :  { %2857 = vmatpush1.msra.mxu0 %v6553_v51  ;;  %2928 = vmatpush1.msra.mxu1 %v6559_v0 }
 0xc0d   :  { %2858 = vmatprep.subr.mxu0 %v6565_v26  ;;  %2929 = vmatprep.subr.mxu1 %v6571_v4  ;;  %v7362_v4 = vld [vmem:[#allocation37_spill] sm:$0xff]  ;;  %v7364_v26 = vld [vmem:[#allocation40_spill] sm:$0xff] }
 0xc0e   :  { %2859 = vmatpush1.msra.mxu0 %v6577_v20  ;;  %2930 = vmatpush1.msra.mxu1 %v6583_v58  ;;  %v7361_v20 = vld [vmem:[#allocation38_spill] sm:$0xff] }
 0xc0f   :  { %2860 = vmatprep.subr.mxu0 %v6589_v63  ;;  %2931 = vmatprep.subr.mxu1 %v6595_v46 }
 0xc10   :  { %2861 = vmatpush1.msra.mxu0 %v6601_v52  ;;  %2932 = vmatpush1.msra.mxu1 %v6607_v55  ;;  %v7359_v55 = vld [vmem:[#allocation10_spill] sm:$0xff] }
 0xc11   :  { %2862 = vmatprep.subr.mxu0 %v6613_v49  ;;  %2933 = vmatprep.subr.mxu1 %v6619_v23  ;;  %v7358_v49 = vld [vmem:[#allocation36_spill] sm:$0xff] }
 0xc12   :  { %2863 = vmatpush1.msra.mxu0 %v6625_v62  ;;  %2934 = vmatpush1.msra.mxu1 %v6631_v54  ;;  %v6649_v62 = vld [vmem:[%s6855_s1 + $0x200] sm:$0xff]  ;;  %v7356_v54 = vld [vmem:[#allocation18_spill] sm:$0xff]  ;;  %v6668_v52 = vadd.f32 %v7359_v55, %v7358_v49 }
 0xc13   :  { %2864 = vmatprep.subr.mxu0 %v6637_v19  ;;  %2935 = vmatprep.subr.mxu1 %v6643_v61  ;;  %7353 = vst [vmem:[#allocation31_spill] sm:$0xff] %v6649_v62  ;;  %v6656_v19 = vld [vmem:[%s6855_s1 + $0x210] sm:$0xff]  ;;  %v7355_v61 = vld [vmem:[#allocation32_spill] sm:$0xff]  ;;  %v7365_v55 = vld [vmem:[#allocation22_spill] sm:$0xff]  ;;  %s3995_s1 = smov [#allocation6]  }
 0xc14   :  { %2865 = vmatpush1.msra.mxu0 %v6649_v62  ;;  %2898 = vmatprep.mubr.f32.mxu0 %v7331_v16  ;;  %7354 = vst [vmem:[#allocation16_spill] sm:$0xff] %v6656_v19  ;;  %v6664_v23 = vadd.f32 %v7356_v54, %v7355_v61  ;;  %7360 = vst [vmem:[#allocation27_spill] sm:$0xff] %v6668_v52  ;;  %v6674_v54 = vadd.f32 %v7362_v4, %v7361_v20  ;;  %s3421_s20 = sshll.u32 %s3995_s1, 4  ;;  %s3422_s20 = int_to_ptr.vmem [resolvable:$true] %s3421_s20 }
 0xc15   :  { %2936 = vmatpush1.msra.mxu1 %v6656_v19  ;;  %2969 = vmatprep.mubr.f32.mxu1 %v7331_v16  ;;  %v6679_v49 = vadd.f32 %v7365_v55, %v7364_v26  ;;  %s3950_s21 = scalar_lea.vmem %s3422_s20, 64  ;;  %p3955_p1 = scmp.lt.s32.totalorder %s3422_s20, %s3422_s20 }
 0xc16   :  { %3022 = vmatprep.subr.mxu0 %v6304_v22  ;;  %3093 = vmatprep.subr.mxu1 %v6310_v27  ;;  %7357 = vst [vmem:[#allocation26_spill] sm:$0xff] %v6664_v23  ;;  %7363 = vst [vmem:[#allocation32_spill] sm:$0xff] %v6674_v54  ;;  %p3951_p0 = scmp.ne.s32.totalorder %s3422_s20, %s3950_s21  ;;  %p3956_p2 = scmp.lt.s32.totalorder %s3950_s21, %s3950_s21 }
 0xc18   :  { %p3957_p3 = por %p3956_p2, %p3955_p1 }
 0xc1a   :  { %p3958_p4 = pnand %p3957_p3, %p3951_p0 }
 0xcb5   :  { %v2727_v62 = vpop.f32.mrf.mxu0  ;;  %v2798_v16 = vpop.f32.mrf.mxu1 }
 0xcb6   :  { %v2803_v46 = vadd.f32 %v2727_v62, %v6664_v23 }
 0xcb7   :  { %v2729_v63 = vpop.f32.mrf.mxu0  ;;  %v2800_v27 = vpop.f32.mrf.mxu1 }
 0xcb8   :  { %v3544_v58 = vmul.f32 -1.442695, %v2803_v46  ;;  %v2804_v19 = vadd.f32 %v2729_v63, %v6668_v52  ;;  %v2806_v61 = vadd.f32 %v2800_v27, %v6674_v54  ;;  %v2805_v46 = vadd.f32 %v2798_v16, %v6679_v49 }
 0xcb9   :  { %v2827_v27 = vrot.slane %v6318_v48, 6  ;;  %v7367_v48 = vld [vmem:[#allocation17_spill] sm:$0xff] }
 0xcba   :  { %3754 = vpow2.f32 %v3544_v58  ;;  %v3545_v22 = vmul.f32 -1.442695, %v2804_v19  ;;  %v3546_v62 = vmul.f32 -1.442695, %v2806_v61 }
 0xcbc   :  { %3756 = vpow2.f32 %v3545_v22 }
 0xcbd   :  { %3758 = vpow2.f32 %v3546_v62 }
 0xcc7   :  { %v3755_v23 = vpop.eup %3754 }
 0xcc8   :  { %v2810_v63 = vadd.f32 1.0, %v3755_v23 }
 0xcc9   :  { %v3757_v58 = vpop.eup %3756 }
 0xcca   :  { %3760 = vrcp.f32 %v2810_v63  ;;  %v2816_v22 = vadd.f32 1.0, %v3757_v58  ;;  %v3759_v19 = vpop.eup %3758  ;;  %v7371_v63 = vld [vmem:[#allocation41_spill] sm:$0xff]  ;;  %v7372_v58 = vld [vmem:[#allocation19_spill] sm:$0xff] }
 0xccb   :  { %3762 = vtanh.f32 %v2805_v46  ;;  %v2823_v52 = vadd.f32 1.0, %v3759_v19  ;;  %v7370_v46 = vld [vmem:[#allocation34_spill] sm:$0xff]  ;;  %v7374_v19 = vld [vmem:[#allocation21_spill] sm:$0xff] }
 0xccc   :  { %3764 = vrcp.f32 %v2816_v22  ;;  %v7373_v22 = vld [vmem:[#allocation13_spill] sm:$0xff] }
 0xccd   :  { %3766 = vrcp.f32 %v2823_v52  ;;  %v7368_v52 = vld [vmem:[#allocation12_spill] sm:$0xff] }
 0xcd7   :  { %v3761_v4 = vpop.eup %3760 }
 0xcd8   :  { %v3763_v20 = vpop.eup %3762 }
 0xcd9   :  { %v3765_v54 = vpop.eup %3764  ;;  %v2830_v26 = vmul.f32 %v3763_v20, %v3761_v4  ;;  %v7375_v4 = vld [vmem:[#allocation14_spill] sm:$0xff]  ;;  %v7376_v20 = vld [vmem:[#allocation23_spill] sm:$0xff] }
 0xcda   :  { %v2829_v55 = vmul.f32 %v3765_v54, %v2827_v27  ;;  %v3767_v16 = vpop.eup %3766  ;;  %v7369_v54 = vld [vmem:[#allocation33_spill] sm:$0xff]  ;;  %v7377_v27 = vld [vmem:[#allocation30_spill] sm:$0xff] }
 0xcdc   :  { %v6683_v61 = vadd.f32 %v2830_v26, %v2829_v55  ;;  %v7378_v26 = vld [vmem:[#allocation15_spill] sm:$0xff]  ;;  %v7379_v55 = vld [vmem:[#allocation24_spill] sm:$0xff] }
 0xcde   :  { %3768 = vtanh.f32 %v6683_v61 }
 0xceb   :  { %v3769_v23 = vpop.eup %3768 }
 0xcec   :  { %v6686_v62 = vmul.f32 %v3769_v23, %v3767_v16  ;;  %v7380_v16 = vld [vmem:[#allocation25_spill] sm:$0xff]  ;;  %v7381_v23 = vld [vmem:[#allocation31_spill] sm:$0xff] }
 0xcee   :  { %7366 = vst [vmem:[#allocation18_spill] sm:$0xff] %v6686_v62  ;;  %2899 = vmatmul.mubr.f32.vlgmr.msra.gmra.mxu0 %v6686_v62  ;;  %2970 = vmatmul.mubr.f32.vlgmr.msra.gmra.mxu1 %v6686_v62  ;;  %v7382_v62 = vmov 0.0  }
 0xcef   :  { %3023 = vmatpush1.msra.mxu0 %v6200_v53  ;;  %3094 = vmatpush1.msra.mxu1 %v6206_v40 }
 0xcf0   :  { %3024 = vmatprep.subr.mxu0 %v6212_v44  ;;  %3095 = vmatprep.subr.mxu1 %v6218_v13 }
 0xcf1   :  { %3025 = vmatpush1.msra.mxu0 %v6224_v60  ;;  %3096 = vmatpush1.msra.mxu1 %v6230_v15 }
 0xcf2   :  { %3026 = vmatprep.subr.mxu0 %v6236_v21  ;;  %3097 = vmatprep.subr.mxu1 %v6242_v24 }
 0xcf3   :  { %3027 = vmatpush1.msra.mxu0 %v6337_v42  ;;  %3098 = vmatpush1.msra.mxu1 %v6343_v59 }
 0xcf4   :  { %3028 = vmatprep.subr.mxu0 %v6349_v9  ;;  %3099 = vmatprep.subr.mxu1 %v6355_v57 }
 0xcf5   :  { %3029 = vmatpush1.msra.mxu0 %v6361_v25  ;;  %3100 = vmatpush1.msra.mxu1 %v6367_v17 }
 0xcf6   :  { %3030 = vmatprep.subr.mxu0 %v6373_v50  ;;  %3101 = vmatprep.subr.mxu1 %v6379_v56 }
 0xcf7   :  { %3031 = vmatpush1.msra.mxu0 %v6385_v1  ;;  %3102 = vmatpush1.msra.mxu1 %v6391_v2 }
 0xcf8   :  { %3032 = vmatprep.subr.mxu0 %v6397_v3  ;;  %3103 = vmatprep.subr.mxu1 %v6403_v5 }
 0xcf9   :  { %3033 = vmatpush1.msra.mxu0 %v6409_v6  ;;  %3104 = vmatpush1.msra.mxu1 %v6415_v7 }
 0xcfa   :  { %3034 = vmatprep.subr.mxu0 %v6421_v8  ;;  %3105 = vmatprep.subr.mxu1 %v6427_v10 }
 0xcfb   :  { %3035 = vmatpush1.msra.mxu0 %v6433_v11  ;;  %3106 = vmatpush1.msra.mxu1 %v6439_v12 }
 0xcfc   :  { %3036 = vmatprep.subr.mxu0 %v6445_v14  ;;  %3107 = vmatprep.subr.mxu1 %v6451_v18 }
 0xcfd   :  { %3037 = vmatpush1.msra.mxu0 %v6457_v28  ;;  %3108 = vmatpush1.msra.mxu1 %v6463_v29 }
 0xcfe   :  { %3038 = vmatprep.subr.mxu0 %v6469_v30  ;;  %3109 = vmatprep.subr.mxu1 %v6475_v31 }
 0xcff   :  { %3039 = vmatpush1.msra.mxu0 %v6481_v32  ;;  %3110 = vmatpush1.msra.mxu1 %v6487_v33 }
 0xd00   :  { %3040 = vmatprep.subr.mxu0 %v6493_v34  ;;  %3111 = vmatprep.subr.mxu1 %v6499_v35 }
 0xd01   :  { %3041 = vmatpush1.msra.mxu0 %v6505_v36  ;;  %3112 = vmatpush1.msra.mxu1 %v6511_v37 }
 0xd02   :  { %3042 = vmatprep.subr.mxu0 %v6517_v38  ;;  %3113 = vmatprep.subr.mxu1 %v6523_v39 }
 0xd03   :  { %3043 = vmatpush1.msra.mxu0 %v6529_v41  ;;  %3114 = vmatpush1.msra.mxu1 %v6535_v43 }
 0xd04   :  { %3044 = vmatprep.subr.mxu0 %v6541_v45  ;;  %3115 = vmatprep.subr.mxu1 %v6547_v47 }
 0xd05   :  { %3045 = vmatpush1.msra.mxu0 %v6553_v51  ;;  %3116 = vmatpush1.msra.mxu1 %v6559_v0 }
 0xd06   :  { %3046 = vmatprep.subr.mxu0 %v7367_v48  ;;  %3117 = vmatprep.subr.mxu1 %v7368_v52 }
 0xd07   :  { %3047 = vmatpush1.msra.mxu0 %v7369_v54  ;;  %3118 = vmatpush1.msra.mxu1 %v7370_v46  ;;  %v7387_v54 = vld [vmem:[#allocation27_spill] sm:$0xff] }
 0xd08   :  { %3048 = vmatprep.subr.mxu0 %v7371_v63  ;;  %3119 = vmatprep.subr.mxu1 %v7372_v58  ;;  %v7383_v58 = vld [vmem:[#allocation16_spill] sm:$0xff] }
 0xd09   :  { %3049 = vmatpush1.msra.mxu0 %v7373_v22  ;;  %3120 = vmatpush1.msra.mxu1 %v7374_v19  ;;  %v7384_v19 = vld [vmem:[#allocation39_spill] sm:$0xff] }
 0xd0a   :  { %3050 = vmatprep.subr.mxu0 %v7375_v4  ;;  %3121 = vmatprep.subr.mxu1 %v7376_v20  ;;  %v7385_v4 = vld [vmem:[#allocation28_spill] sm:$0xff] }
 0xd0b   :  { %3051 = vmatpush1.msra.mxu0 %v7377_v27  ;;  %3122 = vmatpush1.msra.mxu1 %v7378_v26  ;;  %v7386_v26 = vld [vmem:[#allocation26_spill] sm:$0xff] }
 0xd0c   :  { %3052 = vmatprep.subr.mxu0 %v7379_v55  ;;  %3123 = vmatprep.subr.mxu1 %v7380_v16 }
 0xd0d   :  { %3053 = vmatpush1.msra.mxu0 %v7381_v23  ;;  %3086 = vmatprep.mubr.f32.mxu0 %v7382_v62 }
 0xd0e   :  { %3124 = vmatpush1.msra.mxu1 %v7383_v58  ;;  %3157 = vmatprep.mubr.f32.mxu1 %v7382_v62  ;;  %v7388_v62 = vld [vmem:[#allocation32_spill] sm:$0xff] }
 0xd0f   :  { %3210 = vmatprep.subr.mxu0 %v7384_v19  ;;  %3281 = vmatprep.subr.mxu1 %v7385_v4 }
 0xdae   :  { %v2900_v20 = vpop.f32.mrf.mxu0  ;;  %v2971_v55 = vpop.f32.mrf.mxu1 }
 0xdaf   :  { %v2980_v27 = vrot.slane %v2900_v20, 6  ;;  %v2982_v19 = vrot.slane %v2971_v55, 6 }
 0xdb0   :  { %v2902_v22 = vpop.f32.mrf.mxu0  ;;  %v2973_v48 = vpop.f32.mrf.mxu1 }
 0xdb1   :  { %v2988_v63 = vadd.f32 %v2980_v27, %v7386_v26  ;;  %v2981_v46 = vrot.slane %v2902_v22, 6  ;;  %v2983_v58 = vrot.slane %v2973_v48, 6  ;;  %v2990_v20 = vadd.f32 %v2982_v19, %v6679_v49 }
 0xdb3   :  { %v3547_v16 = vmul.f32 -1.442695, %v2988_v63  ;;  %v2989_v23 = vadd.f32 %v2981_v46, %v7387_v54  ;;  %v2991_v0 = vadd.f32 %v2983_v58, %v7388_v62 }
 0xdb5   :  { %3770 = vpow2.f32 %v3547_v16  ;;  %v3548_v52 = vmul.f32 -1.442695, %v2989_v23  ;;  %v3549_v51 = vmul.f32 -1.442695, %v2991_v0 }
 0xdb7   :  { %3772 = vpow2.f32 %v3548_v52  ;;  %v3012_v52 = vrot.slane %v6683_v61, 6 }
 0xdb8   :  { %3774 = vpow2.f32 %v3549_v51 }
 0xdc2   :  { %v3771_v4 = vpop.eup %3770 }
 0xdc3   :  { %v2995_v47 = vadd.f32 1.0, %v3771_v4 }
 0xdc4   :  { %v3773_v45 = vpop.eup %3772 }
 0xdc5   :  { %3776 = vrcp.f32 %v2995_v47  ;;  %v3001_v22 = vadd.f32 1.0, %v3773_v45  ;;  %v3775_v46 = vpop.eup %3774 }
 0xdc6   :  { %3778 = vtanh.f32 %v2990_v20  ;;  %v3008_v16 = vadd.f32 1.0, %v3775_v46 }
 0xdc7   :  { %3780 = vrcp.f32 %v3001_v22 }
 0xdc8   :  { %3782 = vrcp.f32 %v3008_v16  ;;  %v7410_v16 = vld [vmem:[#allocation18_spill] sm:$0xff] }
 0xdd2   :  { %v3777_v63 = vpop.eup %3776 }
 0xdd3   :  { %v3779_v27 = vpop.eup %3778 }
 0xdd4   :  { %v3781_v48 = vpop.eup %3780  ;;  %v3015_v58 = vmul.f32 %v3779_v27, %v3777_v63 }
 0xdd5   :  { %v3014_v55 = vmul.f32 %v3781_v48, %v3012_v52  ;;  %v3783_v23 = vpop.eup %3782 }
 0xdd7   :  { %v6761_v0 = vadd.f32 %v3015_v58, %v3014_v55 }
 0xdd9   :  { %3784 = vtanh.f32 %v6761_v0  ;;  %v3200_v19 = vrot.slane %v6761_v0, 6 }
 0xde6   :  { %v3785_v51 = vpop.eup %3784 }
 0xde7   :  { %v6764_v47 = vmul.f32 %v3785_v51, %v3783_v23 }
 0xde9   :  { %v3020_v45 = vrot.slane %v6764_v47, 2  ;;  %v3395_v58 = vsel %vm834_vm0, %v7410_v16, %v6764_v47 }
 0xdeb   :  { %3087 = vmatmul.mubr.f32.vlgmr.msra.gmra.mxu0 %v3020_v45  ;;  %3158 = vmatmul.mubr.f32.vlgmr.msra.gmra.mxu1 %v3020_v45 }
 0xdec   :  { %3211 = vmatpush1.msra.mxu0 %v6200_v53  ;;  %3282 = vmatpush1.msra.mxu1 %v6206_v40  ;;  %v7389_v53 = vld [vmem:[#allocation20_spill] sm:$0xff]  ;;  %v7390_v40 = vld [vmem:[#allocation29_spill] sm:$0xff] }
 0xded   :  { %3212 = vmatprep.subr.mxu0 %v6212_v44  ;;  %3283 = vmatprep.subr.mxu1 %v6218_v13  ;;  %v7391_v44 = vld [vmem:[#allocation11_spill] sm:$0xff] }
 0xdee   :  { %3213 = vmatpush1.msra.mxu0 %v6224_v60  ;;  %3284 = vmatpush1.msra.mxu1 %v6230_v15  ;;  %v7392_v13 = vld [vmem:[#allocation35_spill] sm:$0xff]  ;;  %v7393_v60 = vld [vmem:[#allocation17_spill] sm:$0xff]  ;;  %v7394_v15 = vld [vmem:[#allocation12_spill] sm:$0xff] }
 0xdef   :  { %3214 = vmatprep.subr.mxu0 %v6236_v21  ;;  %3285 = vmatprep.subr.mxu1 %v6242_v24  ;;  %v7395_v21 = vld [vmem:[#allocation33_spill] sm:$0xff]  ;;  %v7396_v24 = vld [vmem:[#allocation34_spill] sm:$0xff] }
 0xdf0   :  { %3215 = vmatpush1.msra.mxu0 %v6337_v42  ;;  %3286 = vmatpush1.msra.mxu1 %v6343_v59  ;;  %v7397_v42 = vld [vmem:[#allocation41_spill] sm:$0xff]  ;;  %v7398_v59 = vld [vmem:[#allocation19_spill] sm:$0xff] }
 0xdf1   :  { %3216 = vmatprep.subr.mxu0 %v6349_v9  ;;  %3287 = vmatprep.subr.mxu1 %v6355_v57  ;;  %v7399_v9 = vld [vmem:[#allocation13_spill] sm:$0xff] }
 0xdf2   :  { %3217 = vmatpush1.msra.mxu0 %v6361_v25  ;;  %3288 = vmatpush1.msra.mxu1 %v6367_v17  ;;  %v7400_v57 = vld [vmem:[#allocation21_spill] sm:$0xff]  ;;  %v7401_v25 = vld [vmem:[#allocation14_spill] sm:$0xff]  ;;  %v7402_v17 = vld [vmem:[#allocation23_spill] sm:$0xff] }
 0xdf3   :  { %3218 = vmatprep.subr.mxu0 %v6373_v50  ;;  %3289 = vmatprep.subr.mxu1 %v6379_v56  ;;  %v7403_v50 = vld [vmem:[#allocation30_spill] sm:$0xff]  ;;  %v7404_v56 = vld [vmem:[#allocation15_spill] sm:$0xff] }
 0xdf4   :  { %3219 = vmatpush1.msra.mxu0 %v6385_v1  ;;  %3290 = vmatpush1.msra.mxu1 %v6391_v2  ;;  %v7405_v1 = vld [vmem:[#allocation24_spill] sm:$0xff]  ;;  %v7406_v2 = vld [vmem:[#allocation25_spill] sm:$0xff] }
 0xdf5   :  { %3220 = vmatprep.subr.mxu0 %v6397_v3  ;;  %3291 = vmatprep.subr.mxu1 %v6403_v5  ;;  %v7407_v3 = vld [vmem:[#allocation31_spill] sm:$0xff]  ;;  %v7408_v5 = vmov 0.0  }
 0xdf6   :  { %3221 = vmatpush1.msra.mxu0 %v6409_v6  ;;  %3292 = vmatpush1.msra.mxu1 %v6415_v7  ;;  %v7409_v6 = vld [vmem:[#allocation16_spill] sm:$0xff] }
 0xdf7   :  { %3222 = vmatprep.subr.mxu0 %v6421_v8  ;;  %3293 = vmatprep.subr.mxu1 %v6427_v10 }
 0xdf8   :  { %3223 = vmatpush1.msra.mxu0 %v6433_v11  ;;  %3294 = vmatpush1.msra.mxu1 %v6439_v12 }
 0xdf9   :  { %3224 = vmatprep.subr.mxu0 %v6445_v14  ;;  %3295 = vmatprep.subr.mxu1 %v6451_v18 }
 0xdfa   :  { %3225 = vmatpush1.msra.mxu0 %v6457_v28  ;;  %3296 = vmatpush1.msra.mxu1 %v6463_v29 }
 0xdfb   :  { %3226 = vmatprep.subr.mxu0 %v6469_v30  ;;  %3297 = vmatprep.subr.mxu1 %v6475_v31 }
 0xdfc   :  { %3227 = vmatpush1.msra.mxu0 %v6481_v32  ;;  %3298 = vmatpush1.msra.mxu1 %v6487_v33 }
 0xdfd   :  { %3228 = vmatprep.subr.mxu0 %v6493_v34  ;;  %3299 = vmatprep.subr.mxu1 %v6499_v35 }
 0xdfe   :  { %3229 = vmatpush1.msra.mxu0 %v6505_v36  ;;  %3300 = vmatpush1.msra.mxu1 %v6511_v37 }
 0xdff   :  { %3230 = vmatprep.subr.mxu0 %v6517_v38  ;;  %3301 = vmatprep.subr.mxu1 %v6523_v39 }
 0xe00   :  { %3231 = vmatpush1.msra.mxu0 %v6529_v41  ;;  %3302 = vmatpush1.msra.mxu1 %v6535_v43 }
 0xe01   :  { %3232 = vmatprep.subr.mxu0 %v7389_v53  ;;  %3303 = vmatprep.subr.mxu1 %v7390_v40 }
 0xe02   :  { %3233 = vmatpush1.msra.mxu0 %v7391_v44  ;;  %3304 = vmatpush1.msra.mxu1 %v7392_v13 }
 0xe03   :  { %3234 = vmatprep.subr.mxu0 %v7393_v60  ;;  %3305 = vmatprep.subr.mxu1 %v7394_v15 }
 0xe04   :  { %3235 = vmatpush1.msra.mxu0 %v7395_v21  ;;  %3306 = vmatpush1.msra.mxu1 %v7396_v24 }
 0xe05   :  { %3236 = vmatprep.subr.mxu0 %v7397_v42  ;;  %3307 = vmatprep.subr.mxu1 %v7398_v59 }
 0xe06   :  { %3237 = vmatpush1.msra.mxu0 %v7399_v9  ;;  %3308 = vmatpush1.msra.mxu1 %v7400_v57 }
 0xe07   :  { %3238 = vmatprep.subr.mxu0 %v7401_v25  ;;  %3309 = vmatprep.subr.mxu1 %v7402_v17 }
 0xe08   :  { %3239 = vmatpush1.msra.mxu0 %v7403_v50  ;;  %3310 = vmatpush1.msra.mxu1 %v7404_v56 }
 0xe09   :  { %3240 = vmatprep.subr.mxu0 %v7405_v1  ;;  %3311 = vmatprep.subr.mxu1 %v7406_v2 }
 0xe0a   :  { %3241 = vmatpush1.msra.mxu0 %v7407_v3  ;;  %3274 = vmatprep.mubr.f32.mxu0 %v7408_v5 }
 0xe0b   :  { %3312 = vmatpush1.msra.mxu1 %v7409_v6  ;;  %3345 = vmatprep.mubr.f32.mxu1 %v7408_v5 }
 0xeab   :  { %v3088_v7 = vpop.f32.mrf.mxu0  ;;  %v3159_v12 = vpop.f32.mrf.mxu1 }
 0xeac   :  { %v3168_v8 = vrot.slane %v3088_v7, 4  ;;  %v3170_v33 = vrot.slane %v3159_v12, 4 }
 0xead   :  { %v3090_v10 = vpop.f32.mrf.mxu0  ;;  %v3161_v30 = vpop.f32.mrf.mxu1 }
 0xeae   :  { %v3176_v11 = vadd.f32 %v3168_v8, %v7386_v26  ;;  %v3169_v14 = vrot.slane %v3090_v10, 4  ;;  %v3171_v31 = vrot.slane %v3161_v30, 4  ;;  %v3178_v36 = vadd.f32 %v3170_v33, %v6679_v49 }
 0xeb0   :  { %v3550_v18 = vmul.f32 -1.442695, %v3176_v11  ;;  %v3177_v28 = vadd.f32 %v3169_v14, %v7387_v54  ;;  %v3179_v32 = vadd.f32 %v3171_v31, %v7388_v62 }
 0xeb2   :  { %3786 = vpow2.f32 %v3550_v18  ;;  %v3551_v29 = vmul.f32 -1.442695, %v3177_v28  ;;  %v3552_v34 = vmul.f32 -1.442695, %v3179_v32 }
 0xeb4   :  { %3788 = vpow2.f32 %v3551_v29 }
 0xeb5   :  { %3790 = vpow2.f32 %v3552_v34 }
 0xebf   :  { %v3787_v35 = vpop.eup %3786 }
 0xec0   :  { %v3183_v37 = vadd.f32 1.0, %v3787_v35 }
 0xec1   :  { %v3789_v38 = vpop.eup %3788 }
 0xec2   :  { %3792 = vrcp.f32 %v3183_v37  ;;  %v3189_v39 = vadd.f32 1.0, %v3789_v38  ;;  %v3791_v41 = vpop.eup %3790 }
 0xec3   :  { %3794 = vtanh.f32 %v3178_v36  ;;  %v3196_v20 = vadd.f32 1.0, %v3791_v41 }
 0xec4   :  { %3796 = vrcp.f32 %v3189_v39 }
 0xec5   :  { %3798 = vrcp.f32 %v3196_v20 }
 0xecf   :  { %v3793_v43 = vpop.eup %3792 }
 0xed0   :  { %v3795_v61 = vpop.eup %3794 }
 0xed1   :  { %v3797_v4 = vpop.eup %3796  ;;  %v3203_v22 = vmul.f32 %v3795_v61, %v3793_v43 }
 0xed2   :  { %v3202_v46 = vmul.f32 %v3797_v4, %v3200_v19  ;;  %v3799_v27 = vpop.eup %3798 }
 0xed4   :  { %v3204_v63 = vadd.f32 %v3203_v22, %v3202_v46 }
 0xed6   :  { %3800 = vtanh.f32 %v3204_v63  ;;  %v3388_v1 = vrot.slane %v3204_v63, 6 }
 0xee3   :  { %v3801_v52 = vpop.eup %3800 }
 0xee4   :  { %v3206_v48 = vmul.f32 %v3801_v52, %v3799_v27 }
 0xee6   :  { %v3208_v55 = vrot.slane %v3206_v48, 4  ;;  %v3396_v23 = vsel %vm836_vm1, %v3395_v58, %v3206_v48 }
 0xee8   :  { %3275 = vmatmul.mubr.f32.vlgmr.msra.gmra.mxu0 %v3208_v55  ;;  %3346 = vmatmul.mubr.f32.vlgmr.msra.gmra.mxu1 %v3208_v55 }
 0xfa8   :  { %v3276_v0 = vpop.f32.mrf.mxu0  ;;  %v3347_v40 = vpop.f32.mrf.mxu1 }
 0xfa9   :  { %v3356_v51 = vrot.slane %v3276_v0, 2  ;;  %v3358_v42 = vrot.slane %v3347_v40, 2 }
 0xfaa   :  { %v3278_v45 = vpop.f32.mrf.mxu0  ;;  %v3349_v21 = vpop.f32.mrf.mxu1 }
 0xfab   :  { %v3364_v53 = vadd.f32 %v3356_v51, %v7386_v26  ;;  %v3357_v44 = vrot.slane %v3278_v45, 2  ;;  %v3359_v47 = vrot.slane %v3349_v21, 2  ;;  %v3366_v57 = vadd.f32 %v3358_v42, %v6679_v49 }
 0xfad   :  { %v3553_v13 = vmul.f32 -1.442695, %v3364_v53  ;;  %v3365_v60 = vadd.f32 %v3357_v44, %v7387_v54  ;;  %v3367_v24 = vadd.f32 %v3359_v47, %v7388_v62 }
 0xfaf   :  { %3802 = vpow2.f32 %v3553_v13  ;;  %v3554_v15 = vmul.f32 -1.442695, %v3365_v60  ;;  %v3555_v59 = vmul.f32 -1.442695, %v3367_v24 }
 0xfb1   :  { %3804 = vpow2.f32 %v3554_v15 }
 0xfb2   :  { %3806 = vpow2.f32 %v3555_v59 }
 0xfbc   :  { %v3803_v9 = vpop.eup %3802 }
 0xfbd   :  { %v3371_v25 = vadd.f32 1.0, %v3803_v9 }
 0xfbe   :  { %v3805_v17 = vpop.eup %3804 }
 0xfbf   :  { %3808 = vrcp.f32 %v3371_v25  ;;  %v3377_v26 = vadd.f32 1.0, %v3805_v17  ;;  %v3807_v54 = vpop.eup %3806 }
 0xfc0   :  { %3810 = vtanh.f32 %v3366_v57  ;;  %v3384_v3 = vadd.f32 1.0, %v3807_v54 }
 0xfc1   :  { %3812 = vrcp.f32 %v3377_v26 }
 0xfc2   :  { %3814 = vrcp.f32 %v3384_v3 }
 0xfcc   :  { %v3809_v50 = vpop.eup %3808 }
 0xfcd   :  { %v3811_v56 = vpop.eup %3810 }
 0xfce   :  { %v3813_v2 = vpop.eup %3812  ;;  %v3391_v62 = vmul.f32 %v3811_v56, %v3809_v50 }
 0xfcf   :  { %v3390_v5 = vmul.f32 %v3813_v2, %v3388_v1 }
 0xfd1   :  { %v3392_v6 = vadd.f32 %v3391_v62, %v3390_v5 }
 0xfd3   :  { %3401 = vst [vmem:[#allocation6 - $0x4] sm:$0xc0] %v3392_v6  ;;  %3816 = vtanh.f32 %v3392_v6 }
 0xfd4   :  { %3961 = shalt.err (!%p3958_p4)
}
 0xfd5   :  { %s3996_s22 = smov 32   ;;  %s3997_s0 = smov 2   ;;  %v3815_v49 = vpop.eup %3814 }
 0xfd6   :  { %3427 = dma.vmem_to_hbm [thread:$0]  %s3422_s20, 64, %s6860_s6, [#allocation7], %s3996_s22, %s3996_s22, %s3997_s0  }
 0xfd7   :  { %s3998_s24 = smov [#allocation4]  }
 0xfd8   :  { %s3409_s25 = sshll.u32 %s3998_s24, 4  ;;  %s3410_s25 = int_to_ptr.vmem [resolvable:$true] %s3409_s25 }
 0xfd9   :  { %s3970_s28 = scalar_lea.vmem %s3410_s25, 64  ;;  %p3975_p6 = scmp.lt.s32.totalorder %s3410_s25, %s3410_s25 }
 0xfda   :  { %p3971_p5 = scmp.ne.s32.totalorder %s3410_s25, %s3970_s28  ;;  %p3976_p7 = scmp.lt.s32.totalorder %s3970_s28, %s3970_s28 }
 0xfdc   :  { %p3977_p8 = por %p3976_p7, %p3975_p6 }
 0xfde   :  { %p3978_p9 = pnand %p3977_p8, %p3971_p5 }
 0xfe0   :  { %v3817_v7 = vpop.eup %3816 }
 0xfe1   :  { %v3394_v8 = vmul.f32 %v3817_v7, %v3815_v49 }
 0xfe3   :  { %v3397_v10 = vsel %vm838_vm2, %v3396_v23, %v3394_v8  ;;  %3400 = vst [vmem:[#allocation4 - $0x4] sm:$0xc0] %v3394_v8 }
 0xfe4   :  { %3556 = vst [vmem:[%s6858_s4 + $0x8] sm:$0xff] %v3397_v10 }
 0xfe5   :  { %3981 = shalt.err (!%p3978_p9)
}
 0xfe6   :  { %3415 = dma.vmem_to_hbm [thread:$0]  %s3410_s25, 64, %s6859_s5, [#allocation5], %s3996_s22, %s3996_s22, %s3997_s0  }
 0xfe7   :  { %3990 = dma.done.wait [#allocation5], 64  }
 0xfe8   :  { %3991 = vsyncadd [#allocation5], 4294967232 }
 0xfe9   :  { %3992 = dma.done.wait [#allocation7], 64  }
 0xfea   :  { %3993 = vsyncadd [#allocation7], 4294967232 }
 0xfeb   :  { %3436 = vsyncpa [#allocation5], 1 }
 0xfec   :  { %3437 = vsyncpa [#allocation7], 1 }

</bundles_post_ra>
